<compile_context>
chip_gen: v6e
topology: v6e:2x2x1
jax: 0.10.0
libtpu: 0.0.40
codegen_flags: <defaults>
</compile_context>

<pallas_src>
import numpy as np
import jax
import jax.numpy as jnp
from jax.experimental import pallas as pl
from jax.experimental.pallas import tpu as pltpu

C_HIDDEN = 256  # 128 * 2
KSIZE = 3
_INV_SQRT2 = np.float32(1.0 / np.sqrt(2.0))


def _net_kernel(xs_ref, w1b_ref, w2_ref, out_ref):
    # xs_ref : (4, TB*Lp)    rows = [x(l-1), x(l), x(l+1), ones]
    # w1b_ref: (C_HIDDEN, 4) conv1 weight with bias folded in as 4th column
    # w2_ref : (1, C_HIDDEN) conv2 (1x1) weight
    # out_ref: (1, TB*Lp)
    h = jnp.dot(w1b_ref[...], xs_ref[...],
                preferred_element_type=jnp.float32)              # (C, TB*Lp)
    # Exact GELU (matches torch.nn.GELU default): 0.5*x*(1+erf(x/sqrt(2)))
    g = 0.5 * h * (1.0 + jax.lax.erf(h * _INV_SQRT2))
    out_ref[...] = jnp.dot(w2_ref[...], g,
                           preferred_element_type=jnp.float32
                           ).astype(out_ref.dtype)               # (1, TB*Lp)


def _choose_tb(n, l_pad, vmem_budget_bytes=8 << 20):
    """Batch rows per grid step.

    Fit the dominant (C_HIDDEN, TB*Lp) f32 hidden activation in a budget that
    is safe even on v7x's smaller VMEM, and keep >= 2 grid steps when possible
    so v7x's two TensorCores can both be used.
    """
    max_tb = max(1, vmem_budget_bytes // (C_HIDDEN * l_pad * 4))
    tb = max(1, min(n, max_tb))
    if n >= 2 and pl.cdiv(n, tb) < 2:
        tb = pl.cdiv(n, 2)
    return int(tb)


def net_forward(x, w1, b1, w2):
    """x: (N, 1, L) float32; w1: (C,3); b1: (C,); w2: (C,). -> (N, 1, L)."""
    N, Cin, L = x.shape
    assert Cin == 1
    x2d = x[:, 0, :].astype(jnp.float32)                         # (N, L)

    # Replicate ("edge") padding + pre-shifted k=3 taps (glue, plain JAX).
    xpad = jnp.pad(x2d, ((0, 0), (1, 1)), mode="edge")           # (N, L+2)
    taps = jnp.stack([xpad[:, 0:L], xpad[:, 1:L + 1], xpad[:, 2:L + 2]],
                     axis=0)                                     # (3, N, L)

    # Pad L to a lane multiple and N to a multiple of TB; padded lanes compute
    # independent garbage that is sliced off afterwards.
    L_pad = 128 * pl.cdiv(L, 128)
    TB = _choose_tb(N, L_pad)
    N_pad = TB * pl.cdiv(N, TB)
    taps = jnp.pad(taps, ((0, 0), (0, N_pad - N), (0, L_pad - L)))
    ones = jnp.ones((1, N_pad, L_pad), jnp.float32)              # folds bias
    xs = jnp.concatenate([taps, ones], axis=0).reshape(4, N_pad * L_pad)

    w1b = jnp.concatenate(
        [w1.astype(jnp.float32),
         b1.astype(jnp.float32).reshape(C_HIDDEN, 1)], axis=1)   # (C, 4)
    w2_row = w2.astype(jnp.float32).reshape(1, C_HIDDEN)         # (1, C)

    lanes = TB * L_pad
    grid = (N_pad // TB,)

    cost = pl.CostEstimate(
        flops=int(N_pad * L_pad * C_HIDDEN * (2 * 4 + 2) + 4 * N_pad * L_pad * C_HIDDEN),
        transcendentals=int(N_pad * L_pad * C_HIDDEN),
        bytes_accessed=int(4 * (5 * N_pad * L_pad + C_HIDDEN * 5)),
    )

    y_flat = pl.pallas_call(
        _net_kernel,
        out_shape=jax.ShapeDtypeStruct((1, N_pad * L_pad), jnp.float32),
        grid=grid,
        in_specs=[
            pl.BlockSpec((4, lanes), lambda n: (0, n)),
            pl.BlockSpec((C_HIDDEN, 4), lambda n: (0, 0)),
            pl.BlockSpec((1, C_HIDDEN), lambda n: (0, 0)),
        ],
        out_specs=pl.BlockSpec((1, lanes), lambda n: (0, n)),
        compiler_params=pltpu.CompilerParams(
            dimension_semantics=("parallel",)),
        cost_estimate=cost,
    )(xs, w1b, w2_row)

    y = y_flat.reshape(N_pad, L_pad)[:N, :L].reshape(N, 1, L)
    return y


def net_forward_ref(x, w1, b1, w2):
    """Pure-JAX reference (mirrors the PyTorch forward)."""
    N, _, L = x.shape
    xpad = jnp.pad(x, ((0, 0), (0, 0), (1, 1)), mode="edge")
    cols = jnp.stack([xpad[:, 0, k:k + L] for k in range(KSIZE)], axis=-1)  # (N, L, 3)
    h = jnp.einsum("nlk,ck->ncl", cols, w1) + b1[None, :, None]             # (N, C, L)
    g = 0.5 * h * (1.0 + jax.lax.erf(h / jnp.sqrt(2.0)))
    y = jnp.einsum("ncl,c->nl", g, w2)[:, None, :]                          # (N, 1, L)
    return y


if __name__ == "__main__":
    key = jax.random.PRNGKey(0)
    k_x, k_w1, k_b1, k_w2 = jax.random.split(key, 4)

    # Small but non-trivial: L not a multiple of 128 to exercise padding,
    # N > TB so the batched grid has >= 2 steps.
    N, L = 6, 200
    x = jax.random.normal(k_x, (N, 1, L), dtype=jnp.float32)

    # Deterministic parameter init (shapes from nn.Conv1d defs; uniform like
    # PyTorch's default bound = 1/sqrt(fan_in)).
    bound1 = 1.0 / np.sqrt(1 * KSIZE)
    w1 = jax.random.uniform(k_w1, (C_HIDDEN, KSIZE), jnp.float32,
                            -bound1, bound1)   # Conv1d(1,256,3) weight (in_ch squeezed)
    b1 = jax.random.uniform(k_b1, (C_HIDDEN,), jnp.float32, -bound1, bound1)
    bound2 = 1.0 / np.sqrt(C_HIDDEN * 1)
    w2 = jax.random.uniform(k_w2, (C_HIDDEN,), jnp.float32,
                            -bound2, bound2)   # Conv1d(256,1,1,bias=False) weight (squeezed)

    y = jax.block_until_ready(net_forward(x, w1, b1, w2))
    y_ref = net_forward_ref(x, w1, b1, w2)

    assert y.shape == (N, 1, L)
    assert jnp.allclose(y, y_ref, atol=1e-5, rtol=1e-5), "mismatch vs reference"

    print("KERNEL_OK")
</pallas_src>

<mosaic_0001>
module attributes {stable_mosaic.version = 11 : i64} {
  func.func @_net_kernel(%arg0: i32, %arg1: memref<4x768xf32, #tpu.memory_space<vmem>>, %arg2: memref<256x4xf32, #tpu.memory_space<vmem>>, %arg3: memref<1x256xf32, #tpu.memory_space<vmem>>, %arg4: memref<1x768xf32, #tpu.memory_space<vmem>>) attributes {dimension_semantics = [#tpu.dimension_semantics<parallel>], iteration_bounds = array<i64: 2>, scalar_prefetch = 0 : i64, scratch_operands = 0 : i64, tpu.core_type = #tpu.core_type<tc>, window_params = [{transform_indices = @transform_0, window_bounds = array<i64: 4, 768>}, {pipeline_mode = #tpu.pipeline_mode<synchronous>, transform_indices = @transform_1, window_bounds = array<i64: 256, 4>}, {pipeline_mode = #tpu.pipeline_mode<synchronous>, transform_indices = @transform_2, window_bounds = array<i64: 1, 256>}, {transform_indices = @transform_3, window_bounds = array<i64: 1, 768>}]} {
    %c0 = arith.constant 0 : index
    %c0_0 = arith.constant 0 : index
    %0 = vector.load %arg2[%c0, %c0_0] : memref<256x4xf32, #tpu.memory_space<vmem>>, vector<256x4xf32>
    %c0_1 = arith.constant 0 : index
    %c0_2 = arith.constant 0 : index
    %1 = vector.load %arg1[%c0_1, %c0_2] : memref<4x768xf32, #tpu.memory_space<vmem>>, vector<4x768xf32>
    %cst = arith.constant dense<0.000000e+00> : vector<256x768xf32>
    %2 = tpu.matmul %0, %1, %cst {dimension_numbers = #tpu.dot_dimension_numbers<[1], [0], [0], [1], [0, 0, 1, 1], [], []>} : vector<256x4xf32>, vector<4x768xf32>, vector<256x768xf32> -> vector<256x768xf32>
    %cst_3 = arith.constant 5.000000e-01 : f32
    %3 = vector.broadcast %cst_3 : f32 to vector<256x768xf32>
    %4 = arith.mulf %3, %2 : vector<256x768xf32>
    %cst_4 = arith.constant 0.707106769 : f32
    %5 = vector.broadcast %cst_4 : f32 to vector<256x768xf32>
    %6 = arith.mulf %2, %5 : vector<256x768xf32>
    %7 = math.erf %6 : vector<256x768xf32>
    %cst_5 = arith.constant 1.000000e+00 : f32
    %8 = vector.broadcast %cst_5 : f32 to vector<256x768xf32>
    %9 = arith.addf %8, %7 : vector<256x768xf32>
    %10 = arith.mulf %4, %9 : vector<256x768xf32>
    %c0_6 = arith.constant 0 : index
    %c0_7 = arith.constant 0 : index
    %11 = vector.load %arg3[%c0_6, %c0_7] : memref<1x256xf32, #tpu.memory_space<vmem>>, vector<1x256xf32>
    %cst_8 = arith.constant dense<0.000000e+00> : vector<1x768xf32>
    %12 = tpu.matmul %11, %10, %cst_8 {dimension_numbers = #tpu.dot_dimension_numbers<[1], [0], [0], [1], [0, 0, 1, 1], [], []>} : vector<1x256xf32>, vector<256x768xf32>, vector<1x768xf32> -> vector<1x768xf32>
    %c0_9 = arith.constant 0 : index
    %c0_10 = arith.constant 0 : index
    %13 = vector.load %arg4[%c0_9, %c0_10] : memref<1x768xf32, #tpu.memory_space<vmem>>, vector<1x768xf32>
    tpu.vector_store %arg4[%c0_9, %c0_10], %12 {strides = array<i32>} : memref<1x768xf32, #tpu.memory_space<vmem>>, vector<1x768xf32>,
    return
  }
  func.func @transform_0(%arg0: i32) -> (i32, i32) {
    %c0_i32 = arith.constant 0 : i32
    %c0_i32_0 = arith.constant 0 : i32
    return %c0_i32, %arg0 : i32, i32
  }
  func.func @transform_1(%arg0: i32) -> (i32, i32) {
    %c0_i32 = arith.constant 0 : i32
    %c0_i32_0 = arith.constant 0 : i32
    %c0_i32_1 = arith.constant 0 : i32
    return %c0_i32, %c0_i32_0 : i32, i32
  }
  func.func @transform_2(%arg0: i32) -> (i32, i32) {
    %c0_i32 = arith.constant 0 : i32
    %c0_i32_0 = arith.constant 0 : i32
    %c0_i32_1 = arith.constant 0 : i32
    return %c0_i32, %c0_i32_0 : i32, i32
  }
  func.func @transform_3(%arg0: i32) -> (i32, i32) {
    %c0_i32 = arith.constant 0 : i32
    %c0_i32_0 = arith.constant 0 : i32
    return %c0_i32, %arg0 : i32, i32
  }
}

</mosaic_0001>

<bundles_post_ra>
// kernel: tpu_custom_call.1
= control target key start
LH: loop header
LB: loop body
LE: loop exit
PB: predicated region body
PF: predicated region fallthrough
CT: control target
= control target key end

     0   :  { %8 = vsyncpa [#allocation3], 0  ;;  %s5245_s0 = inlined_call_operand.vmem [shape: f32[4,1536], index: 0, kind: input, shape index: {}]   ;;  %s5246_s1 = inlined_call_operand.vmem [shape: f32[256,4], index: 1, kind: input, shape index: {}]   ;;  %s5247_s2 = inlined_call_operand.vmem [shape: f32[1,256], index: 2, kind: input, shape index: {}]   ;;  %s5248_s3 = inlined_call_operand.hbm [shape: f32[1,1536], index: 3, kind: output, shape index: {}]  }
   0x1   :  { %10 = vsyncpa [#allocation3 + $0x1], 0  ;;  %s3032_s12 = smov 0   ;;  %s3034_s13 = smov 0  }
   0x2   :  { %s3036_s14 = smov 0   ;;  %s3038_s15 = smov 0  }
   0x3 LB: > { %s3053_s16 = sadd.s32 4294967295, %s3007_s15   ;;  %s2405_s17 = sadd.s32 4294967294, %s3007_s15   ;;  %s3007_s15 = sphi %s3038_s15, %s5906_s15   ;;  %s3003_s14 = sphi %s3036_s14, %s5905_s14   ;;  %s2999_s13 = sphi %s3034_s13, %s5904_s13   ;;  %s2995_s12 = sphi %s3032_s12, %s5903_s12  }
   0x4   : > { %s3057_s18 = sadd.s32 1, %s3007_s15   ;;  %s91_s19 = sadd.s32 1, %s3003_s14 }
   0x5   : > { %s88_s20 = ssub.s32 %s3007_s15, %s3057_s18  ;;  %p101_p0 = scmp.ne.s32.totalorder %s3003_s14, %s2999_s13 }
   0x6   : > { %p89_p1 = scmp.eq.s32.totalorder %s88_s20, 0  ;;  %p102_p2 = scmp.eq.s32.totalorder %s3053_s16, 1 }
   0x7   : > { %p107_p3 = scmp.ne.s32.totalorder %s2999_s13, %s2995_s12  ;;  %p108_p4 = scmp.eq.s32.totalorder %s2405_s17, 1 }
   0x8   : > { %s3068_s21 = scalar_select %p89_p1, %s3003_s14, %s91_s19  }
   0x9   : > { %p3070_p5 = por %p102_p2, %p101_p0  ;;  %p3074_p6 = por %p108_p4, %p107_p3 }
   0xa   : > { %p2408_p7 = scmp.ge.s32.totalorder %s3007_s15, 1  ;;  %p141_p8 = scmp.lt.s32.totalorder %s3007_s15, 3 }
   0xc   : > { %p142_p9 = pnand %p2408_p7, %p141_p8 }
   0xe   : > { %145 = sbr.rel (%p142_p9) target bundleno = 746 (0x2ea), region = 32 }
  0x13   : > { %s165_s24 = smul.u32 6, %s3053_s16  ;;  %v3009_v0 = vmov 0.0   ;;  %vm310_vm0 = vcmask 1043456   ;;  %v3089_v5 = vld [vmem:[%s5246_s1] sm:$0xff]  ;;  %vm213_vm1 = vcmask 31744   ;;  %v3109_v9 = vld [vmem:[%s5246_s1 + $0x8] sm:$0xff] }
  0x14   : > { %387 = vmatprep.mubr.f32.mxu0 %v3009_v0  ;;  %531 = vmatprep.mubr.f32.mxu1 %v3009_v0  ;;  %v3094_v6 = vld [vmem:[%s5246_s1 + $0xc0] sm:$0xff]  ;;  %v3114_v10 = vld [vmem:[%s5246_s1 + $0xc8] sm:$0xff]  ;;  %v3129_v11 = vld [vmem:[%s5246_s1 + $0x10] sm:$0xff]  ;;  %s162_s20 = sand.u32 1, %s2999_s13  }
  0x15   : > { %p166_p10 = scmp.lt.s32.totalorder %s165_s24, 11  ;;  %v3134_v12 = vld [vmem:[%s5246_s1 + $0xd0] sm:$0xff]  ;;  %v3145_v13 = vld [vmem:[%s5246_s1 + $0x18] sm:$0xff]  ;;  %v3161_v15 = vld [vmem:[%s5246_s1 + $0x20] sm:$0xff]  ;;  %s2332_s4 = scalar_lea.sflag [#allocation3], %s162_s20 }
  0x16   : > { %v3150_v14 = vld [vmem:[%s5246_s1 + $0xd8] sm:$0xff]  ;;  %v3166_v16 = vld [vmem:[%s5246_s1 + $0xe0] sm:$0xff]  ;;  %v3177_v17 = vld [vmem:[%s5246_s1 + $0x28] sm:$0xff] }
  0x17   : > { %s5908_s24 = smov (!%p166_p10, %s165_s24), 11  ;;  %v3182_v18 = vld [vmem:[%s5246_s1 + $0xe8] sm:$0xff]  ;;  %v3193_v19 = vld [vmem:[%s5246_s1 + $0x30] sm:$0xff]  ;;  %v3209_v21 = vld [vmem:[%s5246_s1 + $0x38] sm:$0xff] }
  0x18   : > { %s2409_s25 = sshll.u32 %s5908_s24, 2  ;;  %v3198_v20 = vld [vmem:[%s5246_s1 + $0xf0] sm:$0xff]  ;;  %v3214_v22 = vld [vmem:[%s5246_s1 + $0xf8] sm:$0xff]  ;;  %v3225_v23 = vld [vmem:[%s5246_s1 + $0x40] sm:$0xff]  ;;  %s2518_s24 = smul.u32 6, %s162_s20 }
  0x19   : > { %s169_s28 = scalar_lea.vmem %s5245_s0, %s2409_s25  ;;  %v3236_v24 = vld [vmem:[%s5246_s1 + $0x48] sm:$0xff]  ;;  %v3247_v25 = vld [vmem:[%s5246_s1 + $0x50] sm:$0xff]  ;;  %v3258_v26 = vld [vmem:[%s5246_s1 + $0x58] sm:$0xff]  ;;  %s2515_s25 = smul.u32 96, %s3053_s16 }
  0x1a   : > { %v204_v1 = vld [vmem:[%s169_s28] sm:$0xff]  ;;  %v205_v2 = vld [vmem:[%s169_s28 + $0x8] sm:$0xff]  ;;  %v206_v3 = vld [vmem:[%s169_s28 + $0x10] sm:$0xff]  ;;  %s164_s26 = scalar_lea.vmem [#allocation2], %s2518_s24  ;;  %s3011_s16 = smov [#allocation2]  }
  0x1b   : > { %v210_v4 = vcombine.high %v204_v1, %v204_v1  ;;  %v211_v7 = vcombine.high %v205_v2, %v205_v2  ;;  %v212_v8 = vcombine.high %v206_v3, %v206_v3  ;;  %v3269_v27 = vld [vmem:[%s5246_s1 + $0x60] sm:$0xff]  ;;  %v3280_v28 = vld [vmem:[%s5246_s1 + $0x68] sm:$0xff]  ;;  %v3291_v29 = vld [vmem:[%s5246_s1 + $0x70] sm:$0xff]  ;;  %s2346_s27 = sshll.u32 %s164_s26, 4  ;;  %s2344_s30 = scalar_lea.hbm %s5248_s3, %s2515_s25  ;;  %s2347_s27 = int_to_ptr.vmem [resolvable:$true] %s2346_s27 }
  0x1c   : > { %v3302_v30 = vld [vmem:[%s5246_s1 + $0x78] sm:$0xff]  ;;  %v3313_v31 = vld [vmem:[%s5246_s1 + $0x80] sm:$0xff]  ;;  %v3324_v32 = vld [vmem:[%s5246_s1 + $0x88] sm:$0xff]  ;;  %s2947_s5 = scalar_lea.vmem %s2347_s27, 96  ;;  %s2951_s6 = sshll.u32 %s3011_s16, 4  ;;  %s2952_s6 = int_to_ptr.vmem [resolvable:$false] %s2951_s6 }
  0x1d   : > { %2410 = vmatprep.subr.msk.mxu0 %vm310_vm0, %v210_v4  ;;  %2516 = vmatprep.subr.msk.mxu1 %vm310_vm0, %v210_v4  ;;  %v3335_v33 = vld [vmem:[%s5246_s1 + $0x90] sm:$0xff]  ;;  %v3346_v34 = vld [vmem:[%s5246_s1 + $0x98] sm:$0xff]  ;;  %v3357_v35 = vld [vmem:[%s5246_s1 + $0xa0] sm:$0xff]  ;;  %p2948_p11 = scmp.ne.s32.totalorder %s2347_s27, %s2947_s5  ;;  %s2953_s7 = scalar_lea.vmem %s2952_s6, 192 }
  0x1e   : > { %2411 = vmatpush1.msk.msra.mxu0 %vm310_vm0, %v204_v1  ;;  %2517 = vmatpush1.msk.msra.mxu1 %vm310_vm0, %v204_v1  ;;  %v3368_v36 = vld [vmem:[%s5246_s1 + $0xa8] sm:$0xff]  ;;  %v3379_v37 = vld [vmem:[%s5246_s1 + $0xb0] sm:$0xff]  ;;  %v3390_v38 = vld [vmem:[%s5246_s1 + $0xb8] sm:$0xff]  ;;  %p2954_p0 = scmp.lt.s32.totalorder %s2347_s27, %s2952_s6  ;;  %p2955_p1 = scmp.lt.s32.totalorder %s2953_s7, %s2947_s5 }
  0x1f   : > { %2412 = vmatmul.mubr.msk.f32.vlgmr.msra.gmra.mxu0 %vm213_vm1, %v3089_v5  ;;  %2436 = vmatmul.mubr.msk.f32.vlgmr.msra.gmra.mxu1 %vm213_vm1, %v3094_v6  ;;  %p2949_p12 = pnand %p2948_p11, %p3070_p5 }
  0x20   : > { %393 = vmatprep.mubr.f32.mxu0 %v3009_v0  ;;  %537 = vmatprep.mubr.f32.mxu1 %v3009_v0  ;;  %p2956_p2 = por %p2955_p1, %p2954_p0 }
  0x21   : > { %2444 = vmatprep.subr.msk.mxu1 %vm310_vm0, %v211_v7  ;;  %2478 = vmatprep.subr.msk.mxu0 %vm310_vm0, %v212_v8  ;;  %p2950_p13 = pneg %p2949_p12 }
  0x22   : > { %2445 = vmatpush1.msk.msra.mxu1 %vm310_vm0, %v205_v2  ;;  %2479 = vmatpush1.msk.msra.mxu0 %vm310_vm0, %v206_v3 }
  0x23   : > { %2413 = vmatmul.mubr.msk.f32.gmra.mxu0 %vm213_vm1, %v3109_v9  ;;  %2437 = vmatmul.mubr.msk.f32.gmra.mxu1 %vm213_vm1, %v3114_v10  ;;  %p2957_p3 = pnand %p2956_p2, %p2950_p13 }
  0x24   : > { %399 = vmatprep.mubr.f32.mxu0 %v3009_v0  ;;  %543 = vmatprep.mubr.f32.mxu1 %v3009_v0 }
  0x27   : > { %2414 = vmatmul.mubr.msk.f32.gmra.mxu0 %vm213_vm1, %v3129_v11  ;;  %2438 = vmatmul.mubr.msk.f32.gmra.mxu1 %vm213_vm1, %v3134_v12 }
  0x28   : > { %405 = vmatprep.mubr.f32.mxu0 %v3009_v0  ;;  %549 = vmatprep.mubr.f32.mxu1 %v3009_v0 }
  0x2b   : > { %2415 = vmatmul.mubr.msk.f32.gmra.mxu0 %vm213_vm1, %v3145_v13  ;;  %2439 = vmatmul.mubr.msk.f32.gmra.mxu1 %vm213_vm1, %v3150_v14 }
  0x2c   : > { %411 = vmatprep.mubr.f32.mxu0 %v3009_v0  ;;  %555 = vmatprep.mubr.f32.mxu1 %v3009_v0 }
  0x2f   : > { %2416 = vmatmul.mubr.msk.f32.gmra.mxu0 %vm213_vm1, %v3161_v15  ;;  %2440 = vmatmul.mubr.msk.f32.gmra.mxu1 %vm213_vm1, %v3166_v16 }
  0x30   : > { %417 = vmatprep.mubr.f32.mxu0 %v3009_v0  ;;  %561 = vmatprep.mubr.f32.mxu1 %v3009_v0 }
  0x33   : > { %2417 = vmatmul.mubr.msk.f32.gmra.mxu0 %vm213_vm1, %v3177_v17  ;;  %2441 = vmatmul.mubr.msk.f32.gmra.mxu1 %vm213_vm1, %v3182_v18 }
  0x34   : > { %423 = vmatprep.mubr.f32.mxu0 %v3009_v0  ;;  %567 = vmatprep.mubr.f32.mxu1 %v3009_v0 }
  0x37   : > { %2418 = vmatmul.mubr.msk.f32.gmra.mxu0 %vm213_vm1, %v3193_v19  ;;  %2442 = vmatmul.mubr.msk.f32.gmra.mxu1 %vm213_vm1, %v3198_v20 }
  0x38   : > { %429 = vmatprep.mubr.f32.mxu0 %v3009_v0  ;;  %573 = vmatprep.mubr.f32.mxu1 %v3009_v0 }
  0x3b   : > { %2419 = vmatmul.mubr.msk.f32.gmra.mxu0 %vm213_vm1, %v3209_v21  ;;  %2443 = vmatmul.mubr.msk.f32.gmra.mxu1 %vm213_vm1, %v3214_v22 }
  0x3c   : > { %435 = vmatprep.mubr.f32.mxu0 %v3009_v0  ;;  %644 = vmatprep.mubr.f32.mxu1 %v3009_v0 }
  0x3f   : > { %2420 = vmatmul.mubr.msk.f32.gmra.mxu0 %vm213_vm1, %v3225_v23  ;;  %2446 = vmatmul.mubr.msk.f32.vlgmr.msra.gmra.mxu1 %vm213_vm1, %v3089_v5 }
  0x40   : > { %441 = vmatprep.mubr.f32.mxu0 %v3009_v0  ;;  %650 = vmatprep.mubr.f32.mxu1 %v3009_v0 }
  0x43   : > { %2421 = vmatmul.mubr.msk.f32.gmra.mxu0 %vm213_vm1, %v3236_v24  ;;  %2447 = vmatmul.mubr.msk.f32.gmra.mxu1 %vm213_vm1, %v3109_v9 }
  0x44   : > { %447 = vmatprep.mubr.f32.mxu0 %v3009_v0  ;;  %656 = vmatprep.mubr.f32.mxu1 %v3009_v0 }
  0x47   : > { %2422 = vmatmul.mubr.msk.f32.gmra.mxu0 %vm213_vm1, %v3247_v25  ;;  %2448 = vmatmul.mubr.msk.f32.gmra.mxu1 %vm213_vm1, %v3129_v11 }
  0x48   : > { %453 = vmatprep.mubr.f32.mxu0 %v3009_v0  ;;  %662 = vmatprep.mubr.f32.mxu1 %v3009_v0 }
  0x4b   : > { %2423 = vmatmul.mubr.msk.f32.gmra.mxu0 %vm213_vm1, %v3258_v26  ;;  %2449 = vmatmul.mubr.msk.f32.gmra.mxu1 %vm213_vm1, %v3145_v13 }
  0x4c   : > { %459 = vmatprep.mubr.f32.mxu0 %v3009_v0  ;;  %668 = vmatprep.mubr.f32.mxu1 %v3009_v0 }
  0x4f   : > { %2424 = vmatmul.mubr.msk.f32.gmra.mxu0 %vm213_vm1, %v3269_v27  ;;  %2450 = vmatmul.mubr.msk.f32.gmra.mxu1 %vm213_vm1, %v3161_v15 }
  0x50   : > { %465 = vmatprep.mubr.f32.mxu0 %v3009_v0  ;;  %674 = vmatprep.mubr.f32.mxu1 %v3009_v0 }
  0x53   : > { %2425 = vmatmul.mubr.msk.f32.gmra.mxu0 %vm213_vm1, %v3280_v28  ;;  %2451 = vmatmul.mubr.msk.f32.gmra.mxu1 %vm213_vm1, %v3177_v17 }
  0x54   : > { %471 = vmatprep.mubr.f32.mxu0 %v3009_v0  ;;  %680 = vmatprep.mubr.f32.mxu1 %v3009_v0 }
  0x57   : > { %2426 = vmatmul.mubr.msk.f32.gmra.mxu0 %vm213_vm1, %v3291_v29  ;;  %2452 = vmatmul.mubr.msk.f32.gmra.mxu1 %vm213_vm1, %v3193_v19 }
  0x58   : > { %477 = vmatprep.mubr.f32.mxu0 %v3009_v0  ;;  %686 = vmatprep.mubr.f32.mxu1 %v3009_v0 }
  0x5b   : > { %2427 = vmatmul.mubr.msk.f32.gmra.mxu0 %vm213_vm1, %v3302_v30  ;;  %2453 = vmatmul.mubr.msk.f32.gmra.mxu1 %vm213_vm1, %v3209_v21 }
  0x5c   : > { %483 = vmatprep.mubr.f32.mxu0 %v3009_v0  ;;  %692 = vmatprep.mubr.f32.mxu1 %v3009_v0 }
  0x5f   : > { %2428 = vmatmul.mubr.msk.f32.gmra.mxu0 %vm213_vm1, %v3313_v31  ;;  %2454 = vmatmul.mubr.msk.f32.gmra.mxu1 %vm213_vm1, %v3225_v23 }
  0x60   : > { %489 = vmatprep.mubr.f32.mxu0 %v3009_v0  ;;  %698 = vmatprep.mubr.f32.mxu1 %v3009_v0 }
  0x63   : > { %2429 = vmatmul.mubr.msk.f32.gmra.mxu0 %vm213_vm1, %v3324_v32  ;;  %2455 = vmatmul.mubr.msk.f32.gmra.mxu1 %vm213_vm1, %v3236_v24 }
  0x64   : > { %495 = vmatprep.mubr.f32.mxu0 %v3009_v0  ;;  %704 = vmatprep.mubr.f32.mxu1 %v3009_v0 }
  0x67   : > { %2430 = vmatmul.mubr.msk.f32.gmra.mxu0 %vm213_vm1, %v3335_v33  ;;  %2456 = vmatmul.mubr.msk.f32.gmra.mxu1 %vm213_vm1, %v3247_v25 }
  0x68   : > { %501 = vmatprep.mubr.f32.mxu0 %v3009_v0  ;;  %710 = vmatprep.mubr.f32.mxu1 %v3009_v0 }
  0x6b   : > { %2431 = vmatmul.mubr.msk.f32.gmra.mxu0 %vm213_vm1, %v3346_v34  ;;  %2457 = vmatmul.mubr.msk.f32.gmra.mxu1 %vm213_vm1, %v3258_v26 }
  0x6c   : > { %507 = vmatprep.mubr.f32.mxu0 %v3009_v0  ;;  %716 = vmatprep.mubr.f32.mxu1 %v3009_v0 }
  0x6f   : > { %2432 = vmatmul.mubr.msk.f32.gmra.mxu0 %vm213_vm1, %v3357_v35  ;;  %2458 = vmatmul.mubr.msk.f32.gmra.mxu1 %vm213_vm1, %v3269_v27 }
  0x70   : > { %513 = vmatprep.mubr.f32.mxu0 %v3009_v0  ;;  %722 = vmatprep.mubr.f32.mxu1 %v3009_v0 }
  0x73   : > { %2433 = vmatmul.mubr.msk.f32.gmra.mxu0 %vm213_vm1, %v3368_v36  ;;  %2459 = vmatmul.mubr.msk.f32.gmra.mxu1 %vm213_vm1, %v3280_v28 }
  0x74   : > { %519 = vmatprep.mubr.f32.mxu0 %v3009_v0  ;;  %728 = vmatprep.mubr.f32.mxu1 %v3009_v0 }
  0x77   : > { %2434 = vmatmul.mubr.msk.f32.gmra.mxu0 %vm213_vm1, %v3379_v37  ;;  %2460 = vmatmul.mubr.msk.f32.gmra.mxu1 %vm213_vm1, %v3291_v29 }
  0x78   : > { %525 = vmatprep.mubr.f32.mxu0 %v3009_v0  ;;  %734 = vmatprep.mubr.f32.mxu1 %v3009_v0 }
  0x7b   : > { %2435 = vmatmul.mubr.msk.f32.gmra.mxu0 %vm213_vm1, %v3390_v38  ;;  %2461 = vmatmul.mubr.msk.f32.gmra.mxu1 %vm213_vm1, %v3302_v30 }
  0x7c   : > { %740 = vmatprep.mubr.f32.mxu1 %v3009_v0  ;;  %901 = vmatprep.mubr.f32.mxu0 %v3009_v0 }
  0x7f   : > { %2462 = vmatmul.mubr.msk.f32.gmra.mxu1 %vm213_vm1, %v3313_v31  ;;  %2480 = vmatmul.mubr.msk.f32.vlgmr.msra.gmra.mxu0 %vm213_vm1, %v3089_v5 }
  0x80   : > { %746 = vmatprep.mubr.f32.mxu1 %v3009_v0  ;;  %907 = vmatprep.mubr.f32.mxu0 %v3009_v0 }
  0x83   : > { %2463 = vmatmul.mubr.msk.f32.gmra.mxu1 %vm213_vm1, %v3324_v32  ;;  %2481 = vmatmul.mubr.msk.f32.gmra.mxu0 %vm213_vm1, %v3109_v9 }
  0x84   : > { %752 = vmatprep.mubr.f32.mxu1 %v3009_v0  ;;  %913 = vmatprep.mubr.f32.mxu0 %v3009_v0 }
  0x87   : > { %2464 = vmatmul.mubr.msk.f32.gmra.mxu1 %vm213_vm1, %v3335_v33  ;;  %2482 = vmatmul.mubr.msk.f32.gmra.mxu0 %vm213_vm1, %v3129_v11 }
  0x88   : > { %758 = vmatprep.mubr.f32.mxu1 %v3009_v0  ;;  %919 = vmatprep.mubr.f32.mxu0 %v3009_v0 }
  0x8b   : > { %2465 = vmatmul.mubr.msk.f32.gmra.mxu1 %vm213_vm1, %v3346_v34  ;;  %2483 = vmatmul.mubr.msk.f32.gmra.mxu0 %vm213_vm1, %v3145_v13 }
  0x8c   : > { %764 = vmatprep.mubr.f32.mxu1 %v3009_v0  ;;  %925 = vmatprep.mubr.f32.mxu0 %v3009_v0 }
  0x8f   : > { %2466 = vmatmul.mubr.msk.f32.gmra.mxu1 %vm213_vm1, %v3357_v35  ;;  %2484 = vmatmul.mubr.msk.f32.gmra.mxu0 %vm213_vm1, %v3161_v15 }
  0x90   : > { %770 = vmatprep.mubr.f32.mxu1 %v3009_v0  ;;  %931 = vmatprep.mubr.f32.mxu0 %v3009_v0 }
  0x93   : > { %2467 = vmatmul.mubr.msk.f32.gmra.mxu1 %vm213_vm1, %v3368_v36  ;;  %2485 = vmatmul.mubr.msk.f32.gmra.mxu0 %vm213_vm1, %v3177_v17 }
  0x94   : > { %776 = vmatprep.mubr.f32.mxu1 %v3009_v0  ;;  %937 = vmatprep.mubr.f32.mxu0 %v3009_v0 }
  0x97   : > { %2468 = vmatmul.mubr.msk.f32.gmra.mxu1 %vm213_vm1, %v3379_v37  ;;  %2486 = vmatmul.mubr.msk.f32.gmra.mxu0 %vm213_vm1, %v3193_v19 }
  0x98   : > { %782 = vmatprep.mubr.f32.mxu1 %v3009_v0  ;;  %943 = vmatprep.mubr.f32.mxu0 %v3009_v0 }
  0x9b   : > { %2469 = vmatmul.mubr.msk.f32.gmra.mxu1 %vm213_vm1, %v3390_v38  ;;  %2487 = vmatmul.mubr.msk.f32.gmra.mxu0 %vm213_vm1, %v3209_v21 }
  0x9c   : > { %788 = vmatprep.mubr.f32.mxu1 %v3009_v0  ;;  %949 = vmatprep.mubr.f32.mxu0 %v3009_v0 }
  0x9f   : > { %2470 = vmatmul.mubr.msk.f32.gmra.mxu1 %vm213_vm1, %v3094_v6  ;;  %2488 = vmatmul.mubr.msk.f32.gmra.mxu0 %vm213_vm1, %v3225_v23 }
  0xa0   : > { %794 = vmatprep.mubr.f32.mxu1 %v3009_v0  ;;  %955 = vmatprep.mubr.f32.mxu0 %v3009_v0 }
  0xa3   : > { %2471 = vmatmul.mubr.msk.f32.gmra.mxu1 %vm213_vm1, %v3114_v10  ;;  %2489 = vmatmul.mubr.msk.f32.gmra.mxu0 %vm213_vm1, %v3236_v24 }
  0xa4   : > { %800 = vmatprep.mubr.f32.mxu1 %v3009_v0  ;;  %961 = vmatprep.mubr.f32.mxu0 %v3009_v0 }
  0xa7   : > { %2472 = vmatmul.mubr.msk.f32.gmra.mxu1 %vm213_vm1, %v3134_v12  ;;  %2490 = vmatmul.mubr.msk.f32.gmra.mxu0 %vm213_vm1, %v3247_v25 }
  0xa8   : > { %806 = vmatprep.mubr.f32.mxu1 %v3009_v0  ;;  %967 = vmatprep.mubr.f32.mxu0 %v3009_v0 }
  0xab   : > { %2473 = vmatmul.mubr.msk.f32.gmra.mxu1 %vm213_vm1, %v3150_v14  ;;  %2491 = vmatmul.mubr.msk.f32.gmra.mxu0 %vm213_vm1, %v3258_v26 }
  0xac   : > { %812 = vmatprep.mubr.f32.mxu1 %v3009_v0  ;;  %973 = vmatprep.mubr.f32.mxu0 %v3009_v0 }
  0xaf   : > { %2474 = vmatmul.mubr.msk.f32.gmra.mxu1 %vm213_vm1, %v3166_v16  ;;  %2492 = vmatmul.mubr.msk.f32.gmra.mxu0 %vm213_vm1, %v3269_v27 }
  0xb0   : > { %818 = vmatprep.mubr.f32.mxu1 %v3009_v0  ;;  %979 = vmatprep.mubr.f32.mxu0 %v3009_v0 }
  0xb3   : > { %2475 = vmatmul.mubr.msk.f32.gmra.mxu1 %vm213_vm1, %v3182_v18  ;;  %2493 = vmatmul.mubr.msk.f32.gmra.mxu0 %vm213_vm1, %v3280_v28 }
  0xb4   : > { %824 = vmatprep.mubr.f32.mxu1 %v3009_v0  ;;  %985 = vmatprep.mubr.f32.mxu0 %v3009_v0 }
  0xb7   : > { %2476 = vmatmul.mubr.msk.f32.gmra.mxu1 %vm213_vm1, %v3198_v20  ;;  %2494 = vmatmul.mubr.msk.f32.gmra.mxu0 %vm213_vm1, %v3291_v29 }
  0xb8   : > { %830 = vmatprep.mubr.f32.mxu1 %v3009_v0  ;;  %991 = vmatprep.mubr.f32.mxu0 %v3009_v0 }
  0xbb   : > { %2477 = vmatmul.mubr.msk.f32.gmra.mxu1 %vm213_vm1, %v3214_v22  ;;  %2495 = vmatmul.mubr.msk.f32.gmra.mxu0 %vm213_vm1, %v3302_v30 }
  0xbc   : > { %997 = vmatprep.mubr.f32.mxu0 %v3009_v0 }
  0xbf   : > { %2496 = vmatmul.mubr.msk.f32.gmra.mxu0 %vm213_vm1, %v3313_v31 }
  0xc0   : > { %1003 = vmatprep.mubr.f32.mxu0 %v3009_v0 }
  0xc3   : > { %2497 = vmatmul.mubr.msk.f32.gmra.mxu0 %vm213_vm1, %v3324_v32 }
  0xc4   : > { %1009 = vmatprep.mubr.f32.mxu0 %v3009_v0 }
  0xc7   : > { %2498 = vmatmul.mubr.msk.f32.gmra.mxu0 %vm213_vm1, %v3335_v33 }
  0xc8   : > { %1015 = vmatprep.mubr.f32.mxu0 %v3009_v0 }
  0xcb   : > { %2499 = vmatmul.mubr.msk.f32.gmra.mxu0 %vm213_vm1, %v3346_v34 }
  0xcc   : > { %1021 = vmatprep.mubr.f32.mxu0 %v3009_v0 }
  0xcf   : > { %2500 = vmatmul.mubr.msk.f32.gmra.mxu0 %vm213_vm1, %v3357_v35 }
  0xd0   : > { %1027 = vmatprep.mubr.f32.mxu0 %v3009_v0 }
  0xd3   : > { %2501 = vmatmul.mubr.msk.f32.gmra.mxu0 %vm213_vm1, %v3368_v36 }
  0xd4   : > { %1033 = vmatprep.mubr.f32.mxu0 %v3009_v0 }
  0xd7   : > { %2502 = vmatmul.mubr.msk.f32.gmra.mxu0 %vm213_vm1, %v3379_v37 }
  0xd8   : > { %1039 = vmatprep.mubr.f32.mxu0 %v3009_v0 }
  0xdb   : > { %2503 = vmatmul.mubr.msk.f32.gmra.mxu0 %vm213_vm1, %v3390_v38 }
  0xdc   : > { %1045 = vmatprep.mubr.f32.mxu0 %v3009_v0 }
  0xdf   : > { %v3517_v39 = vpop.f32.mrf.mxu0  ;;  %v3519_v40 = vpop.f32.mrf.mxu1  ;;  %2504 = vmatmul.mubr.msk.f32.gmra.mxu0 %vm213_vm1, %v3094_v6 }
  0xe0   : > { %1051 = vmatprep.mubr.f32.mxu0 %v3009_v0  ;;  %v1286_v8 = vmul.f32 0.70710677, %v3517_v39  ;;  %v1094_v33 = vmul.f32 0.5, %v3517_v39  ;;  %v1238_v34 = vmul.f32 0.5, %v3519_v40 }
  0xe1   : > { %v3524_v41 = vpop.f32.mrf.mxu0  ;;  %v3526_v42 = vpop.f32.mrf.mxu1 }
  0xe2   : > { %2563 = verf.f32 %v1286_v8  ;;  %v1431_v13 = vmul.f32 0.70710677, %v3526_v42  ;;  %v1287_v24 = vmul.f32 0.70710677, %v3524_v41  ;;  %v3652_v38 = vmul.f32 0.5, %v3524_v41 }
  0xe3   : > { %v3528_v43 = vpop.f32.mrf.mxu0  ;;  %v3530_v44 = vpop.f32.mrf.mxu1  ;;  %2505 = vmatmul.mubr.msk.f32.gmra.mxu0 %vm213_vm1, %v3114_v10  ;;  %v1430_v10 = vmul.f32 0.70710677, %v3519_v40  ;;  %v3655_v8 = vmul.f32 0.5, %v3526_v42 }
  0xe4   : > { %1057 = vmatprep.mubr.f32.mxu0 %v3009_v0  ;;  %v1436_v17 = vmul.f32 0.70710677, %v3530_v44  ;;  %5385 = vst [vmem:[#allocation13_spill] sm:$0xff] %v3652_v38  ;;  %v3659_v39 = vmul.f32 0.5, %v3528_v43  ;;  %v3662_v40 = vmul.f32 0.5, %v3530_v44 }
  0xe5   : > { %v3535_v45 = vpop.f32.mrf.mxu0  ;;  %v3537_v46 = vpop.f32.mrf.mxu1  ;;  %2565 = verf.f32 %v1430_v10 }
  0xe6   : > { %2567 = verf.f32 %v1431_v13  ;;  %v1437_v21 = vmul.f32 0.70710677, %v3537_v46  ;;  %v3670_v42 = vmul.f32 0.5, %v3535_v45 }
  0xe7   : > { %v3539_v47 = vpop.f32.mrf.mxu0  ;;  %v3541_v48 = vpop.f32.mrf.mxu1  ;;  %2506 = vmatmul.mubr.msk.f32.gmra.mxu0 %vm213_vm1, %v3134_v12 }
  0xe8   : > { %1063 = vmatprep.mubr.f32.mxu0 %v3009_v0  ;;  %v1298_v25 = vmul.f32 0.70710677, %v3539_v47  ;;  %v1442_v28 = vmul.f32 0.70710677, %v3541_v48  ;;  %v3677_v44 = vmul.f32 0.5, %v3539_v47 }
  0xe9   : > { %v3546_v49 = vpop.f32.mrf.mxu0  ;;  %v3548_v50 = vpop.f32.mrf.mxu1 }
  0xea   : > { %v1299_v29 = vmul.f32 0.70710677, %v3546_v49  ;;  %v1443_v32 = vmul.f32 0.70710677, %v3548_v50 }
  0xeb   : > { %v3550_v51 = vpop.f32.mrf.mxu0  ;;  %v3552_v52 = vpop.f32.mrf.mxu1  ;;  %2507 = vmatmul.mubr.msk.f32.gmra.mxu0 %vm213_vm1, %v3150_v14 }
  0xec   : > { %1069 = vmatprep.mubr.f32.mxu0 %v3009_v0  ;;  %v1304_v35 = vmul.f32 0.70710677, %v3550_v51  ;;  %v1448_v10 = vmul.f32 0.70710677, %v3552_v52 }
  0xed   : > { %v3557_v53 = vpop.f32.mrf.mxu0  ;;  %v3559_v54 = vpop.f32.mrf.mxu1 }
  0xee   : > { %v1305_v13 = vmul.f32 0.70710677, %v3557_v53 }
  0xef   : > { %v3561_v55 = vpop.f32.mrf.mxu0  ;;  %v3563_v56 = vpop.f32.mrf.mxu1  ;;  %2508 = vmatmul.mubr.msk.f32.gmra.mxu0 %vm213_vm1, %v3166_v16  ;;  %v1292_v16 = vmul.f32 0.70710677, %v3528_v43  ;;  %v1449_v43 = vmul.f32 0.70710677, %v3559_v54 }
  0xf0   : > { %1075 = vmatprep.mubr.f32.mxu0 %v3009_v0  ;;  %v2564_v41 = vpop.eup %2563  ;;  %v1454_v47 = vmul.f32 0.70710677, %v3563_v56 }
  0xf1   : > { %v3568_v57 = vpop.f32.mrf.mxu0  ;;  %v3570_v58 = vpop.f32.mrf.mxu1  ;;  %2569 = verf.f32 %v1292_v16 }
  0xf2   : > { %2571 = verf.f32 %v1436_v17 }
  0xf3   : > { %v3572_v59 = vpop.f32.mrf.mxu0  ;;  %v3574_v60 = vpop.f32.mrf.mxu1  ;;  %2509 = vmatmul.mubr.msk.f32.gmra.mxu0 %vm213_vm1, %v3182_v18 }
  0xf4   : > { %1081 = vmatprep.mubr.f32.mxu0 %v3009_v0 }
  0xf5   : > { %v3579_v61 = vpop.f32.mrf.mxu0  ;;  %v3581_v62 = vpop.f32.mrf.mxu1 }
  0xf7   : > { %v3583_v63 = vpop.f32.mrf.mxu0  ;;  %v3585_v1 = vpop.f32.mrf.mxu1  ;;  %2510 = vmatmul.mubr.msk.f32.gmra.mxu0 %vm213_vm1, %v3198_v20  ;;  %v1293_v20 = vmul.f32 0.70710677, %v3535_v45 }
  0xf8   : > { %1087 = vmatprep.mubr.f32.mxu0 %v3009_v0 }
  0xf9   : > { %v3590_v2 = vpop.f32.mrf.mxu0  ;;  %v3592_v3 = vpop.f32.mrf.mxu1  ;;  %2573 = verf.f32 %v1293_v20  ;;  %v3673_v20 = vmul.f32 0.5, %v3537_v46  ;;  %v3688_v46 = vmul.f32 0.5, %v3546_v49 }
  0xfa   : > { %2575 = verf.f32 %v1437_v21  ;;  %v2566_v21 = vpop.eup %2565 }
  0xfb   : > { %v3594_v4 = vpop.f32.mrf.mxu0  ;;  %v3596_v5 = vpop.f32.mrf.mxu1  ;;  %2511 = vmatmul.mubr.msk.f32.gmra.mxu0 %vm213_vm1, %v3214_v22  ;;  %2577 = verf.f32 %v1287_v24  ;;  %v3680_v24 = vmul.f32 0.5, %v3541_v48  ;;  %v3695_v48 = vmul.f32 0.5, %v3550_v51  ;;  %v1814_v49 = vadd.f32 1.0, %v2566_v21 }
  0xfc   : > { %2579 = verf.f32 %v1298_v25  ;;  %v1310_v25 = vmul.f32 0.70710677, %v3561_v55  ;;  %v3710_v51 = vmul.f32 0.5, %v3559_v54 }
  0xfd   : > { %v3600_v6 = vpop.f32.mrf.mxu0  ;;  %v3602_v7 = vpop.f32.mrf.mxu1  ;;  %2581 = verf.f32 %v1442_v28 }
  0xfe   : > { %2583 = verf.f32 %v1299_v29  ;;  %v3691_v29 = vmul.f32 0.5, %v3548_v50  ;;  %v1455_v50 = vmul.f32 0.70710677, %v3570_v58 }
  0xff   : > { %v3605_v9 = vpop.f32.mrf.mxu0  ;;  %v3607_v0 = vpop.f32.mrf.mxu1  ;;  %2585 = verf.f32 %v1443_v32  ;;  %v1670_v32 = vadd.f32 1.0, %v2564_v41  ;;  %v3707_v41 = vmul.f32 0.5, %v3557_v53  ;;  %v1460_v53 = vmul.f32 0.70710677, %v3574_v60 }
 0x100   : > { %2587 = verf.f32 %v1304_v35  ;;  %v1311_v35 = vmul.f32 0.70710677, %v3568_v57 }
 0x101   : > { %v3610_v11 = vpop.f32.mrf.mxu0  ;;  %v3612_v12 = vpop.f32.mrf.mxu1  ;;  %2589 = verf.f32 %v1448_v10  ;;  %v3724_v54 = vmul.f32 %v1670_v32, %v1094_v33  ;;  %v1322_v32 = vmul.f32 0.70710677, %v3583_v63 }
 0x102   : > { %2591 = verf.f32 %v1305_v13  ;;  %v1316_v13 = vmul.f32 0.70710677, %v3572_v59 }
 0x103   : > { %v3615_v14 = vpop.f32.mrf.mxu0  ;;  %v3617_v15 = vpop.f32.mrf.mxu1  ;;  %2593 = verf.f32 %v1449_v43  ;;  %v3721_v43 = vmul.f32 0.5, %v3563_v56  ;;  %5390 = vst [vmem:[#allocation18_spill] sm:$0xff] %v3724_v54 }
 0x104   : > { %5377 = vst [vmem:[#allocation5_spill] sm:$0xff] %v3615_v14  ;;  %5378 = vst [vmem:[#allocation6_spill] sm:$0xff] %v3617_v15  ;;  %2595 = verf.f32 %v1310_v25  ;;  %v3727_v25 = vmul.f32 0.5, %v3568_v57  ;;  %v3734_v15 = vmul.f32 %v1814_v49, %v1238_v34  ;;  %v3740_v57 = vmul.f32 0.5, %v3570_v58 }
 0x105   : > { %v3621_v18 = vpop.f32.mrf.mxu0  ;;  %v3623_v19 = vpop.f32.mrf.mxu1  ;;  %2597 = verf.f32 %v1454_v47  ;;  %v1461_v47 = vmul.f32 0.70710677, %v3581_v62  ;;  %v1466_v49 = vmul.f32 0.70710677, %v3585_v1  ;;  %v1323_v58 = vmul.f32 0.70710677, %v3590_v2 }
 0x106   : > { %5379 = vst [vmem:[#allocation7_spill] sm:$0xff] %v3621_v18  ;;  %5380 = vst [vmem:[#allocation8_spill] sm:$0xff] %v3623_v19 }
 0x107   : > { %v3627_v22 = vpop.f32.mrf.mxu0  ;;  %v3629_v23 = vpop.f32.mrf.mxu1  ;;  %5392 = vst [vmem:[#allocation20_spill] sm:$0xff] %v3734_v15 }
 0x108   : > { %5381 = vst [vmem:[#allocation9_spill] sm:$0xff] %v3629_v23  ;;  %v1317_v23 = vmul.f32 0.70710677, %v3579_v61 }
 0x109   : > { %v3633_v26 = vpop.f32.mrf.mxu0  ;;  %v3635_v27 = vpop.f32.mrf.mxu1 }
 0x10a   : > { %5382 = vst [vmem:[#allocation10_spill] sm:$0xff] %v3635_v27 }
 0x10b   : > { %v3639_v30 = vpop.f32.mrf.mxu0  ;;  %v3641_v31 = vpop.f32.mrf.mxu1 }
 0x10c   : > { %5383 = vst [vmem:[#allocation11_spill] sm:$0xff] %v3641_v31 }
 0x10d   : > { %v3647_v36 = vpop.f32.mrf.mxu0  ;;  %v3649_v37 = vpop.f32.mrf.mxu1 }
 0x10e   : > { %5384 = vst [vmem:[#allocation12_spill] sm:$0xff] %v3649_v37  ;;  %v3703_v37 = vmul.f32 0.5, %v3552_v52  ;;  %v3718_v52 = vmul.f32 0.5, %v3561_v55 }
 0x10f   : > { %v3665_v16 = vpop.f32.mrf.mxu0  ;;  %v3667_v17 = vpop.f32.mrf.mxu1 }
 0x110   : > { %5386 = vst [vmem:[#allocation14_spill] sm:$0xff] %v3667_v17 }
 0x111   : > { %v3683_v28 = vpop.f32.mrf.mxu0  ;;  %v3685_v45 = vpop.f32.mrf.mxu1 }
 0x112   : > { %5387 = vst [vmem:[#allocation15_spill] sm:$0xff] %v3685_v45  ;;  %v2568_v45 = vpop.eup %2567  ;;  %2599 = verf.f32 %v1311_v35 }
 0x113   : > { %v3698_v38 = vpop.f32.mrf.mxu0  ;;  %v3700_v17 = vpop.f32.mrf.mxu1  ;;  %v1815_v56 = vadd.f32 1.0, %v2568_v45  ;;  %v3748_v45 = vmul.f32 0.5, %v3572_v59  ;;  %v3760_v59 = vmul.f32 0.5, %v3574_v60  ;;  %v3775_v60 = vmul.f32 0.5, %v3579_v61 }
 0x114   : > { %5388 = vst [vmem:[#allocation16_spill] sm:$0xff] %v3700_v17  ;;  %v2570_v10 = vpop.eup %2569  ;;  %2601 = verf.f32 %v1455_v50 }
 0x115   : > { %v3713_v31 = vpop.f32.mrf.mxu0  ;;  %v3715_v17 = vpop.f32.mrf.mxu1  ;;  %v1676_v33 = vadd.f32 1.0, %v2570_v10  ;;  %5395 = vst [vmem:[#allocation23_spill] sm:$0xff] %v3748_v45 }
 0x116   : > { %5389 = vst [vmem:[#allocation17_spill] sm:$0xff] %v3715_v17  ;;  %v2572_v21 = vpop.eup %2571  ;;  %2603 = verf.f32 %v1316_v13 }
 0x117   : > { %v2574_v27 = vpop.eup %2573  ;;  %v3730_v17 = vpop.f32.mrf.mxu0  ;;  %v1820_v34 = vadd.f32 1.0, %v2572_v21  ;;  %2605 = verf.f32 %v1460_v53  ;;  %v1467_v21 = vmul.f32 0.70710677, %v3592_v3 }
 0x118   : > { %v3732_v19 = vpop.f32.mrf.mxu1  ;;  %v2576_v55 = vpop.eup %2575  ;;  %v1677_v10 = vadd.f32 1.0, %v2574_v27  ;;  %2607 = verf.f32 %v1317_v23  ;;  %v3764_v27 = vmul.f32 %v1676_v33, %v3659_v39 }
 0x119   : > { %5391 = vst [vmem:[#allocation19_spill] sm:$0xff] %v3732_v19  ;;  %v3737_v14 = vpop.eup %2577  ;;  %v3743_v35 = vpop.f32.mrf.mxu0  ;;  %v1821_v15 = vadd.f32 1.0, %v2576_v55  ;;  %2609 = verf.f32 %v1461_v47  ;;  %v1328_v55 = vmul.f32 0.70710677, %v3594_v4  ;;  %v1472_v47 = vmul.f32 0.70710677, %v3596_v5 }
 0x11a   : > { %5393 = vst [vmem:[#allocation21_spill] sm:$0xff] %v3737_v14  ;;  %v3745_v54 = vpop.f32.mrf.mxu1  ;;  %v2580_v19 = vpop.eup %2579  ;;  %5398 = vst [vmem:[#allocation26_spill] sm:$0xff] %v3764_v27  ;;  %2611 = verf.f32 %v1322_v32  ;;  %v1329_v32 = vmul.f32 0.70710677, %v3600_v6 }
 0x11b   : > { %5394 = vst [vmem:[#allocation22_spill] sm:$0xff] %v3745_v54  ;;  %v2582_v50 = vpop.eup %2581  ;;  %v3752_v13 = vpop.f32.mrf.mxu0  ;;  %v3757_v54 = vmul.f32 %v1815_v56, %v3655_v8  ;;  %v1682_v23 = vadd.f32 1.0, %v2580_v19  ;;  %v3772_v56 = vmul.f32 %v1820_v34, %v3662_v40  ;;  %2613 = verf.f32 %v1466_v49 }
 0x11c   : > { %v3754_v14 = vpop.f32.mrf.mxu1  ;;  %v2584_v18 = vpop.eup %2583  ;;  %v3779_v19 = vmul.f32 %v1677_v10, %v3670_v42  ;;  %v3782_v33 = vmul.f32 %v1821_v15, %v3673_v20  ;;  %2615 = verf.f32 %v1323_v58  ;;  %v1826_v61 = vadd.f32 1.0, %v2582_v50 }
 0x11d   : > { %5396 = vst [vmem:[#allocation24_spill] sm:$0xff] %v3754_v14  ;;  %5397 = vst [vmem:[#allocation25_spill] sm:$0xff] %v3757_v54  ;;  %v2586_v53 = vpop.eup %2585  ;;  %v3767_v45 = vpop.f32.mrf.mxu0  ;;  %2617 = verf.f32 %v1467_v21  ;;  %v1473_v49 = vmul.f32 0.70710677, %v3602_v7  ;;  %v3791_v42 = vmul.f32 %v1682_v23, %v3677_v44  ;;  %v3794_v15 = vmul.f32 0.5, %v3581_v62 }
 0x11e   : > { %v3769_v14 = vpop.f32.mrf.mxu1  ;;  %v2588_v8 = vpop.eup %2587  ;;  %5399 = vst [vmem:[#allocation27_spill] sm:$0xff] %v3772_v56  ;;  %5400 = vst [vmem:[#allocation28_spill] sm:$0xff] %v3779_v19  ;;  %v1683_v56 = vadd.f32 1.0, %v2584_v18  ;;  %2619 = verf.f32 %v1328_v55  ;;  %v1334_v20 = vmul.f32 0.70710677, %v3605_v9  ;;  %v1827_v50 = vadd.f32 1.0, %v2586_v53 }
 0x11f   : > { %v2590_v39 = vpop.eup %2589  ;;  %5401 = vst [vmem:[#allocation29_spill] sm:$0xff] %v3782_v33  ;;  %v3785_v54 = vpop.f32.mrf.mxu0  ;;  %5403 = vst [vmem:[#allocation31_spill] sm:$0xff] %v3791_v42  ;;  %v1688_v18 = vadd.f32 1.0, %v2588_v8  ;;  %2621 = verf.f32 %v1472_v47  ;;  %v1288_v21 = vmul.f32 0.70710677, %v3607_v0  ;;  %v3803_v44 = vmul.f32 0.5, %v3583_v63 }
 0x120   : > { %v3787_v40 = vpop.f32.mrf.mxu1  ;;  %v2592_v34 = vpop.eup %2591  ;;  %2623 = verf.f32 %v1329_v32  ;;  %v1335_v62 = vmul.f32 0.70710677, %v3610_v11  ;;  %v3814_v53 = vmul.f32 %v1683_v56, %v3688_v46  ;;  %v1289_v8 = vmul.f32 0.70710677, %v3612_v12 }
 0x121   : > { %5402 = vst [vmem:[#allocation30_spill] sm:$0xff] %v3787_v40  ;;  %v2594_v27 = vpop.eup %2593  ;;  %v3797_v10 = vpop.f32.mrf.mxu0  ;;  %v1832_v40 = vadd.f32 1.0, %v2590_v39  ;;  %2625 = verf.f32 %v1473_v49  ;;  %v1689_v63 = vadd.f32 1.0, %v2592_v34  ;;  %v3818_v39 = vmul.f32 0.5, %v3585_v1 }
 0x122   : > { %v3799_v58 = vpop.f32.mrf.mxu1  ;;  %v2596_v33 = vpop.eup %2595  ;;  %5408 = vst [vmem:[#allocation36_spill] sm:$0xff] %v3814_v53  ;;  %2627 = verf.f32 %v1334_v20  ;;  %v1365_v32 = vmul.f32 0.70710677, %v3713_v31  ;;  %v3829_v46 = vmul.f32 %v1688_v18, %v3695_v48  ;;  %v3832_v56 = vmul.f32 0.5, %v3590_v2 }
 0x123   : > { %5404 = vst [vmem:[#allocation32_spill] sm:$0xff] %v3799_v58  ;;  %v2598_v19 = vpop.eup %2597  ;;  %v3806_v23 = vpop.f32.mrf.mxu0  ;;  %v3811_v58 = vmul.f32 %v1826_v61, %v3680_v24  ;;  %v3826_v61 = vmul.f32 %v1827_v50, %v3691_v29  ;;  %2629 = verf.f32 %v1288_v21  ;;  %v3835_v34 = vmul.f32 %v1832_v40, %v3703_v37 }
 0x124   : > { %5405 = vst [vmem:[#allocation33_spill] sm:$0xff] %v3806_v23  ;;  %v3808_v55 = vpop.f32.mrf.mxu1  ;;  %v2600_v42 = vpop.eup %2599  ;;  %5412 = vst [vmem:[#allocation40_spill] sm:$0xff] %v3829_v46  ;;  %v1833_v49 = vadd.f32 1.0, %v2594_v27  ;;  %2631 = verf.f32 %v1335_v62  ;;  %v1371_v20 = vmul.f32 0.70710677, %v3743_v35  ;;  %v1694_v50 = vadd.f32 1.0, %v2596_v33 }
 0x125   : > { %5406 = vst [vmem:[#allocation34_spill] sm:$0xff] %v3808_v55  ;;  %5407 = vst [vmem:[#allocation35_spill] sm:$0xff] %v3811_v58  ;;  %v2602_v47 = vpop.eup %2601  ;;  %v3821_v23 = vpop.f32.mrf.mxu0  ;;  %2633 = verf.f32 %v1289_v8  ;;  %v1370_v48 = vmul.f32 0.70710677, %v3730_v17  ;;  %v1376_v2 = vmul.f32 0.70710677, %v3752_v13  ;;  %v3845_v21 = vmul.f32 %v1689_v63, %v3707_v41 }
 0x126   : > { %5409 = vst [vmem:[#allocation37_spill] sm:$0xff] %v3821_v23  ;;  %v3823_v55 = vpop.f32.mrf.mxu1  ;;  %v2604_v24 = vpop.eup %2603  ;;  %5411 = vst [vmem:[#allocation39_spill] sm:$0xff] %v3826_v61  ;;  %v1838_v37 = vadd.f32 1.0, %v2598_v19  ;;  %v3848_v27 = vmul.f32 0.5, %v3592_v3  ;;  %2635 = verf.f32 %v1365_v32  ;;  %v1695_v33 = vadd.f32 1.0, %v2600_v42 }
 0x127   : > { %5410 = vst [vmem:[#allocation38_spill] sm:$0xff] %v3823_v55  ;;  %v2606_v1 = vpop.eup %2605  ;;  %5413 = vst [vmem:[#allocation41_spill] sm:$0xff] %v3835_v34  ;;  %v3838_v58 = vpop.f32.mrf.mxu0  ;;  %v3855_v8 = vmul.f32 0.5, %v3594_v4  ;;  %v1364_v34 = vmul.f32 0.70710677, %v3698_v38  ;;  %2637 = verf.f32 %v1376_v2  ;;  %v3859_v41 = vmul.f32 %v1833_v49, %v3710_v51 }
 0x128   : > { %5414 = vst [vmem:[#allocation42_spill] sm:$0xff] %v3838_v58  ;;  %v3840_v53 = vpop.f32.mrf.mxu1  ;;  %v2608_v29 = vpop.eup %2607  ;;  %5416 = vst [vmem:[#allocation44_spill] sm:$0xff] %v3845_v21  ;;  %v1359_v3 = vmul.f32 0.70710677, %v3683_v28  ;;  %2639 = verf.f32 %v1371_v20  ;;  %v1377_v19 = vmul.f32 0.70710677, %v3767_v45  ;;  %v3868_v4 = vmul.f32 %v1694_v50, %v3718_v52 }
 0x129   : > { %5415 = vst [vmem:[#allocation43_spill] sm:$0xff] %v3840_v53  ;;  %v2610_v18 = vpop.eup %2609  ;;  %v3850_v40 = vpop.f32.mrf.mxu0  ;;  %5419 = vst [vmem:[#allocation47_spill] sm:$0xff] %v3859_v41  ;;  %v1358_v2 = vmul.f32 0.70710677, %v3665_v16  ;;  %2641 = verf.f32 %v1370_v48  ;;  %v3875_v49 = vmul.f32 %v1838_v37, %v3721_v43  ;;  %v1839_v20 = vadd.f32 1.0, %v2602_v47 }
 0x12a   : > { %5417 = vst [vmem:[#allocation45_spill] sm:$0xff] %v3850_v40  ;;  %v3852_v62 = vpop.f32.mrf.mxu1  ;;  %v2612_v61 = vpop.eup %2611  ;;  %5422 = vst [vmem:[#allocation50_spill] sm:$0xff] %v3868_v4  ;;  %v1353_v41 = vmul.f32 0.70710677, %v3647_v36  ;;  %2643 = verf.f32 %v1377_v19  ;;  %v3888_v50 = vmul.f32 0.5, %v3600_v6  ;;  %v1700_v47 = vadd.f32 1.0, %v2604_v24 }
 0x12b   : > { %5418 = vst [vmem:[#allocation46_spill] sm:$0xff] %v3852_v62  ;;  %v2614_v46 = vpop.eup %2613  ;;  %v3863_v63 = vpop.f32.mrf.mxu0  ;;  %v3871_v62 = vmul.f32 0.5, %v3596_v5  ;;  %5423 = vst [vmem:[#allocation51_spill] sm:$0xff] %v3875_v49  ;;  %v3885_v5 = vmul.f32 %v1695_v33, %v3727_v25  ;;  %v1352_v48 = vmul.f32 0.70710677, %v3639_v30  ;;  %2645 = verf.f32 %v1364_v34 }
 0x12c   : > { %5420 = vst [vmem:[#allocation48_spill] sm:$0xff] %v3863_v63  ;;  %v3865_v32 = vpop.f32.mrf.mxu1  ;;  %v2616_v42 = vpop.eup %2615  ;;  %v3894_v37 = vmul.f32 0.5, %v3602_v7  ;;  %v1347_v19 = vmul.f32 0.70710677, %v3633_v26  ;;  %2647 = verf.f32 %v1359_v3  ;;  %v1844_v6 = vadd.f32 1.0, %v2606_v1  ;;  %v5430_v3 = vld [vmem:[#allocation7_spill] sm:$0xff] }
 0x12d   : > { %5421 = vst [vmem:[#allocation49_spill] sm:$0xff] %v3865_v32  ;;  %v2618_v51 = vpop.eup %2617  ;;  %v3878_v63 = vpop.f32.mrf.mxu0  ;;  %5426 = vst [vmem:[#allocation54_spill] sm:$0xff] %v3885_v5  ;;  %v3904_v33 = vmul.f32 0.5, %v3605_v9  ;;  %v1346_v34 = vmul.f32 0.70710677, %v3627_v22  ;;  %2649 = verf.f32 %v1358_v2  ;;  %v3910_v7 = vmul.f32 %v1839_v20, %v3740_v57  ;;  %v5433_v2 = vld [vmem:[#allocation5_spill] sm:$0xff] }
 0x12e   : > { %5424 = vst [vmem:[#allocation52_spill] sm:$0xff] %v3878_v63  ;;  %v3880_v32 = vpop.f32.mrf.mxu1  ;;  %v3882_v52 = vpop.eup %2619  ;;  %v1701_v63 = vadd.f32 1.0, %v2608_v29  ;;  %v1341_v40 = vmul.f32 0.70710677, %v5430_v3  ;;  %2651 = verf.f32 %v1353_v41  ;;  %v1845_v9 = vadd.f32 1.0, %v2610_v18  ;;  %v5434_v57 = vld [vmem:[#allocation23_spill] sm:$0xff] }
 0x12f   : > { %5425 = vst [vmem:[#allocation53_spill] sm:$0xff] %v3880_v32  ;;  %v3891_v43 = vpop.eup %2621  ;;  %v3897_v49 = vpop.f32.mrf.mxu0  ;;  %5429 = vst [vmem:[#allocation57_spill] sm:$0xff] %v3910_v7  ;;  %v3920_v53 = vmul.f32 0.5, %v3607_v0  ;;  %v1340_v21 = vmul.f32 0.70710677, %v5433_v2  ;;  %2653 = verf.f32 %v1352_v48  ;;  %v3926_v29 = vmul.f32 %v1700_v47, %v5434_v57 }
 0x130   : > { %5427 = vst [vmem:[#allocation55_spill] sm:$0xff] %v3897_v49  ;;  %v3899_v32 = vpop.f32.mrf.mxu1  ;;  %v3901_v25 = vpop.eup %2623  ;;  %v1706_v20 = vadd.f32 1.0, %v2612_v61  ;;  %v3929_v41 = vmul.f32 0.5, %v3610_v11  ;;  %2655 = verf.f32 %v1347_v19  ;;  %v3938_v0 = vmul.f32 %v1844_v6, %v3760_v59 }
 0x131   : > { %5428 = vst [vmem:[#allocation56_spill] sm:$0xff] %v3899_v32  ;;  %v3907_v24 = vpop.eup %2625  ;;  %v3913_v49 = vpop.f32.mrf.mxu0  ;;  %5435 = vst [vmem:[#allocation5_spill] sm:$0xff] %v3926_v29  ;;  %v1850_v48 = vadd.f32 1.0, %v2614_v46  ;;  %2657 = verf.f32 %v1346_v34  ;;  %v3944_v61 = vmul.f32 %v1701_v63, %v3775_v60  ;;  %v1707_v11 = vadd.f32 1.0, %v2616_v42  ;;  %v5444_v34 = vld [vmem:[#allocation8_spill] sm:$0xff] }
 0x132   : > { %5431 = vst [vmem:[#allocation7_spill] sm:$0xff] %v3913_v49  ;;  %v3915_v32 = vpop.f32.mrf.mxu1  ;;  %v3917_v1 = vpop.eup %2627  ;;  %5438 = vst [vmem:[#allocation60_spill] sm:$0xff] %v3938_v0  ;;  %v5439_v49 = vld [vmem:[#allocation6_spill] sm:$0xff]  ;;  %v3947_v19 = vmul.f32 0.5, %v3612_v12  ;;  %2659 = verf.f32 %v1341_v40  ;;  %v3954_v46 = vmul.f32 %v1845_v9, %v3794_v15  ;;  %v3957_v6 = vmul.f32 0.5, %v5433_v2 }
 0x133   : > { %5432 = vst [vmem:[#allocation58_spill] sm:$0xff] %v3915_v32  ;;  %v3923_v58 = vpop.eup %2629  ;;  %v3931_v7 = vpop.f32.mrf.mxu0  ;;  %v1294_v4 = vmul.f32 0.70710677, %v5439_v49  ;;  %5440 = vst [vmem:[#allocation6_spill] sm:$0xff] %v3944_v61  ;;  %2661 = verf.f32 %v1340_v21  ;;  %v1295_v60 = vmul.f32 0.70710677, %v5444_v34  ;;  %v3961_v42 = vmul.f32 %v1706_v20, %v3803_v44 }
 0x134   : > { %5436 = vst [vmem:[#allocation23_spill] sm:$0xff] %v3931_v7  ;;  %v3933_v32 = vpop.f32.mrf.mxu1  ;;  %v3935_v18 = vpop.eup %2631  ;;  %5443 = vst [vmem:[#allocation63_spill] sm:$0xff] %v3954_v46  ;;  %v1851_v12 = vadd.f32 1.0, %v2618_v51  ;;  %v3964_v40 = vmul.f32 0.5, %v5439_v49  ;;  %v3967_v0 = vmul.f32 0.5, %v5430_v3  ;;  %v3974_v21 = vmul.f32 %v1850_v48, %v3818_v39  ;;  %v5449_v44 = vld [vmem:[#allocation9_spill] sm:$0xff] }
 0x135   : > { %5437 = vst [vmem:[#allocation59_spill] sm:$0xff] %v3933_v32  ;;  %v3941_v47 = vpop.eup %2633  ;;  %v3949_v57 = vpop.f32.mrf.mxu0  ;;  %5445 = vst [vmem:[#allocation8_spill] sm:$0xff] %v3961_v42  ;;  %2663 = verf.f32 %v1294_v4  ;;  %v3977_v2 = vmul.f32 0.5, %v5444_v34  ;;  %v1300_v51 = vmul.f32 0.70710677, %v5449_v44  ;;  %v3981_v49 = vmul.f32 %v1707_v11, %v3832_v56 }
 0x136   : > { %5441 = vst [vmem:[#allocation61_spill] sm:$0xff] %v3949_v57  ;;  %v3951_v32 = vpop.f32.mrf.mxu1  ;;  %v2636_v59 = vpop.eup %2635  ;;  %5448 = vst [vmem:[#allocation66_spill] sm:$0xff] %v3974_v21  ;;  %v3984_v3 = vmul.f32 0.5, %v3627_v22  ;;  %v3987_v46 = vmul.f32 0.5, %v5449_v44  ;;  %2665 = verf.f32 %v1295_v60  ;;  %v3995_v34 = vmul.f32 0.5, %v3633_v26  ;;  %v5453_v21 = vld [vmem:[#allocation11_spill] sm:$0xff] }
 0x137   : > { %5442 = vst [vmem:[#allocation62_spill] sm:$0xff] %v3951_v32  ;;  %v2638_v63 = vpop.eup %2637  ;;  %v3969_v32 = vpop.f32.mrf.mxu0  ;;  %v1306_v56 = vmul.f32 0.70710677, %v5453_v21  ;;  %v3999_v22 = vmul.f32 %v1851_v12, %v3848_v27  ;;  %v1185_v7 = vmul.f32 0.5, %v3767_v45  ;;  %2667 = verf.f32 %v1300_v51  ;;  %v5457_v60 = vld [vmem:[#allocation12_spill] sm:$0xff] }
 0x138   : > { %5446 = vst [vmem:[#allocation64_spill] sm:$0xff] %v3969_v32  ;;  %v3971_v15 = vpop.f32.mrf.mxu1  ;;  %v2640_v9 = vpop.eup %2639  ;;  %v1760_v11 = vadd.f32 1.0, %v2638_v63  ;;  %v1307_v26 = vmul.f32 0.70710677, %v5457_v60  ;;  %v1184_v29 = vmul.f32 0.5, %v3752_v13  ;;  %v1749_v61 = vadd.f32 1.0, %v2636_v59 }
 0x139   : > { %5447 = vst [vmem:[#allocation65_spill] sm:$0xff] %v3971_v15  ;;  %v2642_v20 = vpop.eup %2641  ;;  %v5450_v15 = vld [vmem:[#allocation10_spill] sm:$0xff]  ;;  %v3990_v39 = vpop.f32.mrf.mxu0  ;;  %5454 = vst [vmem:[#allocation11_spill] sm:$0xff] %v3999_v22  ;;  %v1755_v44 = vadd.f32 1.0, %v2640_v9  ;;  %v1179_v27 = vmul.f32 0.5, %v3743_v35  ;;  %v1178_v51 = vmul.f32 0.5, %v3730_v17 }
 0x13a   : > { %v1301_v32 = vmul.f32 0.70710677, %v5450_v15  ;;  %5451 = vst [vmem:[#allocation9_spill] sm:$0xff] %v3990_v39  ;;  %v3992_v4 = vpop.f32.mrf.mxu1  ;;  %v2644_v48 = vpop.eup %2643  ;;  %v1754_v23 = vadd.f32 1.0, %v2642_v20  ;;  %v5460_v20 = vld [vmem:[#allocation14_spill] sm:$0xff] }
 0x13b   : > { %5452 = vst [vmem:[#allocation10_spill] sm:$0xff] %v3992_v4  ;;  %v2646_v57 = vpop.eup %2645  ;;  %v1761_v55 = vadd.f32 1.0, %v2644_v48  ;;  %v4002_v5 = vpop.f32.mrf.mxu0  ;;  %v1312_v42 = vmul.f32 0.70710677, %v5460_v20  ;;  %v1947_v59 = vmul.f32 %v1755_v44, %v1179_v27 }
 0x13c   : > { %5455 = vst [vmem:[#allocation67_spill] sm:$0xff] %v4002_v5  ;;  %v4004_v39 = vpop.f32.mrf.mxu1  ;;  %v2648_v4 = vpop.eup %2647  ;;  %2669 = verf.f32 %v1301_v32  ;;  %v1748_v22 = vadd.f32 1.0, %v2646_v57  ;;  %v1173_v32 = vmul.f32 0.5, %v3713_v31  ;;  %v1172_v57 = vmul.f32 0.5, %v3698_v38 }
 0x13d   : > { %5456 = vst [vmem:[#allocation68_spill] sm:$0xff] %v4004_v39  ;;  %v2650_v63 = vpop.eup %2649  ;;  %v1953_v12 = vmul.f32 %v1761_v55, %v1185_v7  ;;  %v4009_v9 = vpop.f32.mrf.mxu0  ;;  %2671 = verf.f32 %v1306_v56  ;;  %v1952_v39 = vmul.f32 %v1760_v11, %v1184_v29  ;;  %v1743_v13 = vadd.f32 1.0, %v2648_v4  ;;  %v5462_v4 = vld [vmem:[#allocation15_spill] sm:$0xff] }
 0x13e   : > { %5458 = vst [vmem:[#allocation12_spill] sm:$0xff] %v4009_v9  ;;  %v4011_v45 = vpop.f32.mrf.mxu1  ;;  %v2652_v48 = vpop.eup %2651  ;;  %2673 = verf.f32 %v1307_v26  ;;  %v1946_v56 = vmul.f32 %v1754_v23, %v1178_v51  ;;  %v1167_v11 = vmul.f32 0.5, %v3683_v28  ;;  %v1313_v9 = vmul.f32 0.70710677, %v5462_v4 }
 0x13f   : > { %5459 = vst [vmem:[#allocation69_spill] sm:$0xff] %v4011_v45  ;;  %v2654_v5 = vpop.eup %2653  ;;  %2066 = vmatprep.subr.mxu1 %v1953_v12  ;;  %v4018_v55 = vpop.f32.mrf.mxu0  ;;  %v1742_v45 = vadd.f32 1.0, %v2650_v63  ;;  %v1737_v29 = vadd.f32 1.0, %v2652_v48  ;;  %v1941_v31 = vmul.f32 %v1749_v61, %v1173_v32  ;;  %v1161_v26 = vmul.f32 0.5, %v3647_v36  ;;  %v5464_v48 = vld [vmem:[#allocation16_spill] sm:$0xff] }
 0x140   : > { %v4016_v35 = vpop.f32.mrf.mxu1  ;;  %5461 = vst [vmem:[#allocation14_spill] sm:$0xff] %v4018_v55  ;;  %v2656_v7 = vpop.eup %2655  ;;  %2067 = vmatpush1.msra.mxu1 %v1952_v39  ;;  %v1736_v55 = vadd.f32 1.0, %v2654_v5  ;;  %v1166_v38 = vmul.f32 0.5, %v3665_v16  ;;  %v1940_v23 = vmul.f32 %v1748_v22, %v1172_v57  ;;  %2675 = verf.f32 %v1312_v42  ;;  %v5465_v42 = vld [vmem:[#allocation17_spill] sm:$0xff] }
 0x141   : > { %v2658_v17 = vpop.eup %2657  ;;  %2068 = vmatprep.subr.mxu1 %v1947_v59  ;;  %v4025_v27 = vpop.f32.mrf.mxu0  ;;  %v1731_v63 = vadd.f32 1.0, %v2656_v7  ;;  %v1935_v28 = vmul.f32 %v1743_v13, %v1167_v11  ;;  %v1318_v51 = vmul.f32 0.70710677, %v5464_v48  ;;  %v1712_v59 = vadd.f32 1.0, %v3882_v52 }
 0x142   : > { %v4023_v44 = vpop.f32.mrf.mxu1  ;;  %5463 = vst [vmem:[#allocation15_spill] sm:$0xff] %v4025_v27  ;;  %v2660_v12 = vpop.eup %2659  ;;  %2069 = vmatpush1.msra.mxu1 %v1946_v56  ;;  %v1730_v5 = vadd.f32 1.0, %v2658_v17  ;;  %v1160_v36 = vmul.f32 0.5, %v3639_v30  ;;  %v1934_v27 = vmul.f32 %v1742_v45, %v1166_v38  ;;  %v1929_v57 = vmul.f32 %v1737_v29, %v1161_v26  ;;  %v5466_v29 = vld [vmem:[#allocation19_spill] sm:$0xff] }
 0x143   : > { %v2662_v39 = vpop.eup %2661  ;;  %2070 = vmatprep.subr.mxu1 %v1941_v31  ;;  %v4032_v32 = vpop.f32.mrf.mxu0  ;;  %v1725_v22 = vadd.f32 1.0, %v2660_v12  ;;  %2677 = verf.f32 %v1313_v9  ;;  %v1319_v13 = vmul.f32 0.70710677, %v5465_v42  ;;  %v1856_v11 = vadd.f32 1.0, %v3891_v43 }
 0x144   : > { %v4030_v61 = vpop.f32.mrf.mxu1  ;;  %2071 = vmatpush1.msra.mxu1 %v1940_v23  ;;  %v2664_v16 = vpop.eup %2663  ;;  %v1724_v31 = vadd.f32 1.0, %v2662_v39  ;;  %v4043_v52 = vmul.f32 0.5, %v5450_v15  ;;  %v1928_v30 = vmul.f32 %v1736_v55, %v1160_v36  ;;  %v1719_v17 = vadd.f32 1.0, %v3935_v18  ;;  %v5467_v39 = vld [vmem:[#allocation22_spill] sm:$0xff] }
 0x145   : > { %2072 = vmatprep.subr.mxu1 %v1935_v28  ;;  %v4039_v56 = vpop.f32.mrf.mxu0  ;;  %v2666_v45 = vpop.eup %2665  ;;  %v1923_v9 = vmul.f32 %v1731_v63, %v3995_v34  ;;  %2679 = verf.f32 %v1318_v51  ;;  %v1324_v12 = vmul.f32 0.70710677, %v5466_v29  ;;  %v1904_v43 = vmul.f32 %v1712_v59, %v3855_v8 }
 0x146   : > { %v4037_v7 = vpop.f32.mrf.mxu1  ;;  %2073 = vmatpush1.msra.mxu1 %v1934_v27  ;;  %v1713_v15 = vadd.f32 1.0, %v3901_v25  ;;  %v1718_v55 = vadd.f32 1.0, %v3917_v1  ;;  %v1922_v27 = vmul.f32 %v1730_v5, %v3984_v3  ;;  %v2668_v18 = vpop.eup %2667  ;;  %v1857_v34 = vadd.f32 1.0, %v3907_v24 }
 0x147   : > { %2074 = vmatprep.subr.mxu1 %v1929_v57  ;;  %v4050_v38 = vpop.f32.mrf.mxu0  ;;  %v1917_v23 = vmul.f32 %v1725_v22, %v3967_v0  ;;  %2681 = verf.f32 %v1319_v13  ;;  %v1325_v63 = vmul.f32 0.70710677, %v5467_v39  ;;  %v4064_v25 = vmul.f32 %v1856_v11, %v3871_v62 }
 0x148   : > { %v4048_v26 = vpop.f32.mrf.mxu1  ;;  %2075 = vmatpush1.msra.mxu1 %v1928_v30  ;;  %v1672_v1 = vadd.f32 1.0, %v3923_v58  ;;  %v1916_v3 = vmul.f32 %v1724_v31, %v3957_v6  ;;  %v1114_v24 = vmul.f32 0.5, %v5453_v21  ;;  %v1911_v59 = vmul.f32 %v1719_v17, %v3929_v41  ;;  %v5471_v21 = vld [vmem:[#allocation24_spill] sm:$0xff] }
 0x149   : > { %2076 = vmatprep.subr.mxu1 %v1923_v9  ;;  %v4061_v51 = vpop.f32.mrf.mxu0  ;;  %v2670_v8 = vpop.eup %2669  ;;  %v1673_v5 = vadd.f32 1.0, %v3941_v47  ;;  %v1678_v36 = vadd.f32 1.0, %v2664_v16  ;;  %2683 = verf.f32 %v1324_v12  ;;  %v1905_v62 = vmul.f32 %v1713_v15, %v3888_v50 }
 0x14a   : > { %v4059_v28 = vpop.f32.mrf.mxu1  ;;  %5468 = vst [vmem:[#allocation16_spill] sm:$0xff] %v4061_v51  ;;  %2077 = vmatpush1.msra.mxu1 %v1922_v27  ;;  %v2672_v0 = vpop.eup %2671  ;;  %v1910_v58 = vmul.f32 %v1718_v55, %v3904_v33  ;;  %v1115_v6 = vmul.f32 0.5, %v5457_v60  ;;  %v1330_v13 = vmul.f32 0.70710677, %v5471_v21  ;;  %v4080_v41 = vmul.f32 %v1857_v34, %v3894_v37 }
 0x14b   : > { %2078 = vmatprep.subr.mxu1 %v1917_v23  ;;  %v4073_v57 = vpop.f32.mrf.mxu0  ;;  %v2674_v11 = vpop.eup %2673  ;;  %v1679_v47 = vadd.f32 1.0, %v2666_v45  ;;  %2685 = verf.f32 %v1325_v63  ;;  %v1331_v16 = vmul.f32 0.70710677, %v3769_v14  ;;  %v4088_v50 = vmul.f32 %v1672_v1, %v3920_v53 }
 0x14c   : > { %v4071_v22 = vpop.f32.mrf.mxu1  ;;  %5470 = vst [vmem:[#allocation19_spill] sm:$0xff] %v4073_v57  ;;  %2079 = vmatpush1.msra.mxu1 %v1916_v3  ;;  %v1684_v33 = vadd.f32 1.0, %v2668_v18  ;;  %v1685_v60 = vadd.f32 1.0, %v2670_v8  ;;  %v1120_v17 = vmul.f32 0.5, %v5460_v20  ;;  %v4092_v37 = vmul.f32 %v1673_v5, %v3947_v19  ;;  %v5479_v19 = vld [vmem:[#allocation30_spill] sm:$0xff]  ;;  %v5487_v5 = vld [vmem:[#allocation33_spill] sm:$0xff] }
 0x14d   : > { %5469 = vst [vmem:[#allocation17_spill] sm:$0xff] %v4071_v22  ;;  %2080 = vmatprep.subr.mxu1 %v1911_v59  ;;  %v4085_v30 = vpop.f32.mrf.mxu0  ;;  %5474 = vst [vmem:[#allocation70_spill] sm:$0xff] %v4088_v50  ;;  %v4095_v45 = vmul.f32 %v1678_v36, %v3964_v40  ;;  %v4098_v9 = vmul.f32 0.5, %v5462_v4  ;;  %v1382_v12 = vmul.f32 0.70710677, %v3785_v54  ;;  %v2676_v55 = vpop.eup %2675  ;;  %v1690_v27 = vadd.f32 1.0, %v2672_v0 }
 0x14e   : > { %v4083_v31 = vpop.f32.mrf.mxu1  ;;  %5473 = vst [vmem:[#allocation24_spill] sm:$0xff] %v4085_v30  ;;  %2081 = vmatpush1.msra.mxu1 %v1910_v58  ;;  %5475 = vst [vmem:[#allocation71_spill] sm:$0xff] %v4092_v37  ;;  %v4106_v20 = vmul.f32 0.5, %v5464_v48  ;;  %2687 = verf.f32 %v1330_v13  ;;  %v1336_v18 = vmul.f32 0.70710677, %v5479_v19  ;;  %v4110_v40 = vmul.f32 %v1679_v47, %v3977_v2  ;;  %v5486_v0 = vld [vmem:[#allocation8_spill] sm:$0xff] }
 0x14f   : > { %5472 = vst [vmem:[#allocation22_spill] sm:$0xff] %v4083_v31  ;;  %5476 = vst [vmem:[#allocation72_spill] sm:$0xff] %v4095_v45  ;;  %2082 = vmatprep.subr.mxu1 %v1905_v62  ;;  %v4103_v53 = vpop.f32.mrf.mxu0  ;;  %v1691_v4 = vadd.f32 1.0, %v2674_v11  ;;  %2689 = verf.f32 %v1331_v16  ;;  %v1383_v34 = vmul.f32 0.70710677, %v3797_v10  ;;  %v4119_v48 = vmul.f32 %v1684_v33, %v3987_v46  ;;  %v5488_v62 = vld [vmem:[#allocation6_spill] sm:$0xff] }
 0x150   : > { %v4101_v15 = vpop.f32.mrf.mxu1  ;;  %5478 = vst [vmem:[#allocation74_spill] sm:$0xff] %v4103_v53  ;;  %2083 = vmatpush1.msra.mxu1 %v1904_v43  ;;  %5480 = vst [vmem:[#allocation30_spill] sm:$0xff] %v4110_v40  ;;  %v2678_v8 = vpop.eup %2677  ;;  %v4122_v1 = vmul.f32 %v1685_v60, %v4043_v52  ;;  %v4125_v2 = vmul.f32 0.5, %v5465_v42  ;;  %v5485_v43 = vld [vmem:[#allocation32_spill] sm:$0xff]  ;;  %v1696_v59 = vadd.f32 1.0, %v2676_v55  ;;  %2691 = verf.f32 %v1382_v12  ;;  %v5492_v11 = vld [vmem:[#allocation34_spill] sm:$0xff] }
 0x151   : > { %5477 = vst [vmem:[#allocation73_spill] sm:$0xff] %v4101_v15  ;;  %2084 = vmatprep.subr.mxu1 %v3981_v49  ;;  %v4116_v63 = vpop.f32.mrf.mxu0  ;;  %5483 = vst [vmem:[#allocation77_spill] sm:$0xff] %v4119_v48  ;;  %v1337_v3 = vmul.f32 0.70710677, %v5485_v43  ;;  %v4130_v49 = vmul.f32 0.5, %v5466_v29  ;;  %v4138_v42 = vmul.f32 %v1690_v27, %v1114_v24  ;;  %v4141_v13 = vmul.f32 0.5, %v5467_v39 }
 0x152   : > { %v4114_v23 = vpop.f32.mrf.mxu1  ;;  %5482 = vst [vmem:[#allocation76_spill] sm:$0xff] %v4116_v63  ;;  %5484 = vst [vmem:[#allocation78_spill] sm:$0xff] %v4122_v1  ;;  %2085 = vmatpush1.msra.mxu1 %v5486_v0  ;;  %v1388_v36 = vmul.f32 0.70710677, %v5487_v5  ;;  %v2680_v58 = vpop.eup %2679  ;;  %2693 = verf.f32 %v1336_v18  ;;  %v1342_v47 = vmul.f32 0.70710677, %v5492_v11  ;;  %v4145_v16 = vmul.f32 %v1691_v4, %v1115_v6 }
 0x153   : > { %5481 = vst [vmem:[#allocation75_spill] sm:$0xff] %v4114_v23  ;;  %2086 = vmatprep.subr.mxu1 %v5488_v62  ;;  %v4136_v52 = vpop.f32.mrf.mxu0  ;;  %5491 = vst [vmem:[#allocation33_spill] sm:$0xff] %v4138_v42  ;;  %v5493_v29 = vld [vmem:[#allocation5_spill] sm:$0xff]  ;;  %v1697_v33 = vadd.f32 1.0, %v2678_v8  ;;  %2695 = verf.f32 %v1383_v34  ;;  %v5496_v55 = vld [vmem:[#allocation54_spill] sm:$0xff]  ;;  %v4154_v39 = vmul.f32 0.5, %v5471_v21  ;;  %v4161_v34 = vmul.f32 %v1696_v59, %v1120_v17 }
 0x154   : > { %v4134_v46 = vpop.f32.mrf.mxu1  ;;  %5490 = vst [vmem:[#allocation8_spill] sm:$0xff] %v4136_v52  ;;  %2087 = vmatpush1.msra.mxu1 %v5493_v29  ;;  %5494 = vst [vmem:[#allocation6_spill] sm:$0xff] %v4145_v16  ;;  %v5495_v60 = vld [vmem:[#allocation37_spill] sm:$0xff]  ;;  %v2682_v27 = vpop.eup %2681  ;;  %v4157_v18 = vmul.f32 0.5, %v3769_v14  ;;  %2697 = verf.f32 %v1337_v3  ;;  %v5499_v6 = vld [vmem:[#allocation38_spill] sm:$0xff]  ;;  %v1702_v62 = vadd.f32 1.0, %v2680_v58 }
 0x155   : > { %5489 = vst [vmem:[#allocation32_spill] sm:$0xff] %v4134_v46  ;;  %v1389_v12 = vmul.f32 0.70710677, %v5495_v60  ;;  %2088 = vmatprep.subr.mxu1 %v5496_v55  ;;  %v4151_v24 = vpop.f32.mrf.mxu0  ;;  %v1343_v4 = vmul.f32 0.70710677, %v5499_v6  ;;  %v5500_v8 = vld [vmem:[#allocation50_spill] sm:$0xff]  ;;  %2699 = verf.f32 %v1388_v36  ;;  %v4178_v36 = vmul.f32 %v1697_v33, %v4098_v9 }
 0x156   : > { %v4149_v0 = vpop.f32.mrf.mxu1  ;;  %5498 = vst [vmem:[#allocation5_spill] sm:$0xff] %v4151_v24  ;;  %2089 = vmatpush1.msra.mxu1 %v5500_v8  ;;  %5501 = vst [vmem:[#allocation37_spill] sm:$0xff] %v4161_v34  ;;  %v5502_v29 = vld [vmem:[#allocation42_spill] sm:$0xff]  ;;  %v5503_v50 = vld [vmem:[#allocation44_spill] sm:$0xff]  ;;  %v2684_v45 = vpop.eup %2683  ;;  %v4170_v14 = vmul.f32 0.5, %v3785_v54  ;;  %v4173_v3 = vmul.f32 0.5, %v5479_v19  ;;  %2701 = verf.f32 %v1342_v47  ;;  %v4193_v33 = vmul.f32 %v1702_v62, %v4106_v20 }
 0x157   : > { %5497 = vst [vmem:[#allocation34_spill] sm:$0xff] %v4149_v0  ;;  %v1394_v55 = vmul.f32 0.70710677, %v5502_v29  ;;  %2090 = vmatprep.subr.mxu1 %v5503_v50  ;;  %v4167_v21 = vpop.f32.mrf.mxu0  ;;  %v5506_v17 = vld [vmem:[#allocation43_spill] sm:$0xff]  ;;  %v5507_v58 = vld [vmem:[#allocation40_spill] sm:$0xff]  ;;  %5508 = vst [vmem:[#allocation50_spill] sm:$0xff] %v4178_v36  ;;  %2703 = verf.f32 %v1389_v12 }
 0x158   : > { %v4165_v37 = vpop.f32.mrf.mxu1  ;;  %5505 = vst [vmem:[#allocation38_spill] sm:$0xff] %v4167_v21  ;;  %v1348_v59 = vmul.f32 0.70710677, %v5506_v17  ;;  %2091 = vmatpush1.msra.mxu1 %v5507_v58  ;;  %v1703_v50 = vadd.f32 1.0, %v2682_v27  ;;  %v5509_v8 = vld [vmem:[#allocation45_spill] sm:$0xff]  ;;  %v5510_v48 = vld [vmem:[#allocation36_spill] sm:$0xff]  ;;  %v2686_v54 = vpop.eup %2685  ;;  %2705 = verf.f32 %v1343_v4 }
 0x159   : > { %5504 = vst [vmem:[#allocation54_spill] sm:$0xff] %v4165_v37  ;;  %v1395_v40 = vmul.f32 0.70710677, %v5509_v8  ;;  %2092 = vmatprep.subr.mxu1 %v5510_v48  ;;  %v4182_v1 = vpop.f32.mrf.mxu0  ;;  %v4185_v19 = vmul.f32 0.5, %v3797_v10  ;;  %v4188_v47 = vmul.f32 0.5, %v5485_v43  ;;  %v5512_v58 = vld [vmem:[#allocation46_spill] sm:$0xff]  ;;  %2707 = verf.f32 %v1394_v55 }
 0x15a   : > { %5511 = vst [vmem:[#allocation42_spill] sm:$0xff] %v4182_v1  ;;  %v1349_v42 = vmul.f32 0.70710677, %v5512_v58  ;;  %v5513_v9 = vld [vmem:[#allocation31_spill] sm:$0xff]  ;;  %5514 = vst [vmem:[#allocation44_spill] sm:$0xff] %v4193_v33  ;;  %v1708_v12 = vadd.f32 1.0, %v2684_v45  ;;  %v4197_v34 = vpop.f32.mrf.mxu1  ;;  %2709 = verf.f32 %v1348_v59  ;;  %v4210_v55 = vmul.f32 %v1703_v50, %v4125_v2 }
 0x15b   : > { %2093 = vmatpush1.msra.mxu1 %v5513_v9  ;;  %v5515_v48 = vld [vmem:[#allocation48_spill] sm:$0xff]  ;;  %5517 = vst [vmem:[#allocation43_spill] sm:$0xff] %v4197_v34  ;;  %v4199_v10 = vpop.f32.mrf.mxu0  ;;  %v4202_v43 = vmul.f32 0.5, %v5487_v5  ;;  %v4205_v4 = vmul.f32 0.5, %v5492_v11  ;;  %v5519_v9 = vld [vmem:[#allocation49_spill] sm:$0xff]  ;;  %v5520_v62 = vld [vmem:[#allocation26_spill] sm:$0xff]  ;;  %v2688_v45 = vpop.eup %2687  ;;  %2711 = verf.f32 %v1395_v40 }
 0x15c   : > { %v1400_v27 = vmul.f32 0.70710677, %v5515_v48  ;;  %v5516_v16 = vld [vmem:[#allocation28_spill] sm:$0xff]  ;;  %5518 = vst [vmem:[#allocation40_spill] sm:$0xff] %v4199_v10  ;;  %v1354_v20 = vmul.f32 0.70710677, %v5519_v9  ;;  %v2690_v5 = vpop.eup %2689  ;;  %2713 = verf.f32 %v1349_v42  ;;  %v4223_v34 = vmul.f32 %v1708_v12, %v4130_v49 }
 0x15d   : > { %2094 = vmatprep.subr.mxu1 %v5516_v16  ;;  %5521 = vst [vmem:[#allocation45_spill] sm:$0xff] %v4210_v55  ;;  %v1709_v16 = vadd.f32 1.0, %v2686_v54  ;;  %v5522_v36 = vld [vmem:[#allocation52_spill] sm:$0xff]  ;;  %v4213_v10 = vpop.f32.mrf.mxu0  ;;  %v4216_v1 = vmul.f32 0.5, %v5495_v60  ;;  %v4219_v11 = vmul.f32 0.5, %v5499_v6  ;;  %v5524_v59 = vld [vmem:[#allocation53_spill] sm:$0xff]  ;;  %v4229_v54 = vpop.f32.mrf.mxu1 }
 0x15e   : > { %2095 = vmatpush1.msra.mxu1 %v5520_v62  ;;  %v1401_v33 = vmul.f32 0.70710677, %v5522_v36  ;;  %5523 = vst [vmem:[#allocation36_spill] sm:$0xff] %v4213_v10  ;;  %v1355_v62 = vmul.f32 0.70710677, %v5524_v59  ;;  %5525 = vst [vmem:[#allocation46_spill] sm:$0xff] %v4223_v34  ;;  %2715 = verf.f32 %v1400_v27  ;;  %v2692_v60 = vpop.eup %2691 }
 0x15f   : > { %v4226_v2 = vmul.f32 0.5, %v5502_v29  ;;  %v5526_v40 = vld [vmem:[#allocation55_spill] sm:$0xff]  ;;  %5527 = vst [vmem:[#allocation31_spill] sm:$0xff] %v4229_v54  ;;  %v4231_v55 = vpop.f32.mrf.mxu0  ;;  %v1714_v10 = vadd.f32 1.0, %v2688_v45  ;;  %v4234_v6 = vmul.f32 0.5, %v5506_v17  ;;  %2717 = verf.f32 %v1354_v20  ;;  %v5529_v42 = vld [vmem:[#allocation56_spill] sm:$0xff]  ;;  %v2694_v49 = vpop.eup %2693 }
 0x160   : > { %v1406_v50 = vmul.f32 0.70710677, %v5526_v40  ;;  %5528 = vst [vmem:[#allocation48_spill] sm:$0xff] %v4231_v55  ;;  %v1360_v21 = vmul.f32 0.70710677, %v5529_v42  ;;  %v4238_v12 = vmul.f32 %v1709_v16, %v4141_v13  ;;  %v1715_v29 = vadd.f32 1.0, %v2690_v5  ;;  %v2696_v54 = vpop.eup %2695  ;;  %v4254_v5 = vpop.f32.mrf.mxu1 }
 0x161   : > { %2719 = verf.f32 %v1401_v33  ;;  %v5531_v27 = vld [vmem:[#allocation7_spill] sm:$0xff]  ;;  %v4241_v37 = vpop.f32.mrf.mxu0  ;;  %v4244_v55 = vmul.f32 0.5, %v5509_v8  ;;  %v4247_v17 = vmul.f32 0.5, %v5512_v58  ;;  %v5533_v20 = vld [vmem:[#allocation58_spill] sm:$0xff]  ;;  %v2698_v24 = vpop.eup %2697  ;;  %v1766_v0 = vadd.f32 1.0, %v2692_v60  ;;  %5535 = vst [vmem:[#allocation26_spill] sm:$0xff] %v4254_v5 }
 0x162   : > { %5530 = vst [vmem:[#allocation28_spill] sm:$0xff] %v4238_v12  ;;  %v1407_v34 = vmul.f32 0.70710677, %v5531_v27  ;;  %5532 = vst [vmem:[#allocation49_spill] sm:$0xff] %v4241_v37  ;;  %2721 = verf.f32 %v1355_v62  ;;  %v1361_v45 = vmul.f32 0.70710677, %v5533_v20  ;;  %v2700_v8 = vpop.eup %2699  ;;  %v4259_v37 = vmul.f32 %v1714_v10, %v4154_v39 }
 0x163   : > { %v4251_v13 = vmul.f32 0.5, %v5515_v48  ;;  %2723 = verf.f32 %v1406_v50  ;;  %v5534_v33 = vld [vmem:[#allocation23_spill] sm:$0xff]  ;;  %v4256_v12 = vpop.f32.mrf.mxu0  ;;  %v1720_v58 = vadd.f32 1.0, %v2694_v49  ;;  %v2702_v46 = vpop.eup %2701  ;;  %v4263_v60 = vmul.f32 %v1715_v29, %v4157_v18  ;;  %v5540_v50 = vld [vmem:[#allocation61_spill] sm:$0xff] }
 0x164   : > { %v1412_v16 = vmul.f32 0.70710677, %v5534_v33  ;;  %5536 = vst [vmem:[#allocation52_spill] sm:$0xff] %v4256_v12  ;;  %5537 = vst [vmem:[#allocation53_spill] sm:$0xff] %v4259_v37  ;;  %2725 = verf.f32 %v1360_v21  ;;  %v5538_v62 = vld [vmem:[#allocation59_spill] sm:$0xff]  ;;  %v4266_v48 = vmul.f32 0.5, %v5519_v9  ;;  %v2704_v12 = vpop.eup %2703  ;;  %v4276_v18 = vmul.f32 %v1766_v0, %v4170_v14  ;;  %v4282_v37 = vpop.f32.mrf.mxu1 }
 0x165   : > { %v1366_v52 = vmul.f32 0.70710677, %v5538_v62  ;;  %5539 = vst [vmem:[#allocation55_spill] sm:$0xff] %v4263_v60  ;;  %2727 = verf.f32 %v1407_v34  ;;  %v1413_v5 = vmul.f32 0.70710677, %v5540_v50  ;;  %v4269_v63 = vpop.f32.mrf.mxu0  ;;  %v1767_v23 = vadd.f32 1.0, %v2696_v54  ;;  %v2706_v49 = vpop.eup %2705 }
 0x166   : > { %5541 = vst [vmem:[#allocation56_spill] sm:$0xff] %v4269_v63  ;;  %v4272_v39 = vmul.f32 0.5, %v5522_v36  ;;  %2729 = verf.f32 %v1361_v45  ;;  %v5543_v21 = vld [vmem:[#allocation62_spill] sm:$0xff]  ;;  %5544 = vst [vmem:[#allocation58_spill] sm:$0xff] %v4276_v18  ;;  %v4279_v9 = vmul.f32 0.5, %v5524_v59  ;;  %v5546_v34 = vld [vmem:[#allocation12_spill] sm:$0xff]  ;;  %v2708_v54 = vpop.eup %2707  ;;  %v4287_v36 = vmul.f32 %v1720_v58, %v4173_v3 }
 0x167   : > { %v1367_v10 = vmul.f32 0.70710677, %v5543_v21  ;;  %2731 = verf.f32 %v1412_v16  ;;  %v1425_v29 = vmul.f32 0.70710677, %v5546_v34  ;;  %5547 = vst [vmem:[#allocation59_spill] sm:$0xff] %v4282_v37  ;;  %v4284_v60 = vpop.f32.mrf.mxu0  ;;  %v1721_v45 = vadd.f32 1.0, %v2698_v24  ;;  %v2710_v0 = vpop.eup %2709 }
 0x168   : > { %5542 = vst [vmem:[#allocation7_spill] sm:$0xff] %v4272_v39  ;;  %5545 = vst [vmem:[#allocation23_spill] sm:$0xff] %v4279_v9  ;;  %2733 = verf.f32 %v1366_v52  ;;  %v5550_v63 = vld [vmem:[#allocation67_spill] sm:$0xff]  ;;  %v4291_v14 = vmul.f32 0.5, %v5526_v40  ;;  %v4294_v59 = vmul.f32 0.5, %v5529_v42  ;;  %v5553_v16 = vld [vmem:[#allocation9_spill] sm:$0xff]  ;;  %v4300_v3 = vmul.f32 %v1767_v23, %v4185_v19 }
 0x169   : > { %5548 = vst [vmem:[#allocation61_spill] sm:$0xff] %v4284_v60  ;;  %5549 = vst [vmem:[#allocation62_spill] sm:$0xff] %v4287_v36  ;;  %v1424_v39 = vmul.f32 0.70710677, %v5550_v63  ;;  %2735 = verf.f32 %v1413_v5  ;;  %v1419_v18 = vmul.f32 0.70710677, %v5553_v16  ;;  %v4297_v37 = vpop.f32.mrf.mxu0  ;;  %v2712_v60 = vpop.eup %2711  ;;  %v4310_v15 = vmul.f32 %v1721_v45, %v4188_v47 }
 0x16a   : > { %5551 = vst [vmem:[#allocation12_spill] sm:$0xff] %v4291_v14  ;;  %5552 = vst [vmem:[#allocation67_spill] sm:$0xff] %v4294_v59  ;;  %v1772_v24 = vadd.f32 1.0, %v2700_v8  ;;  %2737 = verf.f32 %v1367_v10  ;;  %v5556_v52 = vld [vmem:[#allocation64_spill] sm:$0xff]  ;;  %v2714_v36 = vpop.eup %2713  ;;  %v1726_v9 = vadd.f32 1.0, %v2702_v46  ;;  %v5557_v40 = vld [vmem:[#allocation65_spill] sm:$0xff]  ;;  %v4305_v5 = vpop.f32.mrf.mxu1 }
 0x16b   : > { %5554 = vst [vmem:[#allocation9_spill] sm:$0xff] %v4297_v37  ;;  %5555 = vst [vmem:[#allocation79_spill] sm:$0xff] %v4300_v3  ;;  %v1418_v58 = vmul.f32 0.70710677, %v5556_v52  ;;  %v1372_v14 = vmul.f32 0.70710677, %v5557_v40  ;;  %2739 = verf.f32 %v1425_v29  ;;  %v4307_v53 = vpop.f32.mrf.mxu0  ;;  %v2716_v37 = vpop.eup %2715 }
 0x16c   : > { %v5558_v42 = vld [vmem:[#allocation21_spill] sm:$0xff]  ;;  %5559 = vst [vmem:[#allocation64_spill] sm:$0xff] %v4305_v5  ;;  %5560 = vst [vmem:[#allocation65_spill] sm:$0xff] %v4307_v53  ;;  %v4313_v23 = vmul.f32 0.5, %v5531_v27  ;;  %v5563_v19 = vld [vmem:[#allocation10_spill] sm:$0xff]  ;;  %2741 = verf.f32 %v1424_v39  ;;  %v2718_v46 = vpop.eup %2717  ;;  %v1773_v10 = vadd.f32 1.0, %v2704_v12  ;;  %v4323_v47 = vmul.f32 %v1772_v24, %v4202_v43 }
 0x16d   : > { %v1671_v59 = vadd.f32 1.0, %v5558_v42  ;;  %5561 = vst [vmem:[#allocation21_spill] sm:$0xff] %v4310_v15  ;;  %v1373_v8 = vmul.f32 0.70710677, %v5563_v19  ;;  %2743 = verf.f32 %v1419_v18  ;;  %v5564_v29 = vld [vmem:[#allocation68_spill] sm:$0xff]  ;;  %v5565_v42 = vld [vmem:[#allocation13_spill] sm:$0xff]  ;;  %v4318_v5 = vpop.f32.mrf.mxu0  ;;  %v4329_v12 = vmul.f32 %v1726_v9, %v4205_v4 }
 0x16e   : > { %5562 = vst [vmem:[#allocation80_spill] sm:$0xff] %v4313_v23  ;;  %v1378_v3 = vmul.f32 0.70710677, %v5564_v29  ;;  %5566 = vst [vmem:[#allocation10_spill] sm:$0xff] %v4318_v5  ;;  %v4320_v53 = vpop.eup %2719  ;;  %v1727_v45 = vadd.f32 1.0, %v2706_v49  ;;  %2745 = verf.f32 %v1418_v58  ;;  %v5567_v27 = vld [vmem:[#allocation69_spill] sm:$0xff] }
 0x16f   : > { %v1863_v30 = vmul.f32 %v1671_v59, %v5565_v42  ;;  %v1379_v15 = vmul.f32 0.70710677, %v5567_v27  ;;  %v4326_v23 = vpop.eup %2721  ;;  %5568 = vst [vmem:[#allocation68_spill] sm:$0xff] %v4329_v12  ;;  %v4332_v39 = vmul.f32 0.5, %v5533_v20  ;;  %2747 = verf.f32 %v1372_v14  ;;  %v4335_v59 = vpop.f32.mrf.mxu1  ;;  %v5571_v4 = vld [vmem:[#allocation14_spill] sm:$0xff]  ;;  %v5581_v5 = vld [vmem:[#allocation63_spill] sm:$0xff] }
 0x170   : > { %v1384_v18 = vmul.f32 0.70710677, %v4016_v35  ;;  %5569 = vst [vmem:[#allocation13_spill] sm:$0xff] %v4335_v59  ;;  %v4337_v43 = vpop.f32.mrf.mxu0  ;;  %v4339_v49 = vpop.eup %2723  ;;  %v1778_v24 = vadd.f32 1.0, %v2708_v54  ;;  %v4342_v58 = vmul.f32 0.5, %v5534_v33  ;;  %2749 = verf.f32 %v1373_v8  ;;  %v5572_v42 = vld [vmem:[#allocation18_spill] sm:$0xff] }
 0x171   : > { %2096 = vmatprep.subr.mxu1 %v1863_v30  ;;  %5570 = vst [vmem:[#allocation69_spill] sm:$0xff] %v4337_v43  ;;  %v1290_v9 = vmul.f32 0.70710677, %v5571_v4  ;;  %v4346_v20 = vpop.eup %2725  ;;  %v4349_v14 = vmul.f32 %v1773_v10, %v4216_v1  ;;  %v1732_v30 = vadd.f32 1.0, %v2710_v0  ;;  %2751 = verf.f32 %v1378_v3  ;;  %v5575_v43 = vld [vmem:[#allocation15_spill] sm:$0xff]  ;;  %v5606_v59 = vld [vmem:[#allocation20_spill] sm:$0xff] }
 0x172   : > { %2097 = vmatpush1.msra.mxu1 %v5572_v42  ;;  %v1385_v12 = vmul.f32 0.70710677, %v4023_v44  ;;  %v4353_v54 = vpop.f32.mrf.mxu0  ;;  %v4355_v33 = vpop.eup %2727  ;;  %v4358_v8 = vmul.f32 %v1727_v45, %v4219_v11  ;;  %v4361_v42 = vmul.f32 0.5, %v5538_v62  ;;  %2753 = verf.f32 %v1379_v15 }
 0x173   : > { %2098 = vmatprep.subr.mxu1 %v4080_v41  ;;  %5573 = vst [vmem:[#allocation14_spill] sm:$0xff] %v4353_v54  ;;  %v1291_v1 = vmul.f32 0.70710677, %v5575_v43  ;;  %v4365_v0 = vpop.eup %2729  ;;  %v1779_v3 = vadd.f32 1.0, %v2712_v60  ;;  %v4368_v41 = vmul.f32 0.5, %v5540_v50  ;;  %2755 = verf.f32 %v1384_v18  ;;  %v5576_v54 = vld [vmem:[#allocation11_spill] sm:$0xff]  ;;  %v4372_v11 = vpop.f32.mrf.mxu1 }
 0x174   : > { %5574 = vst [vmem:[#allocation18_spill] sm:$0xff] %v4358_v8  ;;  %2099 = vmatpush2.msra.mxu1 %v4064_v25  ;;  %v1390_v10 = vmul.f32 0.70710677, %v4030_v61  ;;  %5577 = vst [vmem:[#allocation15_spill] sm:$0xff] %v4372_v11  ;;  %v4374_v62 = vpop.f32.mrf.mxu0  ;;  %v4376_v15 = vpop.eup %2731  ;;  %v4379_v45 = vmul.f32 %v1778_v24, %v4226_v2  ;;  %v1733_v25 = vadd.f32 1.0, %v2714_v36  ;;  %2757 = verf.f32 %v1290_v9  ;;  %v5579_v50 = vld [vmem:[#allocation66_spill] sm:$0xff] }
 0x175   : > { %2100 = vmatprep.subr.mxu1 %v5576_v54  ;;  %5578 = vst [vmem:[#allocation11_spill] sm:$0xff] %v4374_v62  ;;  %v1296_v60 = vmul.f32 0.70710677, %v4032_v32  ;;  %v4383_v18 = vpop.eup %2733  ;;  %v4386_v8 = vmul.f32 %v1732_v30, %v4234_v6  ;;  %v1784_v54 = vadd.f32 1.0, %v2716_v37  ;;  %2759 = verf.f32 %v1385_v12 }
 0x176   : > { %2101 = vmatpush2.msra.mxu1 %v5579_v50  ;;  %v1391_v62 = vmul.f32 0.70710677, %v4037_v7  ;;  %v4390_v11 = vpop.f32.mrf.mxu0  ;;  %v2736_v2 = vpop.eup %2735  ;;  %v1738_v36 = vadd.f32 1.0, %v2718_v46  ;;  %v4393_v24 = vmul.f32 0.5, %v5543_v21  ;;  %2761 = verf.f32 %v1291_v1  ;;  %v5583_v50 = vld [vmem:[#allocation60_spill] sm:$0xff]  ;;  %v5584_v46 = vld [vmem:[#allocation57_spill] sm:$0xff] }
 0x177   : > { %5580 = vst [vmem:[#allocation66_spill] sm:$0xff] %v4386_v8  ;;  %2102 = vmatprep.subr.mxu1 %v5581_v5  ;;  %5582 = vst [vmem:[#allocation63_spill] sm:$0xff] %v4390_v11  ;;  %v1297_v9 = vmul.f32 0.70710677, %v4039_v56  ;;  %v4397_v6 = vpop.eup %2737  ;;  %v4400_v37 = vmul.f32 %v1779_v3, %v4244_v55  ;;  %v4403_v12 = vmul.f32 0.5, %v5556_v52  ;;  %2763 = verf.f32 %v1390_v10  ;;  %v4407_v21 = vpop.f32.mrf.mxu1  ;;  %v5588_v52 = vld [vmem:[#allocation51_spill] sm:$0xff] }
 0x178   : > { %2103 = vmatpush2.msra.mxu1 %v5583_v50  ;;  %v1396_v5 = vmul.f32 0.70710677, %v4048_v26  ;;  %5585 = vst [vmem:[#allocation60_spill] sm:$0xff] %v4407_v21  ;;  %v4409_v30 = vpop.f32.mrf.mxu0  ;;  %v2740_v1 = vpop.eup %2739  ;;  %v4412_v50 = vmul.f32 %v1733_v25, %v4247_v17  ;;  %v4415_v8 = vmul.f32 0.5, %v5557_v40  ;;  %2765 = verf.f32 %v1296_v60 }
 0x179   : > { %2104 = vmatprep.subr.mxu1 %v5584_v46  ;;  %5586 = vst [vmem:[#allocation57_spill] sm:$0xff] %v4409_v30  ;;  %v1302_v55 = vmul.f32 0.70710677, %v4050_v38  ;;  %v2742_v3 = vpop.eup %2741  ;;  %v4420_v10 = vmul.f32 %v1784_v54, %v4251_v13  ;;  %v1227_v46 = vmul.f32 0.5, %v5553_v16  ;;  %2767 = verf.f32 %v1391_v62  ;;  %v5589_v30 = vld [vmem:[#allocation47_spill] sm:$0xff]  ;;  %v5592_v54 = vld [vmem:[#allocation41_spill] sm:$0xff] }
 0x17a   : > { %5587 = vst [vmem:[#allocation81_spill] sm:$0xff] %v4412_v50  ;;  %2105 = vmatpush2.msra.mxu1 %v5588_v52  ;;  %v1397_v21 = vmul.f32 0.70710677, %v4059_v28  ;;  %v4425_v17 = vpop.f32.mrf.mxu0  ;;  %v2744_v40 = vpop.eup %2743  ;;  %v4428_v25 = vmul.f32 %v1738_v36, %v4266_v48  ;;  %v4431_v60 = vmul.f32 0.5, %v5563_v19  ;;  %2769 = verf.f32 %v1297_v9  ;;  %v5593_v50 = vld [vmem:[#allocation39_spill] sm:$0xff] }
 0x17b   : > { %2106 = vmatprep.subr.mxu1 %v5589_v30  ;;  %5590 = vst [vmem:[#allocation51_spill] sm:$0xff] %v4425_v17  ;;  %v1303_v13 = vmul.f32 0.70710677, %v4061_v51  ;;  %v2746_v16 = vpop.eup %2745  ;;  %v4436_v62 = vadd.f32 1.0, %v4320_v53  ;;  %v1809_v52 = vadd.f32 1.0, %v2740_v1  ;;  %2771 = verf.f32 %v1396_v5  ;;  %v4440_v48 = vpop.f32.mrf.mxu1  ;;  %v5596_v53 = vld [vmem:[#allocation35_spill] sm:$0xff] }
 0x17c   : > { %5591 = vst [vmem:[#allocation47_spill] sm:$0xff] %v4428_v25  ;;  %2107 = vmatpush2.msra.mxu1 %v5592_v54  ;;  %v1402_v30 = vmul.f32 0.70710677, %v4071_v22  ;;  %5594 = vst [vmem:[#allocation41_spill] sm:$0xff] %v4440_v48  ;;  %v4442_v36 = vpop.f32.mrf.mxu0  ;;  %v4444_v19 = vpop.eup %2747  ;;  %v1232_v9 = vmul.f32 0.5, %v5550_v63  ;;  %v1808_v25 = vadd.f32 1.0, %v2742_v3  ;;  %2773 = verf.f32 %v1302_v55 }
 0x17d   : > { %2108 = vmatprep.subr.mxu1 %v5593_v50  ;;  %5595 = vst [vmem:[#allocation39_spill] sm:$0xff] %v4442_v36  ;;  %v1308_v54 = vmul.f32 0.70710677, %v4073_v57  ;;  %v4449_v1 = vpop.eup %2749  ;;  %v1803_v5 = vadd.f32 1.0, %v2744_v40  ;;  %v1233_v17 = vmul.f32 0.5, %v5546_v34  ;;  %2775 = verf.f32 %v1397_v21  ;;  %v5597_v48 = vld [vmem:[#allocation29_spill] sm:$0xff] }
 0x17e   : > { %2109 = vmatpush2.msra.mxu1 %v5596_v53  ;;  %v1403_v50 = vmul.f32 0.70710677, %v4083_v31  ;;  %v4454_v36 = vpop.f32.mrf.mxu0  ;;  %v4456_v11 = vpop.eup %2751  ;;  %v1739_v63 = vadd.f32 1.0, %v4326_v23  ;;  %v1802_v55 = vadd.f32 1.0, %v2746_v16  ;;  %2777 = verf.f32 %v1303_v13  ;;  %v5599_v3 = vld [vmem:[#allocation24_spill] sm:$0xff]  ;;  %v5600_v57 = vld [vmem:[#allocation27_spill] sm:$0xff] }
 0x17f   : > { %2110 = vmatprep.subr.mxu1 %v5597_v48  ;;  %5598 = vst [vmem:[#allocation35_spill] sm:$0xff] %v4454_v36  ;;  %v1309_v53 = vmul.f32 0.70710677, %v5599_v3  ;;  %v4461_v40 = vpop.eup %2753  ;;  %v1797_v34 = vadd.f32 1.0, %v2736_v2  ;;  %v2001_v21 = vmul.f32 %v1809_v52, %v1233_v17  ;;  %2779 = verf.f32 %v1402_v30  ;;  %v5601_v31 = vld [vmem:[#allocation73_spill] sm:$0xff]  ;;  %v4465_v36 = vpop.f32.mrf.mxu1  ;;  %v5607_v30 = vld [vmem:[#allocation75_spill] sm:$0xff] }
 0x180   : > { %2111 = vmatpush2.msra.mxu1 %v5600_v57  ;;  %v1408_v22 = vmul.f32 0.70710677, %v5601_v31  ;;  %v5602_v48 = vld [vmem:[#allocation25_spill] sm:$0xff]  ;;  %5603 = vst [vmem:[#allocation29_spill] sm:$0xff] %v4465_v36  ;;  %v4467_v51 = vpop.f32.mrf.mxu0  ;;  %v4469_v23 = vpop.eup %2755  ;;  %v1796_v13 = vadd.f32 1.0, %v4376_v15  ;;  %v2000_v16 = vmul.f32 %v1808_v25, %v1232_v9  ;;  %2781 = verf.f32 %v1308_v54  ;;  %v5605_v57 = vld [vmem:[#allocation74_spill] sm:$0xff] }
 0x181   : > { %2112 = vmatprep.subr.mxu1 %v5602_v48  ;;  %5604 = vst [vmem:[#allocation27_spill] sm:$0xff] %v4467_v51  ;;  %v1314_v3 = vmul.f32 0.70710677, %v5605_v57  ;;  %v4474_v2 = vpop.eup %2757  ;;  %v1791_v17 = vadd.f32 1.0, %v4355_v33  ;;  %v1995_v52 = vmul.f32 %v1803_v5, %v1227_v46  ;;  %2783 = verf.f32 %v1403_v50  ;;  %v5609_v9 = vld [vmem:[#allocation76_spill] sm:$0xff] }
 0x182   : > { %2113 = vmatpush2.msra.mxu1 %v5606_v59  ;;  %v1409_v48 = vmul.f32 0.70710677, %v5607_v30  ;;  %v4478_v51 = vpop.f32.mrf.mxu0  ;;  %v4480_v36 = vpop.eup %2759  ;;  %v1790_v15 = vadd.f32 1.0, %v4339_v49  ;;  %v1994_v25 = vmul.f32 %v1802_v55, %v4403_v12  ;;  %2785 = verf.f32 %v1309_v53  ;;  %v5610_v5 = vld [vmem:[#allocation32_spill] sm:$0xff] }
 0x183   : > { %2114 = vmatprep.subr.mxu1 %v2001_v21  ;;  %5608 = vst [vmem:[#allocation73_spill] sm:$0xff] %v4478_v51  ;;  %v1315_v59 = vmul.f32 0.70710677, %v5609_v9  ;;  %v4485_v54 = vpop.eup %2761  ;;  %v1989_v33 = vmul.f32 %v1797_v34, %v4368_v41  ;;  %v4489_v46 = vmul.f32 0.5, %v5564_v29  ;;  %2787 = verf.f32 %v1408_v22  ;;  %v4492_v21 = vpop.f32.mrf.mxu1  ;;  %v5614_v22 = vld [vmem:[#allocation7_spill] sm:$0xff] }
 0x184   : > { %2115 = vmatpush2.msra.mxu1 %v2000_v16  ;;  %v1414_v50 = vmul.f32 0.70710677, %v5610_v5  ;;  %5611 = vst [vmem:[#allocation25_spill] sm:$0xff] %v4492_v21  ;;  %v4494_v49 = vpop.f32.mrf.mxu0  ;;  %v4496_v12 = vpop.eup %2763  ;;  %v1744_v55 = vadd.f32 1.0, %v4346_v20  ;;  %v1988_v53 = vmul.f32 %v1796_v13, %v4342_v58  ;;  %2789 = verf.f32 %v1314_v3  ;;  %v5613_v16 = vld [vmem:[#allocation8_spill] sm:$0xff]  ;;  %v5616_v21 = vld [vmem:[#allocation34_spill] sm:$0xff] }
 0x185   : > { %2116 = vmatprep.subr.mxu1 %v1995_v52  ;;  %5612 = vst [vmem:[#allocation74_spill] sm:$0xff] %v4494_v49  ;;  %v1320_v41 = vmul.f32 0.70710677, %v5613_v16  ;;  %v4501_v29 = vpop.eup %2765  ;;  %v1977_v34 = vmul.f32 %v4436_v62, %v5614_v22  ;;  %v5615_v52 = vld [vmem:[#allocation80_spill] sm:$0xff]  ;;  %2791 = verf.f32 %v1409_v48  ;;  %v1415_v49 = vmul.f32 0.70710677, %v5616_v21 }
 0x186   : > { %2117 = vmatpush2.msra.mxu1 %v1994_v25  ;;  %v1983_v51 = vmul.f32 %v1791_v17, %v5615_v52  ;;  %v4507_v5 = vpop.f32.mrf.mxu0  ;;  %v4509_v20 = vpop.eup %2767  ;;  %v5618_v58 = vld [vmem:[#allocation12_spill] sm:$0xff]  ;;  %v1745_v13 = vadd.f32 1.0, %v4365_v0  ;;  %2793 = verf.f32 %v1315_v59  ;;  %v5619_v25 = vld [vmem:[#allocation5_spill] sm:$0xff]  ;;  %v5620_v62 = vld [vmem:[#allocation23_spill] sm:$0xff]  ;;  %v1187_v48 = vmul.f32 0.5, %v5567_v27 }
 0x187   : > { %2118 = vmatprep.subr.mxu1 %v1989_v33  ;;  %5617 = vst [vmem:[#allocation20_spill] sm:$0xff] %v4507_v5  ;;  %v1982_v3 = vmul.f32 %v1790_v15, %v5618_v58  ;;  %v1321_v16 = vmul.f32 0.70710677, %v5619_v25  ;;  %v4514_v9 = vpop.eup %2769  ;;  %v4517_v17 = vmul.f32 %v1739_v63, %v5620_v62  ;;  %2795 = verf.f32 %v1414_v50  ;;  %v5621_v33 = vld [vmem:[#allocation54_spill] sm:$0xff]  ;;  %v4521_v52 = vpop.f32.mrf.mxu1  ;;  %v5624_v59 = vld [vmem:[#allocation67_spill] sm:$0xff] }
 0x188   : > { %2119 = vmatpush2.msra.mxu1 %v1988_v53  ;;  %v1420_v22 = vmul.f32 0.70710677, %v5621_v33  ;;  %5622 = vst [vmem:[#allocation75_spill] sm:$0xff] %v4521_v52  ;;  %v4523_v15 = vpop.f32.mrf.mxu0  ;;  %v4525_v0 = vpop.eup %2771  ;;  %v4528_v58 = vmul.f32 %v1744_v55, %v5624_v59  ;;  %v1750_v53 = vadd.f32 1.0, %v4383_v18  ;;  %2797 = verf.f32 %v1320_v41  ;;  %v5625_v63 = vld [vmem:[#allocation38_spill] sm:$0xff]  ;;  %v5629_v59 = vld [vmem:[#allocation31_spill] sm:$0xff] }
 0x189   : > { %2120 = vmatprep.subr.mxu1 %v1983_v51  ;;  %5623 = vst [vmem:[#allocation7_spill] sm:$0xff] %v4523_v15  ;;  %v1326_v62 = vmul.f32 0.70710677, %v5625_v63  ;;  %v4532_v27 = vpop.eup %2773  ;;  %v1763_v50 = vadd.f32 1.0, %v4461_v40  ;;  %v4536_v51 = vmul.f32 0.5, %v4016_v35  ;;  %2799 = verf.f32 %v1415_v49  ;;  %v5626_v15 = vld [vmem:[#allocation43_spill] sm:$0xff] }
 0x18a   : > { %2121 = vmatpush2.msra.mxu1 %v1982_v3  ;;  %v1421_v5 = vmul.f32 0.70710677, %v5626_v15  ;;  %v4539_v52 = vpop.f32.mrf.mxu0  ;;  %v4541_v55 = vpop.eup %2775  ;;  %v4544_v18 = vmul.f32 %v1745_v13, %v4332_v39  ;;  %v4547_v41 = vmul.f32 0.5, %v5571_v4  ;;  %2801 = verf.f32 %v1321_v16  ;;  %v5628_v3 = vld [vmem:[#allocation42_spill] sm:$0xff] }
 0x18b   : > { %2122 = vmatprep.subr.mxu1 %v1977_v34  ;;  %5627 = vst [vmem:[#allocation80_spill] sm:$0xff] %v4539_v52  ;;  %v1327_v40 = vmul.f32 0.70710677, %v5628_v3  ;;  %v4551_v35 = vpop.eup %2777  ;;  %v1751_v49 = vadd.f32 1.0, %v4397_v6  ;;  %v4555_v34 = vmul.f32 0.5, %v4023_v44  ;;  %2803 = verf.f32 %v1420_v22  ;;  %v4559_v39 = vpop.f32.mrf.mxu1  ;;  %v5632_v44 = vld [vmem:[#allocation40_spill] sm:$0xff] }
 0x18c   : > { %2123 = vmatpush2.msra.mxu1 %v4420_v10  ;;  %v1426_v52 = vmul.f32 0.70710677, %v5629_v59  ;;  %5630 = vst [vmem:[#allocation34_spill] sm:$0xff] %v4559_v39  ;;  %v4561_v4 = vpop.f32.mrf.mxu0  ;;  %v4563_v16 = vpop.eup %2779  ;;  %v4566_v10 = vmul.f32 %v1750_v53, %v4361_v42  ;;  %v4569_v13 = vmul.f32 0.5, %v5575_v43  ;;  %2805 = verf.f32 %v1326_v62 }
 0x18d   : > { %2124 = vmatprep.subr.mxu1 %v4400_v37  ;;  %5631 = vst [vmem:[#allocation12_spill] sm:$0xff] %v4561_v4  ;;  %v1332_v6 = vmul.f32 0.70710677, %v5632_v44  ;;  %v4573_v22 = vpop.eup %2781  ;;  %v1756_v37 = vadd.f32 1.0, %v4444_v19  ;;  %v1955_v59 = vmul.f32 %v1763_v50, %v1187_v48  ;;  %2807 = verf.f32 %v1421_v5  ;;  %v5633_v4 = vld [vmem:[#allocation26_spill] sm:$0xff]  ;;  %v5638_v48 = vld [vmem:[#allocation59_spill] sm:$0xff] }
 0x18e   : > { %2125 = vmatpush2.msra.mxu1 %v4379_v45  ;;  %v1427_v39 = vmul.f32 0.70710677, %v5633_v4  ;;  %v4578_v42 = vpop.f32.mrf.mxu0  ;;  %v4580_v53 = vpop.eup %2783  ;;  %v4583_v43 = vmul.f32 0.5, %v4030_v61  ;;  %v4586_v62 = vmul.f32 0.5, %v4032_v32  ;;  %2809 = verf.f32 %v1327_v40  ;;  %v5637_v45 = vld [vmem:[#allocation36_spill] sm:$0xff]  ;;  %v5639_v61 = vld [vmem:[#allocation79_spill] sm:$0xff] }
 0x18f   : > { %2126 = vmatprep.subr.mxu1 %v4349_v14  ;;  %5634 = vst [vmem:[#allocation5_spill] sm:$0xff] %v4578_v42  ;;  %v1333_v44 = vmul.f32 0.70710677, %v5637_v45  ;;  %v4590_v19 = vpop.eup %2785  ;;  %v4593_v5 = vmul.f32 %v1751_v49, %v4393_v24  ;;  %v1757_v14 = vadd.f32 1.0, %v4449_v1  ;;  %2811 = verf.f32 %v1426_v52  ;;  %v4598_v42 = vpop.f32.mrf.mxu1  ;;  %v5643_v24 = vld [vmem:[#allocation48_spill] sm:$0xff]  ;;  %v5644_v52 = vld [vmem:[#allocation58_spill] sm:$0xff] }
 0x190   : > { %5635 = vst [vmem:[#allocation23_spill] sm:$0xff] %v4583_v43  ;;  %5636 = vst [vmem:[#allocation54_spill] sm:$0xff] %v4586_v62  ;;  %2127 = vmatpush2.msra.mxu1 %v4323_v47  ;;  %v1432_v50 = vmul.f32 0.70710677, %v5638_v48  ;;  %v4600_v32 = vpop.f32.mrf.mxu0  ;;  %v4602_v40 = vpop.eup %2787  ;;  %v4605_v47 = vmul.f32 0.5, %v4037_v7  ;;  %v4608_v43 = vmul.f32 0.5, %v4039_v56  ;;  %2813 = verf.f32 %v1332_v6 }
 0x191   : > { %2128 = vmatprep.subr.mxu1 %v5639_v61  ;;  %5640 = vst [vmem:[#allocation67_spill] sm:$0xff] %v4600_v32  ;;  %v1338_v1 = vmul.f32 0.70710677, %v5643_v24  ;;  %v4612_v49 = vpop.eup %2789  ;;  %v4615_v61 = vmul.f32 %v1756_v37, %v4415_v8  ;;  %v1762_v32 = vadd.f32 1.0, %v4456_v11  ;;  %2815 = verf.f32 %v1427_v39  ;;  %v5645_v62 = vld [vmem:[#allocation64_spill] sm:$0xff]  ;;  %v5651_v39 = vld [vmem:[#allocation13_spill] sm:$0xff] }
 0x192   : > { %5641 = vst [vmem:[#allocation38_spill] sm:$0xff] %v4605_v47  ;;  %5642 = vst [vmem:[#allocation43_spill] sm:$0xff] %v4608_v43  ;;  %2129 = vmatpush2.msra.mxu1 %v5644_v52  ;;  %v1433_v48 = vmul.f32 0.70710677, %v5645_v62  ;;  %v4619_v7 = vpop.f32.mrf.mxu0  ;;  %v4621_v56 = vpop.eup %2791  ;;  %v4624_v6 = vmul.f32 0.5, %v4048_v26  ;;  %v4627_v52 = vmul.f32 0.5, %v4050_v38  ;;  %2817 = verf.f32 %v1333_v44 }
 0x193   : > { %2137 = vmatprep.subr.mxu1 %v1955_v59  ;;  %5646 = vst [vmem:[#allocation42_spill] sm:$0xff] %v4619_v7  ;;  %v5649_v47 = vld [vmem:[#allocation49_spill] sm:$0xff]  ;;  %v4630_v37 = vpop.eup %2793  ;;  %v4633_v11 = vmul.f32 %v1757_v14, %v4431_v60  ;;  %v4636_v59 = vmul.f32 0.5, %v4059_v28  ;;  %2819 = verf.f32 %v1432_v50  ;;  %v1438_v7 = vmul.f32 0.70710677, %v5651_v39  ;;  %v4639_v43 = vpop.f32.mrf.mxu1  ;;  %v5656_v60 = vld [vmem:[#allocation52_spill] sm:$0xff] }
 0x194   : > { %5647 = vst [vmem:[#allocation26_spill] sm:$0xff] %v4624_v6  ;;  %5648 = vst [vmem:[#allocation36_spill] sm:$0xff] %v4627_v52  ;;  %v1339_v8 = vmul.f32 0.70710677, %v5649_v47  ;;  %v4641_v26 = vpop.f32.mrf.mxu0  ;;  %v4643_v38 = vpop.eup %2795  ;;  %v1768_v44 = vadd.f32 1.0, %v4469_v23  ;;  %v5654_v6 = vld [vmem:[#allocation16_spill] sm:$0xff]  ;;  %2821 = verf.f32 %v1338_v1  ;;  %v4653_v28 = vmul.f32 %v1762_v32, %v4489_v46 }
 0x195   : > { %5650 = vst [vmem:[#allocation79_spill] sm:$0xff] %v4636_v59  ;;  %5652 = vst [vmem:[#allocation48_spill] sm:$0xff] %v4641_v26  ;;  %v4647_v52 = vmul.f32 0.5, %v5654_v6  ;;  %v1344_v14 = vmul.f32 0.70710677, %v5656_v60  ;;  %v4650_v47 = vpop.eup %2797  ;;  %v5658_v50 = vld [vmem:[#allocation17_spill] sm:$0xff]  ;;  %2823 = verf.f32 %v1433_v48 }
 0x196   : > { %5653 = vst [vmem:[#allocation58_spill] sm:$0xff] %v4643_v38  ;;  %5657 = vst [vmem:[#allocation82_spill] sm:$0xff] %v4650_v47  ;;  %v4656_v59 = vmul.f32 0.5, %v5658_v50  ;;  %v5660_v26 = vld [vmem:[#allocation15_spill] sm:$0xff]  ;;  %v4659_v62 = vpop.f32.mrf.mxu0  ;;  %v4661_v23 = vpop.eup %2799  ;;  %2825 = verf.f32 %v1339_v8  ;;  %v5665_v1 = vld [vmem:[#allocation56_spill] sm:$0xff]  ;;  %v1674_v46 = vadd.f32 1.0, %v4474_v2  ;;  %v4681_v8 = vmul.f32 %v1768_v44, %v4536_v51 }
 0x197   : > { %5655 = vst [vmem:[#allocation16_spill] sm:$0xff] %v4647_v52  ;;  %v1439_v39 = vmul.f32 0.70710677, %v5660_v26  ;;  %5661 = vst [vmem:[#allocation83_spill] sm:$0xff] %v4659_v62  ;;  %v5663_v6 = vld [vmem:[#allocation19_spill] sm:$0xff]  ;;  %v4667_v38 = vpop.eup %2801  ;;  %v5667_v32 = vld [vmem:[#allocation22_spill] sm:$0xff]  ;;  %2827 = verf.f32 %v1438_v7  ;;  %v4674_v62 = vpop.f32.mrf.mxu1 }
 0x198   : > { %5659 = vst [vmem:[#allocation17_spill] sm:$0xff] %v4656_v59  ;;  %5662 = vst [vmem:[#allocation84_spill] sm:$0xff] %v4661_v23  ;;  %v4664_v52 = vmul.f32 0.5, %v5663_v6  ;;  %v1345_v60 = vmul.f32 0.70710677, %v5665_v1  ;;  %v4671_v50 = vmul.f32 0.5, %v5667_v32  ;;  %v4676_v23 = vpop.f32.mrf.mxu0  ;;  %v4678_v6 = vpop.eup %2803  ;;  %2829 = verf.f32 %v1344_v14 }
 0x199   : > { %5666 = vst [vmem:[#allocation85_spill] sm:$0xff] %v4667_v38  ;;  %v5669_v48 = vld [vmem:[#allocation61_spill] sm:$0xff]  ;;  %5670 = vst [vmem:[#allocation86_spill] sm:$0xff] %v4676_v23  ;;  %v5674_v38 = vlaneseq  ;;  %v4687_v32 = vpop.eup %2805  ;;  %v1769_v7 = vadd.f32 1.0, %v4480_v36  ;;  %2831 = verf.f32 %v1439_v39  ;;  %v2054_v51 = vld [vmem:[%s5247_s2] sm:$0x3]  ;;  %v4707_v39 = vmul.f32 %v1674_v46, %v4547_v41 }
 0x19a   : > { %5664 = vst [vmem:[#allocation19_spill] sm:$0xff] %v4664_v52  ;;  %5668 = vst [vmem:[#allocation22_spill] sm:$0xff] %v4671_v50  ;;  %v1350_v59 = vmul.f32 0.70710677, %v5669_v48  ;;  %v5673_v47 = vld [vmem:[#allocation9_spill] sm:$0xff]  ;;  %v5677_v50 = vld [vmem:[#allocation24_spill] sm:$0xff]  ;;  %v4697_v44 = vpop.f32.mrf.mxu0  ;;  %v4699_v14 = vpop.eup %2807  ;;  %2833 = verf.f32 %v1345_v60 }
 0x19b   : > { %5671 = vst [vmem:[#allocation87_spill] sm:$0xff] %v4678_v6  ;;  %5672 = vst [vmem:[#allocation88_spill] sm:$0xff] %v4681_v8  ;;  %v1351_v52 = vmul.f32 0.70710677, %v5673_v47  ;;  %v4685_v2 = vshrl.u32 %v5674_v38, 7  ;;  %v4691_v48 = vmul.f32 0.5, %v5677_v50  ;;  %v4704_v50 = vpop.eup %2809 }
 0x19c   : > { %5676 = vst [vmem:[#allocation90_spill] sm:$0xff] %v4687_v32  ;;  %v5679_v23 = vld [vmem:[#allocation65_spill] sm:$0xff]  ;;  %5680 = vst [vmem:[#allocation91_spill] sm:$0xff] %v4697_v44  ;;  %v5682_v38 = vld [vmem:[#allocation10_spill] sm:$0xff]  ;;  %2835 = verf.f32 %v1350_v59  ;;  %v4711_v44 = vpop.f32.mrf.mxu1  ;;  %v4715_v60 = vpop.eup %2811  ;;  %v4723_v41 = vmul.f32 0.5, %v5601_v31 }
 0x19d   : > { %5675 = vst [vmem:[#allocation89_spill] sm:$0xff] %v4685_v2  ;;  %5678 = vst [vmem:[#allocation24_spill] sm:$0xff] %v4691_v48  ;;  %v1356_v1 = vmul.f32 0.70710677, %v5679_v23  ;;  %v1357_v8 = vmul.f32 0.70710677, %v5682_v38  ;;  %2837 = verf.f32 %v1351_v52  ;;  %v4720_v26 = vpop.eup %2813  ;;  %v4734_v52 = vmul.f32 %v1769_v7, %v4555_v34 }
 0x19e   : > { %5681 = vst [vmem:[#allocation92_spill] sm:$0xff] %v4699_v14  ;;  %v2058_v6 = vsub.s32 0, %v4685_v2  ;;  %v2062_v36 = vsub.s32 1, %v4685_v2  ;;  %5683 = vst [vmem:[#allocation93_spill] sm:$0xff] %v4704_v50  ;;  %v1675_v48 = vadd.f32 1.0, %v4485_v54  ;;  %v5685_v32 = vld [vmem:[#allocation69_spill] sm:$0xff]  ;;  %v4713_v14 = vpop.f32.mrf.mxu0 }
 0x19f   : > { %5684 = vst [vmem:[#allocation94_spill] sm:$0xff] %v4707_v39  ;;  %v1362_v23 = vmul.f32 0.70710677, %v5685_v32  ;;  %5686 = vst [vmem:[#allocation69_spill] sm:$0xff] %v4713_v14  ;;  %v5688_v38 = vld [vmem:[#allocation14_spill] sm:$0xff]  ;;  %v4726_v54 = vmul.f32 0.5, %v5605_v57  ;;  %2839 = verf.f32 %v1356_v1  ;;  %v4731_v14 = vpop.eup %2815 }
 0x1a0   : > { %5687 = vst [vmem:[#allocation95_spill] sm:$0xff] %v4715_v60  ;;  %v1363_v47 = vmul.f32 0.70710677, %v5688_v38  ;;  %v4718_v2 = vrot.slane %v2054_v51, %v2058_v6  ;;  %v2063_v50 = vrot.slane %v2054_v51, %v2062_v36  ;;  %5690 = vst [vmem:[#allocation96_spill] sm:$0xff] %v4720_v26  ;;  %v5693_v59 = vld [vmem:[#allocation11_spill] sm:$0xff]  ;;  %v4729_v39 = vpop.f32.mrf.mxu0  ;;  %v4737_v6 = vadd.f32 1.0, %v4496_v12  ;;  %v4740_v57 = vpop.eup %2817 }
 0x1a1   : > { %5691 = vst [vmem:[#allocation97_spill] sm:$0xff] %v4723_v41  ;;  %5692 = vst [vmem:[#allocation98_spill] sm:$0xff] %v4726_v54  ;;  %v1368_v46 = vmul.f32 0.70710677, %v5693_v59  ;;  %2841 = verf.f32 %v1357_v8  ;;  %v5698_v31 = vld [vmem:[#allocation63_spill] sm:$0xff]  ;;  %v4743_v1 = vmul.f32 %v1675_v48, %v4569_v13  ;;  %v4746_v36 = vadd.f32 1.0, %v4501_v29  ;;  %v4750_v12 = vpop.f32.mrf.mxu1 }
 0x1a2   : > { %5689 = vst [vmem:[#allocation14_spill] sm:$0xff] %v4718_v2  ;;  %5694 = vst [vmem:[#allocation11_spill] sm:$0xff] %v4729_v39  ;;  %2130 = vmatprep.mubr.f32.mxu1 %v2063_v50  ;;  %v1369_v51 = vmul.f32 0.70710677, %v5698_v31  ;;  %2272 = vmatprep.mubr.f32.mxu0 %v2063_v50  ;;  %2843 = verf.f32 %v1362_v23  ;;  %v5701_v34 = vld [vmem:[#allocation57_spill] sm:$0xff]  ;;  %v4752_v8 = vpop.f32.mrf.mxu0  ;;  %v4757_v39 = vadd.f32 1.0, %v4509_v20 }
 0x1a3   : > { %5695 = vst [vmem:[#allocation99_spill] sm:$0xff] %v4731_v14  ;;  %5696 = vst [vmem:[#allocation100_spill] sm:$0xff] %v4734_v52  ;;  %2131 = vmatmul.mubr.f32.vlgmr.msra.gmra.mxu1 %v4718_v2  ;;  %v1374_v7 = vmul.f32 0.70710677, %v5701_v34  ;;  %v4754_v52 = vpop.eup %2819  ;;  %v4760_v13 = vmul.f32 0.5, %v5607_v30  ;;  %v5706_v48 = vld [vmem:[#allocation76_spill] sm:$0xff]  ;;  %2845 = verf.f32 %v1363_v47 }
 0x1a4   : > { %5697 = vst [vmem:[#allocation101_spill] sm:$0xff] %v4737_v6  ;;  %5699 = vst [vmem:[#allocation63_spill] sm:$0xff] %v4743_v1  ;;  %v4763_v29 = vmul.f32 0.5, %v5706_v48  ;;  %2138 = vmatpush1.msra.mxu1 %v4653_v28  ;;  %2201 = vmatprep.mubr.f32.mxu1 %v2063_v50  ;;  %v4766_v23 = vpop.eup %2821  ;;  %v4769_v2 = vadd.f32 1.0, %v4514_v9  ;;  %v5709_v1 = vld [vmem:[#allocation32_spill] sm:$0xff]  ;;  %2847 = verf.f32 %v1368_v46  ;;  %v4776_v20 = vpop.f32.mrf.mxu0  ;;  %v4781_v47 = vadd.f32 1.0, %v4525_v0 }
 0x1a5   : > { %5700 = vst [vmem:[#allocation102_spill] sm:$0xff] %v4746_v36  ;;  %5702 = vst [vmem:[#allocation57_spill] sm:$0xff] %v4752_v8  ;;  %v4772_v8 = vmul.f32 0.5, %v5709_v1  ;;  %2139 = vmatprep.subr.mxu1 %v4633_v11  ;;  %v1469_v30 = vmul.f32 0.70710677, %v4711_v44  ;;  %v4778_v48 = vpop.eup %2823  ;;  %v5713_v28 = vld [vmem:[#allocation8_spill] sm:$0xff]  ;;  %2849 = verf.f32 %v1369_v51 }
 0x1a6   : > { %5703 = vst [vmem:[#allocation103_spill] sm:$0xff] %v4754_v52  ;;  %5704 = vst [vmem:[#allocation104_spill] sm:$0xff] %v4757_v39  ;;  %v4784_v50 = vmul.f32 0.5, %v5713_v28  ;;  %2140 = vmatpush1.msra.mxu1 %v4615_v61  ;;  %v5715_v9 = vld [vmem:[#allocation51_spill] sm:$0xff]  ;;  %v4788_v46 = vpop.eup %2825  ;;  %v4791_v11 = vadd.f32 1.0, %v4532_v27  ;;  %v4794_v39 = vmul.f32 0.5, %v5616_v21  ;;  %2851 = verf.f32 %v1374_v7  ;;  %v4798_v28 = vpop.f32.mrf.mxu1 }
 0x1a7   : > { %5705 = vst [vmem:[#allocation105_spill] sm:$0xff] %v4760_v13  ;;  %5707 = vst [vmem:[#allocation76_spill] sm:$0xff] %v4763_v29  ;;  %v1375_v1 = vmul.f32 0.70710677, %v5715_v9  ;;  %2141 = vmatprep.subr.mxu1 %v4593_v5  ;;  %v1474_v0 = vmul.f32 0.70710677, %v4750_v12  ;;  %v4800_v51 = vpop.f32.mrf.mxu0  ;;  %v4802_v61 = vpop.eup %2827  ;;  %2853 = verf.f32 %v1469_v30 }
 0x1a8   : > { %5708 = vst [vmem:[#allocation106_spill] sm:$0xff] %v4769_v2  ;;  %5710 = vst [vmem:[#allocation32_spill] sm:$0xff] %v4772_v8  ;;  %v4808_v27 = vmul.f32 0.5, %v5619_v25  ;;  %2142 = vmatpush1.msra.mxu1 %v4566_v10  ;;  %v5721_v21 = vld [vmem:[#allocation39_spill] sm:$0xff]  ;;  %v4812_v7 = vpop.eup %2829  ;;  %v4815_v6 = vadd.f32 1.0, %v4551_v35  ;;  %v4821_v36 = vmul.f32 0.5, %v5621_v33 }
 0x1a9   : > { %5711 = vst [vmem:[#allocation107_spill] sm:$0xff] %v4776_v20  ;;  %5712 = vst [vmem:[#allocation108_spill] sm:$0xff] %v4781_v47  ;;  %v4805_v47 = vadd.f32 1.0, %v4541_v55  ;;  %v1380_v5 = vmul.f32 0.70710677, %v5721_v21  ;;  %v4818_v20 = vadd.f32 1.0, %v4563_v16  ;;  %2143 = vmatprep.subr.mxu1 %v4544_v18  ;;  %2855 = verf.f32 %v1375_v1  ;;  %v4824_v25 = vpop.f32.mrf.mxu0  ;;  %v4826_v55 = vpop.eup %2831 }
 0x1aa   : > { %5714 = vst [vmem:[#allocation8_spill] sm:$0xff] %v4784_v50  ;;  %5716 = vst [vmem:[#allocation51_spill] sm:$0xff] %v4791_v11  ;;  %v4829_v10 = vmul.f32 0.5, %v5625_v63  ;;  %v1468_v30 = vmul.f32 0.70710677, %v4674_v62  ;;  %2144 = vmatpush1.msra.mxu1 %v4528_v58  ;;  %v4834_v16 = vpop.eup %2833  ;;  %v4837_v33 = vadd.f32 1.0, %v4573_v22 }
 0x1ab   : > { %5717 = vst [vmem:[#allocation109_spill] sm:$0xff] %v4794_v39  ;;  %5718 = vst [vmem:[#allocation110_spill] sm:$0xff] %v4800_v51  ;;  %2857 = verf.f32 %v1380_v5  ;;  %v1475_v35 = vmul.f32 0.70710677, %v4798_v28  ;;  %v1463_v18 = vmul.f32 0.70710677, %v4639_v43  ;;  %2145 = vmatprep.subr.mxu1 %v4517_v17 }
 0x1ac   : > { %5719 = vst [vmem:[#allocation111_spill] sm:$0xff] %v4805_v47  ;;  %5720 = vst [vmem:[#allocation112_spill] sm:$0xff] %v4808_v27  ;;  %2859 = verf.f32 %v1474_v0  ;;  %v5728_v1 = vld [vmem:[#allocation35_spill] sm:$0xff]  ;;  %v4842_v47 = vpop.f32.mrf.mxu0  ;;  %v4847_v58 = vadd.f32 1.0, %v4580_v53  ;;  %v4850_v5 = vmul.f32 0.5, %v5626_v15  ;;  %v4857_v17 = vadd.f32 1.0, %v4590_v19 }
 0x1ad   : > { %5722 = vst [vmem:[#allocation39_spill] sm:$0xff] %v4815_v6  ;;  %5723 = vst [vmem:[#allocation113_spill] sm:$0xff] %v4818_v20  ;;  %v1381_v63 = vmul.f32 0.70710677, %v5728_v1  ;;  %v4844_v20 = vpop.eup %2835  ;;  %v1462_v22 = vmul.f32 0.70710677, %v4598_v42  ;;  %2861 = verf.f32 %v1475_v35 }
 0x1ae   : > { %5724 = vst [vmem:[#allocation114_spill] sm:$0xff] %v4821_v36  ;;  %5725 = vst [vmem:[#allocation115_spill] sm:$0xff] %v4824_v25  ;;  %v5732_v51 = vld [vmem:[#allocation47_spill] sm:$0xff]  ;;  %v4854_v2 = vpop.eup %2837  ;;  %v4860_v0 = vmul.f32 0.5, %v5628_v3  ;;  %v5735_v25 = vld [vmem:[#allocation34_spill] sm:$0xff]  ;;  %v4864_v15 = vpop.f32.mrf.mxu0 }
 0x1af   : > { %5726 = vst [vmem:[#allocation116_spill] sm:$0xff] %v4829_v10  ;;  %5727 = vst [vmem:[#allocation117_spill] sm:$0xff] %v4837_v33  ;;  %2146 = vmatpush1.msra.mxu1 %v5732_v51  ;;  %v1457_v41 = vmul.f32 0.70710677, %v5735_v25  ;;  %v5736_v53 = vld [vmem:[#allocation81_spill] sm:$0xff]  ;;  %2863 = verf.f32 %v1381_v63  ;;  %v4869_v51 = vadd.f32 1.0, %v4602_v40 }
 0x1b0   : > { %5729 = vst [vmem:[#allocation35_spill] sm:$0xff] %v4842_v47  ;;  %5730 = vst [vmem:[#allocation118_spill] sm:$0xff] %v4847_v58  ;;  %2147 = vmatprep.subr.mxu1 %v5736_v53  ;;  %v4866_v58 = vpop.eup %2839  ;;  %v5739_v35 = vld [vmem:[#allocation31_spill] sm:$0xff]  ;;  %2865 = verf.f32 %v1468_v30  ;;  %v5742_v3 = vld [vmem:[#allocation66_spill] sm:$0xff]  ;;  %v4879_v53 = vadd.f32 1.0, %v4612_v49  ;;  %v4891_v30 = vadd.f32 1.0, %v4621_v56 }
 0x1b1   : > { %5731 = vst [vmem:[#allocation119_spill] sm:$0xff] %v4850_v5  ;;  %5733 = vst [vmem:[#allocation47_spill] sm:$0xff] %v4857_v17  ;;  %v4872_v11 = vmul.f32 0.5, %v5739_v35  ;;  %v5741_v19 = vld [vmem:[#allocation75_spill] sm:$0xff]  ;;  %2148 = vmatpush1.msra.mxu1 %v5742_v3  ;;  %v4876_v13 = vpop.eup %2841  ;;  %v5744_v63 = vld [vmem:[#allocation40_spill] sm:$0xff]  ;;  %2867 = verf.f32 %v1463_v18  ;;  %v4886_v35 = vpop.f32.mrf.mxu0  ;;  %v4894_v3 = vmul.f32 0.5, %v5633_v4 }
 0x1b2   : > { %5734 = vst [vmem:[#allocation120_spill] sm:$0xff] %v4860_v0  ;;  %5737 = vst [vmem:[#allocation34_spill] sm:$0xff] %v4864_v15  ;;  %v1456_v47 = vmul.f32 0.70710677, %v5741_v19  ;;  %v4882_v6 = vmul.f32 0.5, %v5744_v63  ;;  %v5746_v15 = vld [vmem:[#allocation25_spill] sm:$0xff]  ;;  %2869 = verf.f32 %v1462_v22 }
 0x1b3   : > { %5738 = vst [vmem:[#allocation81_spill] sm:$0xff] %v4869_v51  ;;  %5740 = vst [vmem:[#allocation31_spill] sm:$0xff] %v4872_v11  ;;  %v1451_v8 = vmul.f32 0.70710677, %v5746_v15  ;;  %v5747_v40 = vld [vmem:[#allocation18_spill] sm:$0xff]  ;;  %v4888_v51 = vpop.eup %2843  ;;  %v5751_v49 = vld [vmem:[#allocation29_spill] sm:$0xff]  ;;  %2871 = verf.f32 %v1457_v41  ;;  %v4908_v4 = vpop.f32.mrf.mxu0 }
 0x1b4   : > { %5743 = vst [vmem:[#allocation75_spill] sm:$0xff] %v4879_v53  ;;  %5745 = vst [vmem:[#allocation66_spill] sm:$0xff] %v4882_v6  ;;  %2149 = vmatprep.subr.mxu1 %v5747_v40  ;;  %v1450_v33 = vmul.f32 0.70710677, %v5751_v49  ;;  %v5752_v63 = vld [vmem:[#allocation68_spill] sm:$0xff]  ;;  %v4898_v39 = vpop.eup %2845  ;;  %v4901_v18 = vmul.f32 0.5, %v5637_v45  ;;  %2873 = verf.f32 %v1456_v47 }
 0x1b5   : > { %5748 = vst [vmem:[#allocation40_spill] sm:$0xff] %v4886_v35  ;;  %5749 = vst [vmem:[#allocation25_spill] sm:$0xff] %v4891_v30  ;;  %2150 = vmatpush1.msra.mxu1 %v5752_v63  ;;  %v5754_v40 = vld [vmem:[#allocation59_spill] sm:$0xff]  ;;  %v5756_v17 = vld [vmem:[#allocation41_spill] sm:$0xff]  ;;  %v4910_v30 = vpop.eup %2847  ;;  %v4913_v22 = vadd.f32 1.0, %v4630_v37  ;;  %v4916_v63 = vmul.f32 0.5, %v5643_v24  ;;  %2875 = verf.f32 %v1451_v8  ;;  %v4932_v24 = vpop.f32.mrf.mxu0 }
 0x1b6   : > { %5750 = vst [vmem:[#allocation18_spill] sm:$0xff] %v4894_v3  ;;  %5753 = vst [vmem:[#allocation29_spill] sm:$0xff] %v4901_v18  ;;  %v4904_v35 = vmul.f32 0.5, %v5754_v40  ;;  %v1445_v36 = vmul.f32 0.70710677, %v5756_v17  ;;  %v5757_v56 = vld [vmem:[#allocation21_spill] sm:$0xff]  ;;  %v4920_v54 = vpop.eup %2849  ;;  %2877 = verf.f32 %v1450_v33 }
 0x1b7   : > { %2151 = vmatprep.subr.mxu1 %v5757_v56  ;;  %5758 = vst [vmem:[#allocation59_spill] sm:$0xff] %v4908_v4  ;;  %5759 = vst [vmem:[#allocation41_spill] sm:$0xff] %v4913_v22  ;;  %v5761_v45 = vld [vmem:[#allocation60_spill] sm:$0xff]  ;;  %v5762_v40 = vld [vmem:[#allocation62_spill] sm:$0xff]  ;;  %v2852_v22 = vpop.eup %2851  ;;  %v4958_v33 = vmul.f32 0.5, %v5756_v17  ;;  %v1276_v18 = vmul.f32 0.5, %v4674_v62 }
 0x1b8   : > { %5755 = vst [vmem:[#allocation68_spill] sm:$0xff] %v4904_v35  ;;  %5760 = vst [vmem:[#allocation21_spill] sm:$0xff] %v4916_v63  ;;  %v1444_v53 = vmul.f32 0.70710677, %v5761_v45  ;;  %2152 = vmatpush1.msra.mxu1 %v5762_v40  ;;  %v5763_v41 = vld [vmem:[#allocation58_spill] sm:$0xff]  ;;  %v5767_v29 = vld [vmem:[#allocation64_spill] sm:$0xff]  ;;  %2879 = verf.f32 %v1445_v36 }
 0x1b9   : > { %v4923_v5 = vadd.f32 1.0, %v5763_v41  ;;  %v5765_v56 = vld [vmem:[#allocation82_spill] sm:$0xff]  ;;  %v4929_v11 = vmul.f32 0.5, %v5767_v29  ;;  %v5769_v37 = vld [vmem:[#allocation55_spill] sm:$0xff]  ;;  %v5771_v47 = vld [vmem:[#allocation49_spill] sm:$0xff]  ;;  %v2854_v29 = vpop.eup %2853  ;;  %v4967_v36 = vmul.f32 0.5, %v5751_v49 }
 0x1ba   : > { %v4926_v4 = vadd.f32 1.0, %v5765_v56  ;;  %2153 = vmatprep.subr.mxu1 %v5769_v37  ;;  %5770 = vst [vmem:[#allocation82_spill] sm:$0xff] %v4932_v24  ;;  %v4935_v50 = vmul.f32 0.5, %v5771_v47  ;;  %v5773_v40 = vld [vmem:[#allocation13_spill] sm:$0xff]  ;;  %v5775_v41 = vld [vmem:[#allocation52_spill] sm:$0xff]  ;;  %v4951_v24 = vmul.f32 0.5, %v5761_v45  ;;  %2881 = verf.f32 %v1444_v53 }
 0x1bb   : > { %5764 = vst [vmem:[#allocation60_spill] sm:$0xff] %v4923_v5  ;;  %5768 = vst [vmem:[#allocation58_spill] sm:$0xff] %v4929_v11  ;;  %v4938_v3 = vmul.f32 0.5, %v5773_v40  ;;  %v4941_v5 = vmul.f32 0.5, %v5775_v41  ;;  %v5777_v56 = vld [vmem:[#allocation53_spill] sm:$0xff]  ;;  %v5780_v37 = vld [vmem:[#allocation56_spill] sm:$0xff]  ;;  %v2856_v40 = vpop.eup %2855 }
 0x1bc   : > { %5766 = vst [vmem:[#allocation62_spill] sm:$0xff] %v4926_v4  ;;  %5772 = vst [vmem:[#allocation64_spill] sm:$0xff] %v4935_v50  ;;  %2154 = vmatpush1.msra.mxu1 %v5777_v56  ;;  %v5778_v4 = vld [vmem:[#allocation15_spill] sm:$0xff]  ;;  %v4948_v10 = vmul.f32 0.5, %v5780_v37  ;;  %v5782_v47 = vld [vmem:[#allocation28_spill] sm:$0xff]  ;;  %v4964_v37 = vpop.f32.mrf.mxu0  ;;  %v2858_v45 = vpop.eup %2857  ;;  %v4973_v53 = vmul.f32 0.5, %v5746_v15 }
 0x1bd   : > { %5774 = vst [vmem:[#allocation55_spill] sm:$0xff] %v4938_v3  ;;  %5776 = vst [vmem:[#allocation49_spill] sm:$0xff] %v4941_v5  ;;  %v4945_v8 = vmul.f32 0.5, %v5778_v4  ;;  %2155 = vmatprep.subr.mxu1 %v5782_v47  ;;  %v5783_v41 = vld [vmem:[#allocation61_spill] sm:$0xff]  ;;  %v5785_v27 = vld [vmem:[#allocation46_spill] sm:$0xff]  ;;  %v4986_v49 = vmul.f32 0.5, %v5735_v25 }
 0x1be   : > { %5781 = vst [vmem:[#allocation52_spill] sm:$0xff] %v4951_v24  ;;  %v4955_v0 = vmul.f32 0.5, %v5783_v41  ;;  %v5784_v56 = vld [vmem:[#allocation9_spill] sm:$0xff]  ;;  %2156 = vmatpush1.msra.mxu1 %v5785_v27  ;;  %5786 = vst [vmem:[#allocation53_spill] sm:$0xff] %v4964_v37  ;;  %v5788_v41 = vld [vmem:[#allocation10_spill] sm:$0xff]  ;;  %v4980_v27 = vmul.f32 0.5, %v5741_v19 }
 0x1bf   : > { %5779 = vst [vmem:[#allocation13_spill] sm:$0xff] %v4945_v8  ;;  %v4961_v4 = vmul.f32 0.5, %v5784_v56  ;;  %v5787_v47 = vld [vmem:[#allocation65_spill] sm:$0xff]  ;;  %v4976_v17 = vmul.f32 0.5, %v5788_v41  ;;  %v2860_v56 = vpop.eup %2859  ;;  %v4983_v37 = vmul.f32 0.5, %v5685_v32  ;;  %v5790_v15 = vld [vmem:[#allocation44_spill] sm:$0xff] }
 0x1c0   : > { %v4970_v35 = vmul.f32 0.5, %v5787_v47  ;;  %v5789_v6 = vld [vmem:[#allocation45_spill] sm:$0xff]  ;;  %v4989_v47 = vmul.f32 0.5, %v5688_v38  ;;  %v2862_v60 = vpop.eup %2861  ;;  %v4993_v41 = vmul.f32 0.5, %v4598_v42  ;;  %v4997_v19 = vmul.f32 0.5, %v4639_v43  ;;  %v5791_v11 = vld [vmem:[#allocation50_spill] sm:$0xff]  ;;  %v5005_v42 = vpop.f32.mrf.mxu0 }
 0x1c1   : > { %2157 = vmatprep.subr.mxu1 %v5789_v6  ;;  %v1176_v6 = vmul.f32 0.5, %v5693_v59  ;;  %v1177_v32 = vmul.f32 0.5, %v5698_v31  ;;  %v2864_v25 = vpop.eup %2863  ;;  %v1277_v38 = vmul.f32 0.5, %v4711_v44  ;;  %v1764_v3 = vadd.f32 1.0, %v2858_v45  ;;  %v5792_v63 = vld [vmem:[#allocation37_spill] sm:$0xff]  ;;  %5793 = vst [vmem:[#allocation15_spill] sm:$0xff] %v5005_v42 }
 0x1c2   : > { %2158 = vmatpush1.msra.mxu1 %v5790_v15  ;;  %v1283_v15 = vmul.f32 0.5, %v4798_v28  ;;  %v2866_v59 = vpop.eup %2865  ;;  %v1759_v14 = vadd.f32 1.0, %v2856_v40  ;;  %v1859_v43 = vadd.f32 1.0, %v2862_v60  ;;  %v1189_v8 = vmul.f32 0.5, %v5728_v1  ;;  %v5794_v50 = vld [vmem:[#allocation6_spill] sm:$0xff]  ;;  %v5795_v28 = vld [vmem:[#allocation33_spill] sm:$0xff] }
 0x1c3   : > { %2159 = vmatprep.subr.mxu1 %v5791_v11  ;;  %v1765_v31 = vadd.f32 1.0, %v2864_v25  ;;  %v2868_v11 = vpop.eup %2867  ;;  %v1758_v24 = vadd.f32 1.0, %v2852_v22  ;;  %v1282_v62 = vmul.f32 0.5, %v4750_v12  ;;  %v1858_v44 = vadd.f32 1.0, %v2860_v56  ;;  %v5796_v1 = vld [vmem:[#allocation78_spill] sm:$0xff]  ;;  %v5797_v52 = vld [vmem:[#allocation77_spill] sm:$0xff] }
 0x1c4   : > { %2160 = vmatpush1.msra.mxu1 %v5792_v63  ;;  %v1188_v45 = vmul.f32 0.5, %v5721_v21  ;;  %v2870_v63 = vpop.eup %2869  ;;  %v1753_v42 = vadd.f32 1.0, %v4920_v54  ;;  %v1853_v5 = vadd.f32 1.0, %v2854_v29  ;;  %v1183_v60 = vmul.f32 0.5, %v5715_v9  ;;  %v5018_v21 = vpop.f32.mrf.mxu0 }
 0x1c5   : > { %2161 = vmatprep.subr.mxu1 %v5794_v50  ;;  %v1957_v40 = vmul.f32 %v1765_v31, %v1189_v8  ;;  %v2872_v25 = vpop.eup %2871  ;;  %v1752_v50 = vadd.f32 1.0, %v4910_v30  ;;  %v1852_v22 = vadd.f32 1.0, %v2866_v59  ;;  %v1182_v12 = vmul.f32 0.5, %v5701_v34  ;;  %5798 = vst [vmem:[#allocation56_spill] sm:$0xff] %v5018_v21  ;;  %v5799_v8 = vld [vmem:[#allocation30_spill] sm:$0xff] }
 0x1c6   : > { %2162 = vmatpush1.msra.mxu1 %v5795_v28  ;;  %v1956_v56 = vmul.f32 %v1764_v3, %v1188_v45  ;;  %v2874_v28 = vpop.eup %2873  ;;  %v1747_v54 = vadd.f32 1.0, %v4898_v39  ;;  %v1847_v29 = vadd.f32 1.0, %v2868_v11  ;;  %v1951_v26 = vmul.f32 %v1759_v14, %v1183_v60  ;;  %v5800_v3 = vld [vmem:[#allocation72_spill] sm:$0xff]  ;;  %v5801_v14 = vld [vmem:[#allocation71_spill] sm:$0xff] }
 0x1c7   : > { %2163 = vmatprep.subr.mxu1 %v5796_v1  ;;  %v2051_v9 = vmul.f32 %v1859_v43, %v1283_v15  ;;  %2208 = vmatprep.subr.mxu0 %v1957_v40  ;;  %v2876_v31 = vpop.eup %2875  ;;  %v1746_v30 = vadd.f32 1.0, %v4888_v51  ;;  %v1846_v59 = vadd.f32 1.0, %v2870_v63  ;;  %v1950_v1 = vmul.f32 %v1758_v24, %v1182_v12  ;;  %v5802_v24 = vld [vmem:[#allocation70_spill] sm:$0xff]  ;;  %v5803_v12 = vld [vmem:[#allocation96_spill] sm:$0xff] }
 0x1c8   : > { %2164 = vmatpush1.msra.mxu1 %v5797_v52  ;;  %v2050_v34 = vmul.f32 %v1858_v44, %v1282_v62  ;;  %2209 = vmatpush1.msra.mxu0 %v1956_v56  ;;  %v2878_v52 = vpop.eup %2877  ;;  %v1741_v45 = vadd.f32 1.0, %v4876_v13  ;;  %v1841_v21 = vadd.f32 1.0, %v2872_v25  ;;  %v1945_v39 = vmul.f32 %v1753_v42, %v1177_v32  ;;  %v5028_v62 = vpop.f32.mrf.mxu0  ;;  %v5804_v56 = vld [vmem:[#allocation103_spill] sm:$0xff] }
 0x1c9   : > { %2165 = vmatprep.subr.mxu1 %v5799_v8  ;;  %v2045_v11 = vmul.f32 %v1853_v5, %v1277_v38  ;;  %2210 = vmatprep.subr.mxu0 %v1951_v26  ;;  %v2880_v15 = vpop.eup %2879  ;;  %v1740_v43 = vadd.f32 1.0, %v4866_v58  ;;  %v1840_v60 = vadd.f32 1.0, %v2874_v28  ;;  %v1944_v51 = vmul.f32 %v1752_v50, %v1176_v6  ;;  %v5806_v28 = vld [vmem:[#allocation52_spill] sm:$0xff]  ;;  %v5810_v8 = vld [vmem:[#allocation13_spill] sm:$0xff] }
 0x1ca   : > { %2166 = vmatpush1.msra.mxu1 %v5800_v3  ;;  %v2044_v63 = vmul.f32 %v1852_v22, %v1276_v18  ;;  %2211 = vmatpush1.msra.mxu0 %v1950_v1  ;;  %v2882_v44 = vpop.eup %2881  ;;  %v1735_v13 = vadd.f32 1.0, %v4854_v2  ;;  %v1835_v40 = vadd.f32 1.0, %v2876_v31  ;;  %v1939_v5 = vmul.f32 %v1747_v54, %v4989_v47  ;;  %v5812_v1 = vld [vmem:[#allocation99_spill] sm:$0xff]  ;;  %v5813_v3 = vld [vmem:[#allocation21_spill] sm:$0xff] }
 0x1cb   : > { %2167 = vmatprep.subr.mxu1 %v5801_v14  ;;  %v2039_v32 = vmul.f32 %v1847_v29, %v4997_v19  ;;  %2212 = vmatprep.subr.mxu0 %v1945_v39  ;;  %v1734_v26 = vadd.f32 1.0, %v4844_v20  ;;  %v1834_v58 = vadd.f32 1.0, %v2878_v52  ;;  %v1938_v18 = vmul.f32 %v1746_v30, %v4983_v37  ;;  %v5808_v29 = vld [vmem:[#allocation93_spill] sm:$0xff]  ;;  %v5811_v30 = vld [vmem:[#allocation90_spill] sm:$0xff] }
 0x1cc   : > { %2168 = vmatpush1.msra.mxu1 %v5802_v24  ;;  %v2038_v6 = vmul.f32 %v1846_v59, %v4993_v41  ;;  %2213 = vmatpush1.msra.mxu0 %v1944_v51  ;;  %v1729_v38 = vadd.f32 1.0, %v4834_v16  ;;  %v1829_v42 = vadd.f32 1.0, %v2880_v15  ;;  %v1933_v2 = vmul.f32 %v1741_v45, %v4976_v17  ;;  %v5042_v41 = vpop.f32.mrf.mxu0  ;;  %v5814_v45 = vld [vmem:[#allocation55_spill] sm:$0xff]  ;;  %v5816_v15 = vld [vmem:[#allocation29_spill] sm:$0xff] }
 0x1cd   : > { %2169 = vmatprep.subr.mxu1 %v2051_v9  ;;  %v2033_v47 = vmul.f32 %v1841_v21, %v4986_v49  ;;  %2214 = vmatprep.subr.mxu0 %v1939_v5  ;;  %v1728_v19 = vadd.f32 1.0, %v4812_v7  ;;  %v1828_v25 = vadd.f32 1.0, %v2882_v44  ;;  %v1932_v20 = vmul.f32 %v1740_v43, %v4970_v35  ;;  %v5805_v21 = vld [vmem:[#allocation49_spill] sm:$0xff]  ;;  %v5809_v9 = vld [vmem:[#allocation64_spill] sm:$0xff]  ;;  %v5819_v44 = vld [vmem:[#allocation95_spill] sm:$0xff] }
 0x1ce   : > { %2170 = vmatpush2.msra.mxu1 %v2050_v34  ;;  %v2032_v37 = vmul.f32 %v1840_v60, %v4980_v27  ;;  %2215 = vmatpush1.msra.mxu0 %v1938_v18  ;;  %v1723_v16 = vadd.f32 1.0, %v4788_v46  ;;  %v1823_v50 = vadd.f32 1.0, %v4826_v55  ;;  %v1927_v17 = vmul.f32 %v1735_v13, %v4961_v4  ;;  %v5060_v54 = vpop.f32.mrf.mxu0  ;;  %v5817_v60 = vld [vmem:[#allocation58_spill] sm:$0xff] }
 0x1cf   : > { %2171 = vmatprep.subr.mxu1 %v2045_v11  ;;  %v2027_v49 = vmul.f32 %v1835_v40, %v4973_v53  ;;  %2216 = vmatprep.subr.mxu0 %v1933_v2  ;;  %v1722_v7 = vadd.f32 1.0, %v4766_v23  ;;  %v1822_v35 = vadd.f32 1.0, %v4802_v61  ;;  %v1926_v27 = vmul.f32 %v1734_v26, %v4955_v0  ;;  %v5815_v11 = vld [vmem:[#allocation84_spill] sm:$0xff]  ;;  %v5820_v40 = vld [vmem:[#allocation66_spill] sm:$0xff] }
 0x1d0   : > { %2172 = vmatpush2.msra.mxu1 %v2044_v63  ;;  %v2026_v22 = vmul.f32 %v1834_v58, %v4967_v36  ;;  %2217 = vmatpush1.msra.mxu0 %v1932_v20  ;;  %v1717_v46 = vadd.f32 1.0, %v4740_v57  ;;  %v1817_v55 = vadd.f32 1.0, %v4778_v48  ;;  %v1921_v4 = vmul.f32 %v1729_v38, %v4948_v10  ;;  %v5807_v57 = vld [vmem:[#allocation85_spill] sm:$0xff]  ;;  %v5818_v63 = vld [vmem:[#allocation56_spill] sm:$0xff]  ;;  %v5078_v18 = vpop.f32.mrf.mxu0 }
 0x1d1   : > { %2173 = vmatprep.subr.mxu1 %v2039_v32  ;;  %v2021_v53 = vmul.f32 %v1829_v42, %v4958_v33  ;;  %2218 = vmatprep.subr.mxu0 %v1927_v17  ;;  %v1716_v23 = vadd.f32 1.0, %v5803_v12  ;;  %v1816_v61 = vadd.f32 1.0, %v5804_v56  ;;  %v1920_v0 = vmul.f32 %v1728_v19, %v5805_v21  ;;  %v5821_v32 = vld [vmem:[#allocation68_spill] sm:$0xff]  ;;  %v5823_v42 = vld [vmem:[#allocation87_spill] sm:$0xff]  ;;  %v5834_v21 = vld [vmem:[#allocation41_spill] sm:$0xff] }
 0x1d2   : > { %2174 = vmatpush2.msra.mxu1 %v2038_v6  ;;  %v2020_v36 = vmul.f32 %v1828_v25, %v5806_v28  ;;  %2219 = vmatpush1.msra.mxu0 %v1926_v27  ;;  %v1705_v48 = vadd.f32 1.0, %v5807_v57  ;;  %v1711_v10 = vadd.f32 1.0, %v5808_v29  ;;  %v1915_v33 = vmul.f32 %v1723_v16, %v5809_v9  ;;  %v5822_v6 = vld [vmem:[#allocation112_spill] sm:$0xff]  ;;  %v5835_v28 = vld [vmem:[#allocation119_spill] sm:$0xff]  ;;  %v5836_v57 = vld [vmem:[#allocation82_spill] sm:$0xff] }
 0x1d3   : > { %2175 = vmatprep.subr.mxu1 %v2033_v47  ;;  %v2015_v31 = vmul.f32 %v1823_v50, %v5810_v8  ;;  %2220 = vmatprep.subr.mxu0 %v1921_v4  ;;  %v1710_v59 = vadd.f32 1.0, %v5811_v30  ;;  %v1811_v34 = vadd.f32 1.0, %v5812_v1  ;;  %v1914_v52 = vmul.f32 %v1722_v7, %v5813_v3  ;;  %v5824_v47 = vld [vmem:[#allocation92_spill] sm:$0xff]  ;;  %v5827_v50 = vld [vmem:[#allocation18_spill] sm:$0xff]  ;;  %v5828_v7 = vld [vmem:[#allocation15_spill] sm:$0xff] }
 0x1d4   : > { %2176 = vmatpush2.msra.mxu1 %v2032_v37  ;;  %v2014_v39 = vmul.f32 %v1822_v35, %v5814_v45  ;;  %2221 = vmatpush1.msra.mxu0 %v1920_v0  ;;  %v1799_v14 = vadd.f32 1.0, %v5815_v11  ;;  %v1909_v43 = vmul.f32 %v1717_v46, %v5816_v15  ;;  %v2009_v51 = vmul.f32 %v1817_v55, %v5817_v60  ;;  %v5825_v25 = vld [vmem:[#allocation120_spill] sm:$0xff]  ;;  %v5830_v55 = vld [vmem:[#allocation62_spill] sm:$0xff]  ;;  %v5842_v1 = vld [vmem:[#allocation47_spill] sm:$0xff] }
 0x1d5   : > { %2177 = vmatprep.subr.mxu1 %v2027_v49  ;;  %2222 = vmatprep.subr.mxu0 %v1915_v33  ;;  %v1465_v24 = vmul.f32 0.70710677, %v5818_v63  ;;  %v1810_v13 = vadd.f32 1.0, %v5819_v44  ;;  %v1908_v5 = vmul.f32 %v1716_v23, %v5820_v40  ;;  %v2008_v26 = vmul.f32 %v1816_v61, %v5821_v32  ;;  %v5826_v37 = vld [vmem:[#allocation116_spill] sm:$0xff]  ;;  %v5832_v23 = vld [vmem:[#allocation53_spill] sm:$0xff]  ;;  %v5837_v29 = vld [vmem:[#allocation98_spill] sm:$0xff] }
 0x1d6   : > { %2178 = vmatpush2.msra.mxu1 %v2026_v22  ;;  %2223 = vmatpush1.msra.mxu0 %v1914_v52  ;;  %v1470_v58 = vmul.f32 0.70710677, %v5028_v62  ;;  %v1897_v38 = vmul.f32 %v1705_v48, %v5822_v6  ;;  %v1804_v2 = vadd.f32 1.0, %v5823_v42  ;;  %v1805_v19 = vadd.f32 1.0, %v5824_v47  ;;  %v5829_v46 = vld [vmem:[#allocation8_spill] sm:$0xff]  ;;  %v5839_v33 = vld [vmem:[#allocation114_spill] sm:$0xff] }
 0x1d7   : > { %2179 = vmatprep.subr.mxu1 %v2021_v53  ;;  %v1903_v20 = vmul.f32 %v1711_v10, %v5825_v25  ;;  %2224 = vmatprep.subr.mxu0 %v1909_v43  ;;  %v1902_v16 = vmul.f32 %v1710_v59, %v5826_v37  ;;  %v2003_v17 = vmul.f32 %v1811_v34, %v5827_v50  ;;  %2883 = verf.f32 %v1465_v24  ;;  %v5831_v53 = vld [vmem:[#allocation31_spill] sm:$0xff]  ;;  %v5833_v61 = vld [vmem:[#allocation76_spill] sm:$0xff]  ;;  %v5843_v3 = vld [vmem:[#allocation109_spill] sm:$0xff] }
 0x1d8   : > { %2180 = vmatpush2.msra.mxu1 %v2020_v36  ;;  %2225 = vmatpush1.msra.mxu0 %v1908_v5  ;;  %v1471_v49 = vmul.f32 0.70710677, %v5042_v41  ;;  %v1464_v35 = vmul.f32 0.70710677, %v5828_v7  ;;  %2885 = verf.f32 %v1470_v58  ;;  %v1476_v27 = vmul.f32 0.70710677, %v5060_v54 }
 0x1d9   : > { %2181 = vmatprep.subr.mxu1 %v2015_v31  ;;  %2226 = vmatprep.subr.mxu0 %v1903_v20  ;;  %v1477_v22 = vmul.f32 0.70710677, %v5078_v18  ;;  %v1896_v4 = vmul.f32 %v5830_v55, %v5829_v46  ;;  %v2002_v12 = vmul.f32 %v1810_v13, %v5831_v53  ;;  %v1459_v56 = vmul.f32 0.70710677, %v5832_v23  ;;  %v5838_v10 = vld [vmem:[#allocation75_spill] sm:$0xff]  ;;  %v5841_v59 = vld [vmem:[#allocation24_spill] sm:$0xff] }
 0x1da   : > { %2182 = vmatpush2.msra.mxu1 %v2014_v39  ;;  %2227 = vmatpush1.msra.mxu0 %v1902_v16  ;;  %2887 = verf.f32 %v1471_v49  ;;  %v1891_v0 = vmul.f32 %v5834_v21, %v5833_v61  ;;  %v1997_v36 = vmul.f32 %v1805_v19, %v5835_v28  ;;  %v1458_v48 = vmul.f32 0.70710677, %v5836_v57  ;;  %v5840_v31 = vld [vmem:[#allocation59_spill] sm:$0xff]  ;;  %v5844_v45 = vld [vmem:[#allocation40_spill] sm:$0xff]  ;;  %v5846_v15 = vld [vmem:[#allocation117_spill] sm:$0xff] }
 0x1db   : > { %2183 = vmatprep.subr.mxu1 %v2009_v51  ;;  %2228 = vmatprep.subr.mxu0 %v1897_v38  ;;  %2889 = verf.f32 %v1476_v27  ;;  %v1890_v9 = vmul.f32 %v5838_v10, %v5837_v29  ;;  %v1996_v8 = vmul.f32 %v1804_v2, %v5839_v33  ;;  %v1453_v30 = vmul.f32 0.70710677, %v5840_v31  ;;  %v5845_v11 = vld [vmem:[#allocation19_spill] sm:$0xff]  ;;  %v5847_v60 = vld [vmem:[#allocation32_spill] sm:$0xff]  ;;  %v5849_v44 = vld [vmem:[#allocation34_spill] sm:$0xff] }
 0x1dc   : > { %2184 = vmatpush2.msra.mxu1 %v2008_v26  ;;  %2229 = vmatpush1.msra.mxu0 %v1896_v4  ;;  %2891 = verf.f32 %v1477_v22  ;;  %v1885_v34 = vmul.f32 %v5842_v1, %v5841_v59  ;;  %v1991_v52 = vmul.f32 %v1799_v14, %v5843_v3  ;;  %v1452_v39 = vmul.f32 0.70710677, %v5844_v45  ;;  %v5848_v51 = vld [vmem:[#allocation60_spill] sm:$0xff]  ;;  %v5851_v5 = vld [vmem:[#allocation39_spill] sm:$0xff]  ;;  %v5852_v14 = vld [vmem:[#allocation105_spill] sm:$0xff] }
 0x1dd   : > { %2185 = vmatprep.subr.mxu1 %v2003_v17  ;;  %2230 = vmatprep.subr.mxu0 %v1891_v0  ;;  %2893 = verf.f32 %v1464_v35  ;;  %v1884_v43 = vmul.f32 %v5846_v15, %v5845_v11  ;;  %v1990_v24 = vmul.f32 %v5848_v51, %v5847_v60  ;;  %v1447_v13 = vmul.f32 0.70710677, %v5849_v44  ;;  %v5850_v40 = vld [vmem:[#allocation16_spill] sm:$0xff]  ;;  %v5853_v26 = vld [vmem:[#allocation25_spill] sm:$0xff]  ;;  %v5854_v6 = vld [vmem:[#allocation35_spill] sm:$0xff] }
 0x1de   : > { %2186 = vmatpush2.msra.mxu1 %v2002_v12  ;;  %2231 = vmatpush1.msra.mxu0 %v1890_v9  ;;  %2895 = verf.f32 %v1459_v56  ;;  %v1879_v32 = vmul.f32 %v5851_v5, %v5850_v40  ;;  %v1985_v58 = vmul.f32 %v5853_v26, %v5852_v14  ;;  %v1446_v38 = vmul.f32 0.70710677, %v5854_v6  ;;  %v5855_v42 = vld [vmem:[#allocation36_spill] sm:$0xff]  ;;  %v5856_v2 = vld [vmem:[#allocation51_spill] sm:$0xff]  ;;  %v5857_v19 = vld [vmem:[#allocation97_spill] sm:$0xff] }
 0x1df   : > { %2187 = vmatprep.subr.mxu1 %v1997_v36  ;;  %2232 = vmatprep.subr.mxu0 %v1885_v34  ;;  %2897 = verf.f32 %v1458_v48  ;;  %v1878_v47 = vmul.f32 %v5856_v2, %v5855_v42  ;;  %v5858_v25 = vld [vmem:[#allocation81_spill] sm:$0xff]  ;;  %v5859_v37 = vld [vmem:[#allocation115_spill] sm:$0xff]  ;;  %v5861_v17 = vld [vmem:[#allocation106_spill] sm:$0xff] }
 0x1e0   : > { %2188 = vmatpush2.msra.mxu1 %v1996_v8  ;;  %v1984_v20 = vmul.f32 %v5858_v25, %v5857_v19  ;;  %v1441_v16 = vmul.f32 0.70710677, %v5859_v37  ;;  %2233 = vmatpush1.msra.mxu0 %v1884_v43  ;;  %2899 = verf.f32 %v1453_v30  ;;  %v5860_v50 = vld [vmem:[#allocation43_spill] sm:$0xff]  ;;  %v5862_v35 = vld [vmem:[#allocation22_spill] sm:$0xff]  ;;  %v5867_v56 = vld [vmem:[#allocation17_spill] sm:$0xff] }
 0x1e1   : > { %2189 = vmatprep.subr.mxu1 %v1991_v52  ;;  %v1873_v49 = vmul.f32 %v5861_v17, %v5860_v50  ;;  %v5863_v27 = vld [vmem:[#allocation118_spill] sm:$0xff]  ;;  %2901 = verf.f32 %v1452_v39  ;;  %2234 = vmatprep.subr.mxu0 %v1879_v32  ;;  %v5868_v61 = vld [vmem:[#allocation113_spill] sm:$0xff]  ;;  %v5869_v0 = vld [vmem:[#allocation107_spill] sm:$0xff] }
 0x1e2   : > { %2190 = vmatpush2.msra.mxu1 %v1990_v24  ;;  %v1979_v22 = vmul.f32 %v5863_v27, %v5862_v35  ;;  %v5864_v46 = vld [vmem:[#allocation110_spill] sm:$0xff]  ;;  %v1978_v21 = vmul.f32 %v5868_v61, %v5867_v56  ;;  %v1435_v28 = vmul.f32 0.70710677, %v5869_v0  ;;  %2903 = verf.f32 %v1447_v13  ;;  %2235 = vmatpush1.msra.mxu0 %v1878_v47  ;;  %v5870_v36 = vld [vmem:[#allocation23_spill] sm:$0xff]  ;;  %v5871_v48 = vld [vmem:[#allocation101_spill] sm:$0xff] }
 0x1e3   : > { %v1440_v55 = vmul.f32 0.70710677, %v5864_v46  ;;  %2191 = vmatprep.subr.mxu1 %v1985_v58  ;;  %v5865_v4 = vld [vmem:[#allocation54_spill] sm:$0xff]  ;;  %v1966_v29 = vmul.f32 %v5871_v48, %v5870_v36  ;;  %v5872_v10 = vld [vmem:[#allocation79_spill] sm:$0xff]  ;;  %v5874_v8 = vld [vmem:[#allocation57_spill] sm:$0xff]  ;;  %2905 = verf.f32 %v1446_v38  ;;  %2236 = vmatprep.subr.mxu0 %v1873_v49 }
 0x1e4   : > { %v5866_v53 = vld [vmem:[#allocation102_spill] sm:$0xff]  ;;  %2192 = vmatpush2.msra.mxu1 %v1984_v20  ;;  %v5873_v9 = vld [vmem:[#allocation111_spill] sm:$0xff]  ;;  %v1434_v30 = vmul.f32 0.70710677, %v5874_v8  ;;  %v5876_v1 = vld [vmem:[#allocation104_spill] sm:$0xff]  ;;  %2907 = verf.f32 %v1441_v16  ;;  %v2884_v43 = vpop.eup %2883 }
 0x1e5   : > { %v1872_v12 = vmul.f32 %v5866_v53, %v5865_v4  ;;  %v1973_v33 = vmul.f32 %v5873_v9, %v5872_v10  ;;  %2193 = vmatprep.subr.mxu1 %v1979_v22  ;;  %v5875_v59 = vld [vmem:[#allocation38_spill] sm:$0xff]  ;;  %v5878_v52 = vld [vmem:[#allocation108_spill] sm:$0xff]  ;;  %v5879_v11 = vld [vmem:[#allocation11_spill] sm:$0xff]  ;;  %2909 = verf.f32 %v1440_v55  ;;  %v2886_v14 = vpop.eup %2885 }
 0x1e6   : > { %v1967_v34 = vmul.f32 %v5876_v1, %v5875_v59  ;;  %v5877_v3 = vld [vmem:[#allocation26_spill] sm:$0xff]  ;;  %v1429_v15 = vmul.f32 0.70710677, %v5879_v11  ;;  %2194 = vmatpush2.msra.mxu1 %v1978_v21  ;;  %v5880_v60 = vld [vmem:[#allocation27_spill] sm:$0xff]  ;;  %v5881_v24 = vld [vmem:[#allocation73_spill] sm:$0xff]  ;;  %2911 = verf.f32 %v1435_v28  ;;  %v1285_v1 = vmul.f32 0.5, %v5078_v18 }
 0x1e7   : > { %v1972_v39 = vmul.f32 %v5878_v52, %v5877_v3  ;;  %2237 = vmatpush1.msra.mxu0 %v1872_v12  ;;  %v5142_v51 = vmul.f32 0.70710677, %v5880_v60  ;;  %v5145_v13 = vmul.f32 0.70710677, %v5881_v24  ;;  %v5882_v40 = vld [vmem:[#allocation69_spill] sm:$0xff]  ;;  %2195 = vmatprep.subr.mxu1 %v1973_v33  ;;  %v5883_v32 = vld [vmem:[#allocation63_spill] sm:$0xff]  ;;  %v2888_v25 = vpop.eup %2887  ;;  %2913 = verf.f32 %v1434_v30 }
 0x1e8   : > { %v1428_v5 = vmul.f32 0.70710677, %v5882_v40  ;;  %2238 = vmatprep.subr.mxu0 %v5883_v32  ;;  %v5884_v26 = vld [vmem:[#allocation74_spill] sm:$0xff]  ;;  %v5885_v38 = vld [vmem:[#allocation20_spill] sm:$0xff]  ;;  %v5886_v2 = vld [vmem:[#allocation91_spill] sm:$0xff]  ;;  %v2890_v27 = vpop.eup %2889  ;;  %2915 = verf.f32 %v1429_v15  ;;  %v1855_v59 = vadd.f32 1.0, %v2888_v25 }
 0x1e9   : > { %v5150_v58 = vmul.f32 0.70710677, %v5884_v26  ;;  %v5153_v42 = vmul.f32 0.70710677, %v5885_v38  ;;  %v1423_v47 = vmul.f32 0.70710677, %v5886_v2  ;;  %2196 = vmatpush2.msra.mxu1 %v1972_v39  ;;  %v2892_v61 = vpop.eup %2891 }
 0x1ea   : > { %v5887_v19 = vld [vmem:[#allocation94_spill] sm:$0xff]  ;;  %v5888_v20 = vld [vmem:[#allocation7_spill] sm:$0xff]  ;;  %v5889_v50 = vld [vmem:[#allocation80_spill] sm:$0xff]  ;;  %2197 = vmatprep.subr.mxu1 %v1967_v34  ;;  %2917 = verf.f32 %v1428_v5  ;;  %v1860_v9 = vadd.f32 1.0, %v2890_v27  ;;  %v2894_v33 = vpop.eup %2893  ;;  %v1861_v34 = vadd.f32 1.0, %v2892_v61  ;;  %v1854_v39 = vadd.f32 1.0, %v2886_v14 }
 0x1eb   : > { %2239 = vmatpush1.msra.mxu0 %v5887_v19  ;;  %v5158_v16 = vmul.f32 0.70710677, %v5888_v20  ;;  %v1399_v17 = vmul.f32 0.70710677, %v5889_v50  ;;  %v5890_v49 = vld [vmem:[#allocation86_spill] sm:$0xff]  ;;  %v5891_v22 = vld [vmem:[#allocation12_spill] sm:$0xff]  ;;  %2198 = vmatpush2.msra.mxu1 %v1966_v29  ;;  %2919 = verf.f32 %v1423_v47  ;;  %v2896_v3 = vpop.eup %2895 }
 0x1ec   : > { %v1422_v35 = vmul.f32 0.70710677, %v5890_v49  ;;  %v1404_v55 = vmul.f32 0.70710677, %v5891_v22  ;;  %v5892_v4 = vld [vmem:[#allocation5_spill] sm:$0xff]  ;;  %v5893_v12 = vld [vmem:[#allocation83_spill] sm:$0xff]  ;;  %v2898_v5 = vpop.eup %2897  ;;  %v2053_v27 = vmul.f32 %v1861_v34, %v1285_v1 }
 0x1ed   : > { %v1405_v53 = vmul.f32 0.70710677, %v5892_v4  ;;  %v1417_v56 = vmul.f32 0.70710677, %v5893_v12  ;;  %v5894_v21 = vld [vmem:[#allocation42_spill] sm:$0xff]  ;;  %v5895_v36 = vld [vmem:[#allocation48_spill] sm:$0xff] }
 0x1ee   : > { %v1411_v28 = vmul.f32 0.70710677, %v5894_v21  ;;  %v1416_v48 = vmul.f32 0.70710677, %v5895_v36  ;;  %v5896_v10 = vld [vmem:[#allocation100_spill] sm:$0xff]  ;;  %v5898_v52 = vld [vmem:[#allocation67_spill] sm:$0xff]  ;;  %2921 = verf.f32 %v1422_v35  ;;  %2240 = vmatprep.subr.mxu0 %v2053_v27 }
 0x1ef   : > { %2199 = vmatprep.subr.mxu1 %v5896_v10  ;;  %v5897_v30 = vld [vmem:[#allocation88_spill] sm:$0xff]  ;;  %v1410_v29 = vmul.f32 0.70710677, %v5898_v52  ;;  %v1284_v15 = vmul.f32 0.5, %v5060_v54  ;;  %v5899_v32 = vld [vmem:[#allocation14_spill] sm:$0xff]  ;;  %2923 = verf.f32 %v1417_v56  ;;  %v1849_v19 = vadd.f32 1.0, %v2884_v43  ;;  %v2900_v10 = vpop.eup %2899 }
 0x1f0   : > { %2200 = vmatpush2.msra.mxu1 %v5897_v30  ;;  %v1279_v47 = vmul.f32 0.5, %v5042_v41  ;;  %2925 = verf.f32 %v1416_v48  ;;  %v1848_v25 = vadd.f32 1.0, %v2894_v33  ;;  %v1278_v18 = vmul.f32 0.5, %v5028_v62  ;;  %v2902_v30 = vpop.eup %2901 }
 0x1f1   : > { %2202 = vmatmul.mubr.f32.vlgmr.msra.gmra.mxu1 %v5899_v32  ;;  %v2052_v61 = vmul.f32 %v1860_v9, %v1284_v15  ;;  %2927 = verf.f32 %v1411_v28  ;;  %v1843_v35 = vadd.f32 1.0, %v2896_v3  ;;  %v1273_v14 = vmul.f32 0.5, %v5818_v63  ;;  %v2904_v32 = vpop.eup %2903 }
 0x1f2   : > { %v2047_v54 = vmul.f32 %v1855_v59, %v1279_v47  ;;  %2929 = verf.f32 %v1410_v29  ;;  %v1842_v56 = vadd.f32 1.0, %v2898_v5  ;;  %v1272_v43 = vmul.f32 0.5, %v5828_v7  ;;  %v2906_v1 = vpop.eup %2905 }
 0x1f3   : > { %v2046_v41 = vmul.f32 %v1854_v39, %v1278_v18  ;;  %2241 = vmatpush2.msra.mxu0 %v2052_v61  ;;  %2931 = verf.f32 %v1405_v53  ;;  %v1837_v48 = vadd.f32 1.0, %v2900_v10  ;;  %v1267_v62 = vmul.f32 0.5, %v5832_v23  ;;  %v2908_v28 = vpop.eup %2907 }
 0x1f4   : > { %v2041_v9 = vmul.f32 %v1849_v19, %v1273_v14  ;;  %2242 = vmatprep.subr.mxu0 %v2047_v54  ;;  %2933 = verf.f32 %v1404_v55  ;;  %v1836_v33 = vadd.f32 1.0, %v2902_v30  ;;  %v1266_v63 = vmul.f32 0.5, %v5836_v57  ;;  %v2910_v34 = vpop.eup %2909 }
 0x1f5   : > { %v2040_v59 = vmul.f32 %v1848_v25, %v1272_v43  ;;  %2243 = vmatpush2.msra.mxu0 %v2046_v41  ;;  %2935 = verf.f32 %v1399_v17  ;;  %v1831_v3 = vadd.f32 1.0, %v2904_v32  ;;  %v1261_v7 = vmul.f32 0.5, %v5840_v31  ;;  %v2912_v53 = vpop.eup %2911 }
 0x1f6   : > { %v2035_v29 = vmul.f32 %v1843_v35, %v1267_v62  ;;  %2244 = vmatprep.subr.mxu0 %v2041_v9  ;;  %2937 = verf.f32 %v5158_v16  ;;  %v1830_v23 = vadd.f32 1.0, %v2906_v1  ;;  %v1260_v39 = vmul.f32 0.5, %v5844_v45  ;;  %v2914_v55 = vpop.eup %2913 }
 0x1f7   : > { %v2034_v15 = vmul.f32 %v1842_v56, %v1266_v63  ;;  %2245 = vmatpush2.msra.mxu0 %v2040_v59  ;;  %2939 = verf.f32 %v5153_v42  ;;  %v1825_v57 = vadd.f32 1.0, %v2908_v28  ;;  %v1255_v5 = vmul.f32 0.5, %v5849_v44  ;;  %v2916_v32 = vpop.eup %2915 }
 0x1f8   : > { %v2029_v17 = vmul.f32 %v1837_v48, %v1261_v7  ;;  %2246 = vmatprep.subr.mxu0 %v2035_v29  ;;  %2941 = verf.f32 %v5150_v58  ;;  %v1824_v31 = vadd.f32 1.0, %v2910_v34  ;;  %v1254_v19 = vmul.f32 0.5, %v5854_v6  ;;  %v2918_v47 = vpop.eup %2917 }
 0x1f9   : > { %v2028_v16 = vmul.f32 %v1836_v33, %v1260_v39  ;;  %2247 = vmatpush2.msra.mxu0 %v2034_v15  ;;  %2943 = verf.f32 %v5145_v13  ;;  %v1819_v45 = vadd.f32 1.0, %v2912_v53  ;;  %v1249_v27 = vmul.f32 0.5, %v5859_v37  ;;  %v2920_v10 = vpop.eup %2919 }
 0x1fa   : > { %v2023_v42 = vmul.f32 %v1831_v3, %v1255_v5  ;;  %2248 = vmatprep.subr.mxu0 %v2029_v17  ;;  %2945 = verf.f32 %v5142_v51  ;;  %v1818_v44 = vadd.f32 1.0, %v2914_v55  ;;  %v1248_v25 = vmul.f32 0.5, %v5864_v46 }
 0x1fb   : > { %v2022_v58 = vmul.f32 %v1830_v23, %v1254_v19  ;;  %2249 = vmatpush2.msra.mxu0 %v2028_v16  ;;  %v2922_v18 = vpop.eup %2921  ;;  %v1813_v6 = vadd.f32 1.0, %v2916_v32  ;;  %v1243_v61 = vmul.f32 0.5, %v5869_v0  ;;  %v2017_v30 = vmul.f32 %v1825_v57, %v1249_v27 }
 0x1fc   : > { %2250 = vmatprep.subr.mxu0 %v2023_v42  ;;  %v2924_v13 = vpop.eup %2923  ;;  %v1812_v35 = vadd.f32 1.0, %v2918_v47  ;;  %v1242_v37 = vmul.f32 0.5, %v5874_v8  ;;  %v2016_v14 = vmul.f32 %v1824_v31, %v1248_v25  ;;  %v1807_v56 = vadd.f32 1.0, %v2920_v10 }
 0x1fd   : > { %2251 = vmatpush2.msra.mxu0 %v2022_v58  ;;  %v2926_v54 = vpop.eup %2925  ;;  %v1237_v51 = vmul.f32 0.5, %v5879_v11  ;;  %v2011_v43 = vmul.f32 %v1819_v45, %v1243_v61  ;;  %v1806_v41 = vadd.f32 1.0, %v2922_v18  ;;  %v1236_v1 = vmul.f32 0.5, %v5882_v40 }
 0x1fe   : > { %2252 = vmatprep.subr.mxu0 %v2017_v30  ;;  %v2928_v46 = vpop.eup %2927  ;;  %v2010_v48 = vmul.f32 %v1818_v44, %v1242_v37  ;;  %v1801_v62 = vadd.f32 1.0, %v2924_v13  ;;  %v1231_v9 = vmul.f32 0.5, %v5886_v2  ;;  %v1800_v33 = vadd.f32 1.0, %v2926_v54 }
 0x1ff   : > { %2253 = vmatpush2.msra.mxu0 %v2016_v14  ;;  %v2930_v0 = vpop.eup %2929  ;;  %v2005_v28 = vmul.f32 %v1813_v6, %v1237_v51  ;;  %v1230_v63 = vmul.f32 0.5, %v5890_v49  ;;  %v2004_v59 = vmul.f32 %v1812_v35, %v1236_v1  ;;  %v1795_v34 = vadd.f32 1.0, %v2928_v46 }
 0x200   : > { %2254 = vmatprep.subr.mxu0 %v2011_v43  ;;  %v2932_v8 = vpop.eup %2931  ;;  %v1225_v3 = vmul.f32 0.5, %v5893_v12  ;;  %v1999_v7 = vmul.f32 %v1807_v56, %v1231_v9  ;;  %v1794_v29 = vadd.f32 1.0, %v2930_v0  ;;  %v1224_v53 = vmul.f32 0.5, %v5895_v36 }
 0x201   : > { %2255 = vmatpush2.msra.mxu0 %v2010_v48  ;;  %v2934_v11 = vpop.eup %2933  ;;  %v1998_v23 = vmul.f32 %v1806_v41, %v1230_v63  ;;  %v1789_v39 = vadd.f32 1.0, %v2932_v8  ;;  %v1219_v15 = vmul.f32 0.5, %v5894_v21  ;;  %v1218_v5 = vmul.f32 0.5, %v5898_v52  ;;  %v5901_v41 = vld [vmem:[#allocation89_spill] sm:$0xff] }
 0x202   : > { %2256 = vmatprep.subr.mxu0 %v2005_v28  ;;  %v2936_v40 = vpop.eup %2935  ;;  %v1993_v55 = vmul.f32 %v1801_v62, %v1225_v3  ;;  %v1788_v57 = vadd.f32 1.0, %v2934_v11  ;;  %v1992_v17 = vmul.f32 %v1800_v33, %v1224_v53  ;;  %v1213_v31 = vmul.f32 0.5, %v5892_v4 }
 0x203   : > { %2257 = vmatpush2.msra.mxu0 %v2004_v59  ;;  %v2938_v2 = vpop.eup %2937  ;;  %v1783_v32 = vadd.f32 1.0, %v2936_v40  ;;  %v1987_v19 = vmul.f32 %v1795_v34, %v1219_v15  ;;  %v1212_v47 = vmul.f32 0.5, %v5891_v22  ;;  %v1986_v45 = vmul.f32 %v1794_v29, %v1218_v5 }
 0x204   : > { %2258 = vmatprep.subr.mxu0 %v1999_v7  ;;  %v2940_v49 = vpop.eup %2939  ;;  %v1782_v16 = vadd.f32 1.0, %v2938_v2  ;;  %v1207_v42 = vmul.f32 0.5, %v5889_v50  ;;  %v1981_v10 = vmul.f32 %v1789_v39, %v1213_v31  ;;  %v1206_v44 = vmul.f32 0.5, %v5888_v20 }
 0x205   : > { %2259 = vmatpush2.msra.mxu0 %v1998_v23  ;;  %v2942_v12 = vpop.eup %2941  ;;  %v1777_v27 = vadd.f32 1.0, %v2940_v49  ;;  %v1980_v25 = vmul.f32 %v1788_v57, %v1212_v47  ;;  %v1201_v58 = vmul.f32 0.5, %v5885_v38  ;;  %v1200_v22 = vmul.f32 0.5, %v5884_v26  ;;  %v5900_v38 = vld [vmem:[#allocation14_spill] sm:$0xff] }
 0x206   : > { %2260 = vmatprep.subr.mxu0 %v1993_v55  ;;  %v2944_v36 = vpop.eup %2943  ;;  %v1776_v52 = vadd.f32 1.0, %v2942_v12  ;;  %v1975_v18 = vmul.f32 %v1783_v32, %v1207_v42  ;;  %v1974_v61 = vmul.f32 %v1782_v16, %v1206_v44  ;;  %v1195_v30 = vmul.f32 0.5, %v5881_v24 }
 0x207   : > { %2261 = vmatpush2.msra.mxu0 %v1992_v17  ;;  %v2946_v21 = vpop.eup %2945  ;;  %v1771_v4 = vadd.f32 1.0, %v2944_v36  ;;  %v1969_v50 = vmul.f32 %v1777_v27, %v1201_v58  ;;  %v1194_v13 = vmul.f32 0.5, %v5880_v60  ;;  %v3010_v56 = vmov 1966171168  }
 0x208   : > { %2262 = vmatprep.subr.mxu0 %v1987_v19  ;;  %v1770_v6 = vadd.f32 1.0, %v2946_v21  ;;  %v1968_v35 = vmul.f32 %v1776_v52, %v1200_v22  ;;  %v2289_v24 = vunpack.c.l.s4 %v3010_v56  ;;  %v5902_v11 = vlaneseq }
 0x209   : > { %2263 = vmatpush2.msra.mxu0 %v1986_v45  ;;  %v1963_v20 = vmul.f32 %v1771_v4, %v1195_v30 }
 0x20a   : > { %2264 = vmatprep.subr.mxu0 %v1981_v10  ;;  %v1962_v37 = vmul.f32 %v1770_v6, %v1194_v13  ;;  %v2290_v43 = vunpack.c.0.s8 %v2289_v24  ;;  %vm2328_vm2 = vcmp.lt.s32.totalorder %v5902_v11, 768 }
 0x20b   : > { %2265 = vmatpush2.msra.mxu0 %v1980_v25 }
 0x20c   : > { %2266 = vmatprep.subr.mxu0 %v1975_v18  ;;  %v2293_v1 = vsub.s32 %v2290_v43, %v5901_v41 }
 0x20d   : > { %2267 = vmatpush2.msra.mxu0 %v1974_v61 }
 0x20e   : > { %2268 = vmatprep.subr.mxu0 %v1969_v50 }
 0x20f   : > { %2269 = vmatpush2.msra.mxu0 %v1968_v35 }
 0x210   : > { %2270 = vmatprep.subr.mxu0 %v1963_v20 }
 0x211   : > { %2271 = vmatpush2.msra.mxu0 %v1962_v37 }
 0x212   : > { %2273 = vmatmul.mubr.f32.vlgmr.msra.gmra.mxu0 %v5900_v38 }
 0x263   : > { %v2132_v26 = vpop.f32.mrf.mxu1 }
 0x265   : > { %v2134_v14 = vpop.f32.mrf.mxu1 }
 0x266   : > { %v2285_v46 = vcombine.low %v2132_v26, %v2134_v14 }
 0x268   : > { %v2294_v62 = vrot.slane %v2285_v46, %v2293_v1 }
 0x2b1   : > { %v2203_v54 = vpop.f32.mrf.mxu1 }
 0x2b3   : > { %v2205_v51 = vpop.f32.mrf.mxu1 }
 0x2b4   : > { %v2286_v60 = vcombine.low %v2203_v54, %v2205_v51 }
 0x2b6   : > { %v2301_v48 = vrot.slane %v2286_v60, %v2293_v1 }
 0x2b8   : > { %v2309_v28 = vcombine.low %v2294_v62, %v2301_v48 }
 0x2ba   : > { %v2316_v63 = vrot.slane %v2309_v28, %v2293_v1 }
 0x2d2   : > { %v2274_v0 = vpop.f32.mrf.mxu0 }
 0x2d4   : > { %v2276_v9 = vpop.f32.mrf.mxu0 }
 0x2d5   : > { %v2287_v8 = vcombine.low %v2274_v0, %v2276_v9 }
 0x2d7   : > { %v2308_v33 = vrot.slane %v2287_v8, %v2293_v1 }
 0x2d9   : > { %v2323_v59 = vrot.slane %v2308_v33, %v2293_v1 }
 0x2db   : > { %v2324_v34 = vcombine.low %v2316_v63, %v2323_v59 }
 0x2dd   : > { %2330 = vst.msk [vmem:[%s164_s26] sm:$0x3f] %vm2328_vm2, %v2324_v34 }
 0x2de   : > { %2960 = shalt.err (!%p2957_p3)
}
 0x2df   : > { %s2961_s8 = scalar_lea.hbm %s2344_s30, 96  ;;  %s2965_s11 = scalar_lea.hbm %s5248_s3, 192 }
 0x2e0   : > { %p2962_p4 = scmp.ne.s32.totalorder %s2344_s30, %s2961_s8  ;;  %p2966_p9 = scmp.lt.s32.totalorder %s2344_s30, %s5248_s3 }
 0x2e1   : > { %p2967_p10 = scmp.lt.s32.totalorder %s2965_s11, %s2961_s8 }
 0x2e2   : > { %p2963_p7 = pnand %p2962_p4, %p3070_p5 }
 0x2e3   : > { %p2968_p11 = por %p2967_p10, %p2966_p9 }
 0x2e4   : > { %p2964_p8 = pneg %p2963_p7 }
 0x2e6   : > { %p2969_p12 = pnand %p2968_p11, %p2964_p8 }
 0x2e8   : > { %2972 = shalt.err (!%p2969_p12)
}
 0x2e9   : > { %2519 = dma.vmem_to_hbm [thread:$0]  (%p3070_p5), %s2347_s27, 96, %s2344_s30, %s2332_s4  }
 0x2ea PF: > { %p2525_p13 = scmp.ge.s32.totalorder %s3007_s15, 2  ;;  %s2358_s20 = sand.u32 1, %s2995_s12  }
 0x2eb   : > { %s2359_s24 = scalar_lea.sflag [#allocation3], %s2358_s20 }
 0x2ec   : > { %p2522_p0 = pnand %p2525_p13, %p3074_p6 }
 0x2ee   : > { %p2523_p1 = pneg %p2522_p0 }
 0x2f0   : > { %2990 = dma.done.wait (%p2523_p1), %s2359_s24, 96  }
 0x2f1   : > { %2992 = vsyncadd (%p2523_p1), %s2359_s24, 4294967200  ;;  %p13_p2 = scmp.ge.s32.totalorder %s3057_s18, 4   ;;  %s5903_s12 = smov %s2999_s13 }
 0x2f2   : > { %s5904_s13 = smov %s3003_s14  ;;  %s5905_s14 = smov %s3068_s21 }
 0x2f3   : > { %s5906_s15 = smov %s3057_s18  ;;  %15 = sbr.rel (!%p13_p2) target bundleno = 3 (0x3), region = 67 }
 0x2f8   :  { %2364 = vsyncpa [#allocation3], 1 }
 0x2f9   :  { %2366 = vsyncpa [#allocation3 + $0x1], 1 }

</bundles_post_ra>
